<compile_context>
chip_gen: v7x
topology: tpu7x:2x2x1
jax: 0.10.0
libtpu: 0.0.40
codegen_flags: <defaults>
</compile_context>

<pallas_src>
import functools

import jax
import jax.numpy as jnp
from jax import lax
from jax.experimental import pallas as pl
from jax.experimental.pallas import tpu as pltpu

F32 = jnp.float32

FIN = 3
FILTERS = [16, 16, 16]
HEADS = [2, 2, 2]


# ----------------------------------------------------------------------------
# Fused forward kernel: 3x (GATConv + skip + BN(eval) + LeakyReLU) + JK('lstm')
# ----------------------------------------------------------------------------
def _fused_gat_kernel(x_ref, adj0_ref, adj1_ref, adj2_ref,
                      wcat0_ref, vsrc0_ref, scale0_ref, shift0_ref,
                      wcat1_ref, vsrc1_ref, scale1_ref, shift1_ref,
                      wcat2_ref, vsrc2_ref, scale2_ref, shift2_ref,
                      projw_ref, projb_ref,
                      wih_f_ref, whh_f_ref, bf_ref,
                      wih_b_ref, whh_b_ref, bb_ref,
                      attwf_ref, attwb_ref, attb_ref,
                      out_ref, *, heads, feat, nds, hidden):

    def gat_layer(x, adj, wcat_ref, vsrc_ref, scale_ref, shift_ref, nd):
        # Combined projection: [heads*F | a_dst cols | skip cols]
        xall = jnp.dot(x, wcat_ref[...], preferred_element_type=F32)   # [Ns, 2F+H+F]
        xd_all = xall[:nd, :]                                          # dst rows
        # a_src for all heads in one small matmul: [heads, Ns]
        a_src_all = lax.dot_general(vsrc_ref[...], x,
                                    (((1,), (1,)), ((), ())),
                                    preferred_element_type=F32)

        acc = jnp.zeros((nd, feat), F32)
        for h in range(heads):
            xp = xall[:, h * feat:(h + 1) * feat]                      # [Ns, F]
            a_dst = xd_all[:, heads * feat + h:heads * feat + h + 1]   # [nd, 1]
            a_src = a_src_all[h:h + 1, :]                              # [1, Ns]
            e = a_dst + a_src                                          # [nd, Ns]
            e = jnp.where(e > 0, e, 0.2 * e)          # GATConv LeakyReLU(0.2)
            e = jnp.where(adj > 0, e, -1e30)          # mask non-edges
            m = jnp.max(e, axis=1, keepdims=True)
            p = jnp.exp(e - m) * adj
            denom = jnp.maximum(jnp.sum(p, axis=1, keepdims=True), 1e-30)
            attn = p * pl.reciprocal(denom, approx=True)
            acc = acc + jnp.dot(attn, xp, preferred_element_type=F32)  # [nd, F]

        skip = xd_all[:, heads * feat + heads:heads * feat + heads + feat]
        y = acc * (1.0 / heads) + skip                 # concat=False mean + skip
        y = y * scale_ref[...] + shift_ref[...]        # folded bias + BN(eval)
        return jnp.where(y > 0, y, 0.01 * y)           # LeakyReLU

    x = x_ref[...].astype(F32)
    h1 = gat_layer(x, adj0_ref[...], wcat0_ref, vsrc0_ref, scale0_ref,
                   shift0_ref, nds[0])
    h2 = gat_layer(h1, adj1_ref[...], wcat1_ref, vsrc1_ref, scale1_ref,
                   shift1_ref, nds[1])
    h3 = gat_layer(h2, adj2_ref[...], wcat2_ref, vsrc2_ref, scale2_ref,
                   shift2_ref, nds[2])

    # --------------------- JumpingKnowledge('lstm') ---------------------
    nf = nds[2]
    H = hidden
    # proj_lyrs[0]: Linear(inp_dim -> filters[-1]); others are Identity
    x0 = (jnp.dot(x[:nf, :], projw_ref[...], preferred_element_type=F32)
          + projb_ref[...])
    xs = [x0, h1[:nf, :], h2[:nf, :], h3]
    L = len(xs)

    def lstm_step(x_t, h, c, wih, whh, b):
        g = (jnp.dot(x_t, wih, preferred_element_type=F32)
             + jnp.dot(h, whh, preferred_element_type=F32) + b)        # [nf, 4H]
        sg = jax.nn.sigmoid(g)                # full-width (EUP)
        tg = jnp.tanh(g)                      # full-width (EUP)
        i, f, o = sg[:, 0:H], sg[:, H:2 * H], sg[:, 3 * H:4 * H]
        gg = tg[:, 2 * H:3 * H]
        c = f * c + i * gg
        h = o * jnp.tanh(c)
        return h, c

    wih_f, whh_f, bf = wih_f_ref[...], whh_f_ref[...], bf_ref[...]
    wih_b, whh_b, bb = wih_b_ref[...], whh_b_ref[...], bb_ref[...]

    # forward direction
    h = jnp.zeros((nf, H), F32)
    c = jnp.zeros((nf, H), F32)
    hf = []
    for t in range(L):
        h, c = lstm_step(xs[t], h, c, wih_f, whh_f, bf)
        hf.append(h)
    # backward direction
    h = jnp.zeros((nf, H), F32)
    c = jnp.zeros((nf, H), F32)
    hb = [None] * L
    for t in range(L - 1, -1, -1):
        h, c = lstm_step(xs[t], h, c, wih_b, whh_b, bb)
        hb[t] = h

    # att(Linear(2H -> 1)) on concat(h_fwd, h_bwd), softmax over the L axis
    scores = [jnp.dot(hf[t], attwf_ref[...], preferred_element_type=F32)
              + jnp.dot(hb[t], attwb_ref[...], preferred_element_type=F32)
              + attb_ref[...] for t in range(L)]                       # each [nf, 1]
    m = scores[0]
    for t in range(1, L):
        m = jnp.maximum(m, scores[t])
    exps = [jnp.exp(s - m) for s in scores]
    denom = exps[0]
    for t in range(1, L):
        denom = denom + exps[t]
    inv = pl.reciprocal(denom, approx=True)
    out = jnp.zeros_like(x0)
    for t in range(L):
        out = out + (exps[t] * inv) * xs[t]
    out_ref[...] = out.astype(out_ref.dtype)


# ----------------------------------------------------------------------------
# Wrapper: fold params and launch a single pallas_call
# ----------------------------------------------------------------------------
def _fold_layer_params(p, heads, feat):
    """Fold attention vectors, skip proj, bias and eval-BN into Wcat/Vsrc/scale/shift."""
    w = p['w']                                                # [Fin, heads*feat]
    vdst = jnp.stack([w[:, h * feat:(h + 1) * feat] @ p['att_dst'][h]
                      for h in range(heads)], axis=1)         # [Fin, heads]
    vsrc = jnp.stack([w[:, h * feat:(h + 1) * feat] @ p['att_src'][h]
                      for h in range(heads)], axis=0)         # [heads, Fin]
    wcat = jnp.concatenate([w, vdst, p['wskip']], axis=1)     # [Fin, 2F+H+F]
    scale = p['gamma'] * lax.rsqrt(p['rvar'] + 1e-5)          # [1, feat]
    shift = p['beta'] + (p['bias'] - p['rmean']) * scale      # [1, feat]
    return wcat.astype(F32), vsrc.astype(F32), scale.astype(F32), shift.astype(F32)


def gat_forward(x, adj_masks, params):
    feat = FILTERS[-1]
    heads = HEADS[0]
    nds = tuple(a.shape[0] for a in adj_masks)
    jk = params['jk']
    hidden = jk['whh_f'].shape[0]

    args = [x] + list(adj_masks)
    for i, p in enumerate(params['layers']):
        args += list(_fold_layer_params(p, HEADS[i], FILTERS[i]))
    args += [jk['proj_w'], jk['proj_b'],
             jk['wih_f'], jk['whh_f'], jk['b_f'],
             jk['wih_b'], jk['whh_b'], jk['b_b'],
             jk['att_wf'], jk['att_wb'], jk['att_b']]

    full = lambda a: pl.BlockSpec(a.shape, lambda i: (0,) * a.ndim)
    kernel = functools.partial(_fused_gat_kernel, heads=heads, feat=feat,
                               nds=nds, hidden=hidden)
    return pl.pallas_call(
        kernel,
        out_shape=jax.ShapeDtypeStruct((nds[-1], feat), F32),
        grid=(1,),
        in_specs=[full(a) for a in args],
        out_specs=pl.BlockSpec((nds[-1], feat), lambda i: (0, 0)),
        compiler_params=pltpu.CompilerParams(
            dimension_semantics=("arbitrary",)),
    )(*args)


# ----------------------------------------------------------------------------
# Deterministic parameter / input construction (original parameterization)
# ----------------------------------------------------------------------------
def init_params(key):
    keys = iter(jax.random.split(key, 64))

    def nrm(shape, scale=0.2):
        return (scale * jax.random.normal(next(keys), shape)).astype(F32)

    layers = []
    f_prev = FIN
    for i, f in enumerate(FILTERS):
        h = HEADS[i]
        wskip = nrm((f_prev, f)) if f_prev != f else jnp.eye(f, dtype=F32)
        layers.append(dict(
            w=nrm((f_prev, h * f)),          # GATConv lin (bias=False)
            att_src=nrm((h, f)),
            att_dst=nrm((h, f)),
            bias=nrm((1, f), 0.1),
            wskip=wskip,                      # Linear(bias=False) or Identity
            gamma=1.0 + nrm((1, f), 0.1),     # BatchNorm weight
            beta=nrm((1, f), 0.1),            # BatchNorm bias
            rmean=nrm((1, f), 0.1),           # running mean
            rvar=1.0 + 0.1 * jnp.abs(nrm((1, f))),   # running var
        ))
        f_prev = f

    c = FILTERS[-1]
    hid = ((len(FILTERS) + 1) * c) // 2       # JumpingKnowledge LSTM hidden = 32
    jk = dict(
        proj_w=nrm((FIN, c)), proj_b=nrm((1, c), 0.1),     # proj_lyrs[0]
        wih_f=nrm((c, 4 * hid)), whh_f=nrm((hid, 4 * hid)),
        b_f=nrm((1, 4 * hid), 0.1),                        # b_ih + b_hh (fwd)
        wih_b=nrm((c, 4 * hid)), whh_b=nrm((hid, 4 * hid)),
        b_b=nrm((1, 4 * hid), 0.1),                        # b_ih + b_hh (bwd)
        att_wf=nrm((hid, 1)), att_wb=nrm((hid, 1)), att_b=nrm((1, 1), 0.1),
    )
    return dict(layers=layers, jk=jk)


def make_adj_masks(key, sizes):
    masks = []
    for (ns, nd) in sizes:
        key, sub = jax.random.split(key)
        m = jax.random.bernoulli(sub, 0.3, (nd, ns)).astype(F32)
        m = jnp.maximum(m, jnp.eye(nd, ns, dtype=F32))   # add_self_loops
        masks.append(m)
    return masks


if __name__ == "__main__":
    key = jax.random.PRNGKey(0)
    k_x, k_adj, k_p = jax.random.split(key, 3)

    # NeighborSampler-style shrinking node sets: (num_src, num_dst) per layer
    sizes = [(64, 48), (48, 32), (32, 16)]
    x = jax.random.normal(k_x, (64, FIN), dtype=F32)
    adj_masks = make_adj_masks(k_adj, sizes)
    params = init_params(k_p)

    out = gat_forward(x, adj_masks, params)
    out = jax.block_until_ready(out)

    assert out.shape == (sizes[-1][1], FILTERS[-1]), out.shape
    assert bool(jnp.all(jnp.isfinite(out)))
    print("KERNEL_OK")
</pallas_src>

<mosaic_0001>
module attributes {stable_mosaic.version = 11 : i64} {
  func.func @_fused_gat_kernel(%arg0: i32, %arg1: memref<64x3xf32, #tpu.memory_space<vmem>>, %arg2: memref<48x64xf32, #tpu.memory_space<vmem>>, %arg3: memref<32x48xf32, #tpu.memory_space<vmem>>, %arg4: memref<16x32xf32, #tpu.memory_space<vmem>>, %arg5: memref<3x50xf32, #tpu.memory_space<vmem>>, %arg6: memref<2x3xf32, #tpu.memory_space<vmem>>, %arg7: memref<1x16xf32, #tpu.memory_space<vmem>>, %arg8: memref<1x16xf32, #tpu.memory_space<vmem>>, %arg9: memref<16x50xf32, #tpu.memory_space<vmem>>, %arg10: memref<2x16xf32, #tpu.memory_space<vmem>>, %arg11: memref<1x16xf32, #tpu.memory_space<vmem>>, %arg12: memref<1x16xf32, #tpu.memory_space<vmem>>, %arg13: memref<16x50xf32, #tpu.memory_space<vmem>>, %arg14: memref<2x16xf32, #tpu.memory_space<vmem>>, %arg15: memref<1x16xf32, #tpu.memory_space<vmem>>, %arg16: memref<1x16xf32, #tpu.memory_space<vmem>>, %arg17: memref<3x16xf32, #tpu.memory_space<vmem>>, %arg18: memref<1x16xf32, #tpu.memory_space<vmem>>, %arg19: memref<16x128xf32, #tpu.memory_space<vmem>>, %arg20: memref<32x128xf32, #tpu.memory_space<vmem>>, %arg21: memref<1x128xf32, #tpu.memory_space<vmem>>, %arg22: memref<16x128xf32, #tpu.memory_space<vmem>>, %arg23: memref<32x128xf32, #tpu.memory_space<vmem>>, %arg24: memref<1x128xf32, #tpu.memory_space<vmem>>, %arg25: memref<32x1xf32, #tpu.memory_space<vmem>>, %arg26: memref<32x1xf32, #tpu.memory_space<vmem>>, %arg27: memref<1x1xf32, #tpu.memory_space<vmem>>, %arg28: memref<16x16xf32, #tpu.memory_space<vmem>>) attributes {dimension_semantics = [#tpu.dimension_semantics<arbitrary>], iteration_bounds = array<i64: 1>, scalar_prefetch = 0 : i64, scratch_operands = 0 : i64, tpu.core_type = #tpu.core_type<tc>, window_params = [{pipeline_mode = #tpu.pipeline_mode<synchronous>, transform_indices = @transform_0, window_bounds = array<i64: 64, 3>}, {pipeline_mode = #tpu.pipeline_mode<synchronous>, transform_indices = @transform_1, window_bounds = array<i64: 48, 64>}, {pipeline_mode = #tpu.pipeline_mode<synchronous>, transform_indices = @transform_2, window_bounds = array<i64: 32, 48>}, {pipeline_mode = #tpu.pipeline_mode<synchronous>, transform_indices = @transform_3, window_bounds = array<i64: 16, 32>}, {pipeline_mode = #tpu.pipeline_mode<synchronous>, transform_indices = @transform_4, window_bounds = array<i64: 3, 50>}, {pipeline_mode = #tpu.pipeline_mode<synchronous>, transform_indices = @transform_5, window_bounds = array<i64: 2, 3>}, {pipeline_mode = #tpu.pipeline_mode<synchronous>, transform_indices = @transform_6, window_bounds = array<i64: 1, 16>}, {pipeline_mode = #tpu.pipeline_mode<synchronous>, transform_indices = @transform_7, window_bounds = array<i64: 1, 16>}, {pipeline_mode = #tpu.pipeline_mode<synchronous>, transform_indices = @transform_8, window_bounds = array<i64: 16, 50>}, {pipeline_mode = #tpu.pipeline_mode<synchronous>, transform_indices = @transform_9, window_bounds = array<i64: 2, 16>}, {pipeline_mode = #tpu.pipeline_mode<synchronous>, transform_indices = @transform_10, window_bounds = array<i64: 1, 16>}, {pipeline_mode = #tpu.pipeline_mode<synchronous>, transform_indices = @transform_11, window_bounds = array<i64: 1, 16>}, {pipeline_mode = #tpu.pipeline_mode<synchronous>, transform_indices = @transform_12, window_bounds = array<i64: 16, 50>}, {pipeline_mode = #tpu.pipeline_mode<synchronous>, transform_indices = @transform_13, window_bounds = array<i64: 2, 16>}, {pipeline_mode = #tpu.pipeline_mode<synchronous>, transform_indices = @transform_14, window_bounds = array<i64: 1, 16>}, {pipeline_mode = #tpu.pipeline_mode<synchronous>, transform_indices = @transform_15, window_bounds = array<i64: 1, 16>}, {pipeline_mode = #tpu.pipeline_mode<synchronous>, transform_indices = @transform_16, window_bounds = array<i64: 3, 16>}, {pipeline_mode = #tpu.pipeline_mode<synchronous>, transform_indices = @transform_17, window_bounds = array<i64: 1, 16>}, {pipeline_mode = #tpu.pipeline_mode<synchronous>, transform_indices = @transform_18, window_bounds = array<i64: 16, 128>}, {pipeline_mode = #tpu.pipeline_mode<synchronous>, transform_indices = @transform_19, window_bounds = array<i64: 32, 128>}, {pipeline_mode = #tpu.pipeline_mode<synchronous>, transform_indices = @transform_20, window_bounds = array<i64: 1, 128>}, {pipeline_mode = #tpu.pipeline_mode<synchronous>, transform_indices = @transform_21, window_bounds = array<i64: 16, 128>}, {pipeline_mode = #tpu.pipeline_mode<synchronous>, transform_indices = @transform_22, window_bounds = array<i64: 32, 128>}, {pipeline_mode = #tpu.pipeline_mode<synchronous>, transform_indices = @transform_23, window_bounds = array<i64: 1, 128>}, {pipeline_mode = #tpu.pipeline_mode<synchronous>, transform_indices = @transform_24, window_bounds = array<i64: 32, 1>}, {pipeline_mode = #tpu.pipeline_mode<synchronous>, transform_indices = @transform_25, window_bounds = array<i64: 32, 1>}, {pipeline_mode = #tpu.pipeline_mode<synchronous>, transform_indices = @transform_26, window_bounds = array<i64: 1, 1>}, {pipeline_mode = #tpu.pipeline_mode<synchronous>, transform_indices = @transform_27, window_bounds = array<i64: 16, 16>}]} {
    %c0 = arith.constant 0 : index
    %c0_0 = arith.constant 0 : index
    %0 = vector.load %arg1[%c0, %c0_0] : memref<64x3xf32, #tpu.memory_space<vmem>>, vector<64x3xf32>
    %c0_1 = arith.constant 0 : index
    %c0_2 = arith.constant 0 : index
    %1 = vector.load %arg2[%c0_1, %c0_2] : memref<48x64xf32, #tpu.memory_space<vmem>>, vector<48x64xf32>
    %c0_3 = arith.constant 0 : index
    %c0_4 = arith.constant 0 : index
    %2 = vector.load %arg5[%c0_3, %c0_4] : memref<3x50xf32, #tpu.memory_space<vmem>>, vector<3x50xf32>
    %cst = arith.constant dense<0.000000e+00> : vector<64x50xf32>
    %3 = tpu.matmul %0, %2, %cst {dimension_numbers = #tpu.dot_dimension_numbers<[1], [0], [0], [1], [0, 0, 1, 1], [], []>} : vector<64x3xf32>, vector<3x50xf32>, vector<64x50xf32> -> vector<64x50xf32>
    %4 = vector.extract_strided_slice %3 {offsets = [0, 0], sizes = [48, 50], strides = [1, 1]} : vector<64x50xf32> to vector<48x50xf32>
    %c0_5 = arith.constant 0 : index
    %c0_6 = arith.constant 0 : index
    %5 = vector.load %arg6[%c0_5, %c0_6] : memref<2x3xf32, #tpu.memory_space<vmem>>, vector<2x3xf32>
    %cst_7 = arith.constant dense<0.000000e+00> : vector<2x64xf32>
    %6 = tpu.matmul %5, %0, %cst_7 {dimension_numbers = #tpu.dot_dimension_numbers<[1], [1], [0], [0], [0, 0, 1, 0], [], []>} : vector<2x3xf32>, vector<64x3xf32>, vector<2x64xf32> -> vector<2x64xf32>
    %cst_8 = arith.constant 0.000000e+00 : f32
    %7 = vector.broadcast %cst_8 : f32 to vector<48x16xf32>
    %8 = vector.extract_strided_slice %3 {offsets = [0, 0], sizes = [64, 16], strides = [1, 1]} : vector<64x50xf32> to vector<64x16xf32>
    %9 = vector.extract_strided_slice %4 {offsets = [0, 32], sizes = [48, 1], strides = [1, 1]} : vector<48x50xf32> to vector<48x1xf32>
    %10 = vector.extract_strided_slice %6 {offsets = [0, 0], sizes = [1, 64], strides = [1, 1]} : vector<2x64xf32> to vector<1x64xf32>
    %11 = vector.broadcast %9 : vector<48x1xf32> to vector<48x64xf32>
    %12 = vector.broadcast %10 : vector<1x64xf32> to vector<48x64xf32>
    %13 = arith.addf %11, %12 : vector<48x64xf32>
    %cst_9 = arith.constant 0.000000e+00 : f32
    %14 = vector.broadcast %cst_9 : f32 to vector<48x64xf32>
    %15 = arith.cmpf ogt, %13, %14 : vector<48x64xf32>
    %cst_10 = arith.constant 2.000000e-01 : f32
    %16 = vector.broadcast %cst_10 : f32 to vector<48x64xf32>
    %17 = arith.mulf %16, %13 : vector<48x64xf32>
    %18 = arith.select %15, %13, %17 : vector<48x64xi1>, vector<48x64xf32>
    %cst_11 = arith.constant 0.000000e+00 : f32
    %19 = vector.broadcast %cst_11 : f32 to vector<48x64xf32>
    %20 = arith.cmpf ogt, %1, %19 : vector<48x64xf32>
    %cst_12 = arith.constant -1.000000e+30 : f32
    %21 = vector.broadcast %cst_12 : f32 to vector<48x64xf32>
    %22 = arith.select %20, %18, %21 : vector<48x64xi1>, vector<48x64xf32>
    %cst_13 = arith.constant dense<0xFF800000> : vector<48xf32>
    %23 = vector.multi_reduction <maximumf>, %22, %cst_13 [1] : vector<48x64xf32> to vector<48xf32>
    %24 = vector.shape_cast %23 : vector<48xf32> to vector<48x1xf32>
    %25 = vector.broadcast %24 : vector<48x1xf32> to vector<48x64xf32>
    %26 = arith.subf %22, %25 : vector<48x64xf32>
    %27 = math.exp %26 : vector<48x64xf32>
    %28 = arith.mulf %27, %1 : vector<48x64xf32>
    %cst_14 = arith.constant dense<0.000000e+00> : vector<48xf32>
    %29 = vector.multi_reduction <add>, %28, %cst_14 [1] : vector<48x64xf32> to vector<48xf32>
    %30 = vector.shape_cast %29 : vector<48xf32> to vector<48x1xf32>
    %cst_15 = arith.constant 1.000000e-30 : f32
    %31 = vector.broadcast %cst_15 : f32 to vector<48x1xf32>
    %32 = arith.maximumf %30, %31 : vector<48x1xf32>
    %33 = tpu.reciprocal %32 {approx = true} : vector<48x1xf32> -> vector<48x1xf32>
    %34 = vector.broadcast %33 : vector<48x1xf32> to vector<48x64xf32>
    %35 = arith.mulf %28, %34 : vector<48x64xf32>
    %cst_16 = arith.constant dense<0.000000e+00> : vector<48x16xf32>
    %36 = tpu.matmul %35, %8, %cst_16 {dimension_numbers = #tpu.dot_dimension_numbers<[1], [0], [0], [1], [0, 0, 1, 1], [], []>} : vector<48x64xf32>, vector<64x16xf32>, vector<48x16xf32> -> vector<48x16xf32>
    %37 = arith.addf %7, %36 : vector<48x16xf32>
    %38 = vector.extract_strided_slice %3 {offsets = [0, 16], sizes = [64, 16], strides = [1, 1]} : vector<64x50xf32> to vector<64x16xf32>
    %39 = vector.extract_strided_slice %4 {offsets = [0, 33], sizes = [48, 1], strides = [1, 1]} : vector<48x50xf32> to vector<48x1xf32>
    %40 = vector.extract_strided_slice %6 {offsets = [1, 0], sizes = [1, 64], strides = [1, 1]} : vector<2x64xf32> to vector<1x64xf32>
    %41 = vector.broadcast %39 : vector<48x1xf32> to vector<48x64xf32>
    %42 = vector.broadcast %40 : vector<1x64xf32> to vector<48x64xf32>
    %43 = arith.addf %41, %42 : vector<48x64xf32>
    %cst_17 = arith.constant 0.000000e+00 : f32
    %44 = vector.broadcast %cst_17 : f32 to vector<48x64xf32>
    %45 = arith.cmpf ogt, %43, %44 : vector<48x64xf32>
    %cst_18 = arith.constant 2.000000e-01 : f32
    %46 = vector.broadcast %cst_18 : f32 to vector<48x64xf32>
    %47 = arith.mulf %46, %43 : vector<48x64xf32>
    %48 = arith.select %45, %43, %47 : vector<48x64xi1>, vector<48x64xf32>
    %cst_19 = arith.constant 0.000000e+00 : f32
    %49 = vector.broadcast %cst_19 : f32 to vector<48x64xf32>
    %50 = arith.cmpf ogt, %1, %49 : vector<48x64xf32>
    %cst_20 = arith.constant -1.000000e+30 : f32
    %51 = vector.broadcast %cst_20 : f32 to vector<48x64xf32>
    %52 = arith.select %50, %48, %51 : vector<48x64xi1>, vector<48x64xf32>
    %cst_21 = arith.constant dense<0xFF800000> : vector<48xf32>
    %53 = vector.multi_reduction <maximumf>, %52, %cst_21 [1] : vector<48x64xf32> to vector<48xf32>
    %54 = vector.shape_cast %53 : vector<48xf32> to vector<48x1xf32>
    %55 = vector.broadcast %54 : vector<48x1xf32> to vector<48x64xf32>
    %56 = arith.subf %52, %55 : vector<48x64xf32>
    %57 = math.exp %56 : vector<48x64xf32>
    %58 = arith.mulf %57, %1 : vector<48x64xf32>
    %cst_22 = arith.constant dense<0.000000e+00> : vector<48xf32>
    %59 = vector.multi_reduction <add>, %58, %cst_22 [1] : vector<48x64xf32> to vector<48xf32>
    %60 = vector.shape_cast %59 : vector<48xf32> to vector<48x1xf32>
    %cst_23 = arith.constant 1.000000e-30 : f32
    %61 = vector.broadcast %cst_23 : f32 to vector<48x1xf32>
    %62 = arith.maximumf %60, %61 : vector<48x1xf32>
    %63 = tpu.reciprocal %62 {approx = true} : vector<48x1xf32> -> vector<48x1xf32>
    %64 = vector.broadcast %63 : vector<48x1xf32> to vector<48x64xf32>
    %65 = arith.mulf %58, %64 : vector<48x64xf32>
    %cst_24 = arith.constant dense<0.000000e+00> : vector<48x16xf32>
    %66 = tpu.matmul %65, %38, %cst_24 {dimension_numbers = #tpu.dot_dimension_numbers<[1], [0], [0], [1], [0, 0, 1, 1], [], []>} : vector<48x64xf32>, vector<64x16xf32>, vector<48x16xf32> -> vector<48x16xf32>
    %67 = arith.addf %37, %66 : vector<48x16xf32>
    %68 = vector.extract_strided_slice %4 {offsets = [0, 34], sizes = [48, 16], strides = [1, 1]} : vector<48x50xf32> to vector<48x16xf32>
    %cst_25 = arith.constant 5.000000e-01 : f32
    %69 = vector.broadcast %cst_25 : f32 to vector<48x16xf32>
    %70 = arith.mulf %67, %69 : vector<48x16xf32>
    %71 = arith.addf %70, %68 : vector<48x16xf32>
    %c0_26 = arith.constant 0 : index
    %c0_27 = arith.constant 0 : index
    %72 = vector.load %arg7[%c0_26, %c0_27] : memref<1x16xf32, #tpu.memory_space<vmem>>, vector<1x16xf32>
    %73 = vector.broadcast %72 : vector<1x16xf32> to vector<48x16xf32>
    %74 = arith.mulf %71, %73 : vector<48x16xf32>
    %c0_28 = arith.constant 0 : index
    %c0_29 = arith.constant 0 : index
    %75 = vector.load %arg8[%c0_28, %c0_29] : memref<1x16xf32, #tpu.memory_space<vmem>>, vector<1x16xf32>
    %76 = vector.broadcast %75 : vector<1x16xf32> to vector<48x16xf32>
    %77 = arith.addf %74, %76 : vector<48x16xf32>
    %cst_30 = arith.constant 0.000000e+00 : f32
    %78 = vector.broadcast %cst_30 : f32 to vector<48x16xf32>
    %79 = arith.cmpf ogt, %77, %78 : vector<48x16xf32>
    %cst_31 = arith.constant 0.00999999977 : f32
    %80 = vector.broadcast %cst_31 : f32 to vector<48x16xf32>
    %81 = arith.mulf %80, %77 : vector<48x16xf32>
    %82 = arith.select %79, %77, %81 : vector<48x16xi1>, vector<48x16xf32>
    %c0_32 = arith.constant 0 : index
    %c0_33 = arith.constant 0 : index
    %83 = vector.load %arg3[%c0_32, %c0_33] : memref<32x48xf32, #tpu.memory_space<vmem>>, vector<32x48xf32>
    %c0_34 = arith.constant 0 : index
    %c0_35 = arith.constant 0 : index
    %84 = vector.load %arg9[%c0_34, %c0_35] : memref<16x50xf32, #tpu.memory_space<vmem>>, vector<16x50xf32>
    %cst_36 = arith.constant dense<0.000000e+00> : vector<48x50xf32>
    %85 = tpu.matmul %82, %84, %cst_36 {dimension_numbers = #tpu.dot_dimension_numbers<[1], [0], [0], [1], [0, 0, 1, 1], [], []>} : vector<48x16xf32>, vector<16x50xf32>, vector<48x50xf32> -> vector<48x50xf32>
    %86 = vector.extract_strided_slice %85 {offsets = [0, 0], sizes = [32, 50], strides = [1, 1]} : vector<48x50xf32> to vector<32x50xf32>
    %c0_37 = arith.constant 0 : index
    %c0_38 = arith.constant 0 : index
    %87 = vector.load %arg10[%c0_37, %c0_38] : memref<2x16xf32, #tpu.memory_space<vmem>>, vector<2x16xf32>
    %cst_39 = arith.constant dense<0.000000e+00> : vector<2x48xf32>
    %88 = tpu.matmul %87, %82, %cst_39 {dimension_numbers = #tpu.dot_dimension_numbers<[1], [1], [0], [0], [0, 0, 1, 0], [], []>} : vector<2x16xf32>, vector<48x16xf32>, vector<2x48xf32> -> vector<2x48xf32>
    %cst_40 = arith.constant 0.000000e+00 : f32
    %89 = vector.broadcast %cst_40 : f32 to vector<32x16xf32>
    %90 = vector.extract_strided_slice %85 {offsets = [0, 0], sizes = [48, 16], strides = [1, 1]} : vector<48x50xf32> to vector<48x16xf32>
    %91 = vector.extract_strided_slice %86 {offsets = [0, 32], sizes = [32, 1], strides = [1, 1]} : vector<32x50xf32> to vector<32x1xf32>
    %92 = vector.extract_strided_slice %88 {offsets = [0, 0], sizes = [1, 48], strides = [1, 1]} : vector<2x48xf32> to vector<1x48xf32>
    %93 = vector.broadcast %91 : vector<32x1xf32> to vector<32x48xf32>
    %94 = vector.broadcast %92 : vector<1x48xf32> to vector<32x48xf32>
    %95 = arith.addf %93, %94 : vector<32x48xf32>
    %cst_41 = arith.constant 0.000000e+00 : f32
    %96 = vector.broadcast %cst_41 : f32 to vector<32x48xf32>
    %97 = arith.cmpf ogt, %95, %96 : vector<32x48xf32>
    %cst_42 = arith.constant 2.000000e-01 : f32
    %98 = vector.broadcast %cst_42 : f32 to vector<32x48xf32>
    %99 = arith.mulf %98, %95 : vector<32x48xf32>
    %100 = arith.select %97, %95, %99 : vector<32x48xi1>, vector<32x48xf32>
    %cst_43 = arith.constant 0.000000e+00 : f32
    %101 = vector.broadcast %cst_43 : f32 to vector<32x48xf32>
    %102 = arith.cmpf ogt, %83, %101 : vector<32x48xf32>
    %cst_44 = arith.constant -1.000000e+30 : f32
    %103 = vector.broadcast %cst_44 : f32 to vector<32x48xf32>
    %104 = arith.select %102, %100, %103 : vector<32x48xi1>, vector<32x48xf32>
    %cst_45 = arith.constant dense<0xFF800000> : vector<32xf32>
    %105 = vector.multi_reduction <maximumf>, %104, %cst_45 [1] : vector<32x48xf32> to vector<32xf32>
    %106 = vector.shape_cast %105 : vector<32xf32> to vector<32x1xf32>
    %107 = vector.broadcast %106 : vector<32x1xf32> to vector<32x48xf32>
    %108 = arith.subf %104, %107 : vector<32x48xf32>
    %109 = math.exp %108 : vector<32x48xf32>
    %110 = arith.mulf %109, %83 : vector<32x48xf32>
    %cst_46 = arith.constant dense<0.000000e+00> : vector<32xf32>
    %111 = vector.multi_reduction <add>, %110, %cst_46 [1] : vector<32x48xf32> to vector<32xf32>
    %112 = vector.shape_cast %111 : vector<32xf32> to vector<32x1xf32>
    %cst_47 = arith.constant 1.000000e-30 : f32
    %113 = vector.broadcast %cst_47 : f32 to vector<32x1xf32>
    %114 = arith.maximumf %112, %113 : vector<32x1xf32>
    %115 = tpu.reciprocal %114 {approx = true} : vector<32x1xf32> -> vector<32x1xf32>
    %116 = vector.broadcast %115 : vector<32x1xf32> to vector<32x48xf32>
    %117 = arith.mulf %110, %116 : vector<32x48xf32>
    %cst_48 = arith.constant dense<0.000000e+00> : vector<32x16xf32>
    %118 = tpu.matmul %117, %90, %cst_48 {dimension_numbers = #tpu.dot_dimension_numbers<[1], [0], [0], [1], [0, 0, 1, 1], [], []>} : vector<32x48xf32>, vector<48x16xf32>, vector<32x16xf32> -> vector<32x16xf32>
    %119 = arith.addf %89, %118 : vector<32x16xf32>
    %120 = vector.extract_strided_slice %85 {offsets = [0, 16], sizes = [48, 16], strides = [1, 1]} : vector<48x50xf32> to vector<48x16xf32>
    %121 = vector.extract_strided_slice %86 {offsets = [0, 33], sizes = [32, 1], strides = [1, 1]} : vector<32x50xf32> to vector<32x1xf32>
    %122 = vector.extract_strided_slice %88 {offsets = [1, 0], sizes = [1, 48], strides = [1, 1]} : vector<2x48xf32> to vector<1x48xf32>
    %123 = vector.broadcast %121 : vector<32x1xf32> to vector<32x48xf32>
    %124 = vector.broadcast %122 : vector<1x48xf32> to vector<32x48xf32>
    %125 = arith.addf %123, %124 : vector<32x48xf32>
    %cst_49 = arith.constant 0.000000e+00 : f32
    %126 = vector.broadcast %cst_49 : f32 to vector<32x48xf32>
    %127 = arith.cmpf ogt, %125, %126 : vector<32x48xf32>
    %cst_50 = arith.constant 2.000000e-01 : f32
    %128 = vector.broadcast %cst_50 : f32 to vector<32x48xf32>
    %129 = arith.mulf %128, %125 : vector<32x48xf32>
    %130 = arith.select %127, %125, %129 : vector<32x48xi1>, vector<32x48xf32>
    %cst_51 = arith.constant 0.000000e+00 : f32
    %131 = vector.broadcast %cst_51 : f32 to vector<32x48xf32>
    %132 = arith.cmpf ogt, %83, %131 : vector<32x48xf32>
    %cst_52 = arith.constant -1.000000e+30 : f32
    %133 = vector.broadcast %cst_52 : f32 to vector<32x48xf32>
    %134 = arith.select %132, %130, %133 : vector<32x48xi1>, vector<32x48xf32>
    %cst_53 = arith.constant dense<0xFF800000> : vector<32xf32>
    %135 = vector.multi_reduction <maximumf>, %134, %cst_53 [1] : vector<32x48xf32> to vector<32xf32>
    %136 = vector.shape_cast %135 : vector<32xf32> to vector<32x1xf32>
    %137 = vector.broadcast %136 : vector<32x1xf32> to vector<32x48xf32>
    %138 = arith.subf %134, %137 : vector<32x48xf32>
    %139 = math.exp %138 : vector<32x48xf32>
    %140 = arith.mulf %139, %83 : vector<32x48xf32>
    %cst_54 = arith.constant dense<0.000000e+00> : vector<32xf32>
    %141 = vector.multi_reduction <add>, %140, %cst_54 [1] : vector<32x48xf32> to vector<32xf32>
    %142 = vector.shape_cast %141 : vector<32xf32> to vector<32x1xf32>
    %cst_55 = arith.constant 1.000000e-30 : f32
    %143 = vector.broadcast %cst_55 : f32 to vector<32x1xf32>
    %144 = arith.maximumf %142, %143 : vector<32x1xf32>
    %145 = tpu.reciprocal %144 {approx = true} : vector<32x1xf32> -> vector<32x1xf32>
    %146 = vector.broadcast %145 : vector<32x1xf32> to vector<32x48xf32>
    %147 = arith.mulf %140, %146 : vector<32x48xf32>
    %cst_56 = arith.constant dense<0.000000e+00> : vector<32x16xf32>
    %148 = tpu.matmul %147, %120, %cst_56 {dimension_numbers = #tpu.dot_dimension_numbers<[1], [0], [0], [1], [0, 0, 1, 1], [], []>} : vector<32x48xf32>, vector<48x16xf32>, vector<32x16xf32> -> vector<32x16xf32>
    %149 = arith.addf %119, %148 : vector<32x16xf32>
    %150 = vector.extract_strided_slice %86 {offsets = [0, 34], sizes = [32, 16], strides = [1, 1]} : vector<32x50xf32> to vector<32x16xf32>
    %cst_57 = arith.constant 5.000000e-01 : f32
    %151 = vector.broadcast %cst_57 : f32 to vector<32x16xf32>
    %152 = arith.mulf %149, %151 : vector<32x16xf32>
    %153 = arith.addf %152, %150 : vector<32x16xf32>
    %c0_58 = arith.constant 0 : index
    %c0_59 = arith.constant 0 : index
    %154 = vector.load %arg11[%c0_58, %c0_59] : memref<1x16xf32, #tpu.memory_space<vmem>>, vector<1x16xf32>
    %155 = vector.broadcast %154 : vector<1x16xf32> to vector<32x16xf32>
    %156 = arith.mulf %153, %155 : vector<32x16xf32>
    %c0_60 = arith.constant 0 : index
    %c0_61 = arith.constant 0 : index
    %157 = vector.load %arg12[%c0_60, %c0_61] : memref<1x16xf32, #tpu.memory_space<vmem>>, vector<1x16xf32>
    %158 = vector.broadcast %157 : vector<1x16xf32> to vector<32x16xf32>
    %159 = arith.addf %156, %158 : vector<32x16xf32>
    %cst_62 = arith.constant 0.000000e+00 : f32
    %160 = vector.broadcast %cst_62 : f32 to vector<32x16xf32>
    %161 = arith.cmpf ogt, %159, %160 : vector<32x16xf32>
    %cst_63 = arith.constant 0.00999999977 : f32
    %162 = vector.broadcast %cst_63 : f32 to vector<32x16xf32>
    %163 = arith.mulf %162, %159 : vector<32x16xf32>
    %164 = arith.select %161, %159, %163 : vector<32x16xi1>, vector<32x16xf32>
    %c0_64 = arith.constant 0 : index
    %c0_65 = arith.constant 0 : index
    %165 = vector.load %arg4[%c0_64, %c0_65] : memref<16x32xf32, #tpu.memory_space<vmem>>, vector<16x32xf32>
    %c0_66 = arith.constant 0 : index
    %c0_67 = arith.constant 0 : index
    %166 = vector.load %arg13[%c0_66, %c0_67] : memref<16x50xf32, #tpu.memory_space<vmem>>, vector<16x50xf32>
    %cst_68 = arith.constant dense<0.000000e+00> : vector<32x50xf32>
    %167 = tpu.matmul %164, %166, %cst_68 {dimension_numbers = #tpu.dot_dimension_numbers<[1], [0], [0], [1], [0, 0, 1, 1], [], []>} : vector<32x16xf32>, vector<16x50xf32>, vector<32x50xf32> -> vector<32x50xf32>
    %168 = vector.extract_strided_slice %167 {offsets = [0, 0], sizes = [16, 50], strides = [1, 1]} : vector<32x50xf32> to vector<16x50xf32>
    %c0_69 = arith.constant 0 : index
    %c0_70 = arith.constant 0 : index
    %169 = vector.load %arg14[%c0_69, %c0_70] : memref<2x16xf32, #tpu.memory_space<vmem>>, vector<2x16xf32>
    %cst_71 = arith.constant dense<0.000000e+00> : vector<2x32xf32>
    %170 = tpu.matmul %169, %164, %cst_71 {dimension_numbers = #tpu.dot_dimension_numbers<[1], [1], [0], [0], [0, 0, 1, 0], [], []>} : vector<2x16xf32>, vector<32x16xf32>, vector<2x32xf32> -> vector<2x32xf32>
    %cst_72 = arith.constant 0.000000e+00 : f32
    %171 = vector.broadcast %cst_72 : f32 to vector<16x16xf32>
    %172 = vector.extract_strided_slice %167 {offsets = [0, 0], sizes = [32, 16], strides = [1, 1]} : vector<32x50xf32> to vector<32x16xf32>
    %173 = vector.extract_strided_slice %168 {offsets = [0, 32], sizes = [16, 1], strides = [1, 1]} : vector<16x50xf32> to vector<16x1xf32>
    %174 = vector.extract_strided_slice %170 {offsets = [0, 0], sizes = [1, 32], strides = [1, 1]} : vector<2x32xf32> to vector<1x32xf32>
    %175 = vector.broadcast %173 : vector<16x1xf32> to vector<16x32xf32>
    %176 = vector.broadcast %174 : vector<1x32xf32> to vector<16x32xf32>
    %177 = arith.addf %175, %176 : vector<16x32xf32>
    %cst_73 = arith.constant 0.000000e+00 : f32
    %178 = vector.broadcast %cst_73 : f32 to vector<16x32xf32>
    %179 = arith.cmpf ogt, %177, %178 : vector<16x32xf32>
    %cst_74 = arith.constant 2.000000e-01 : f32
    %180 = vector.broadcast %cst_74 : f32 to vector<16x32xf32>
    %181 = arith.mulf %180, %177 : vector<16x32xf32>
    %182 = arith.select %179, %177, %181 : vector<16x32xi1>, vector<16x32xf32>
    %cst_75 = arith.constant 0.000000e+00 : f32
    %183 = vector.broadcast %cst_75 : f32 to vector<16x32xf32>
    %184 = arith.cmpf ogt, %165, %183 : vector<16x32xf32>
    %cst_76 = arith.constant -1.000000e+30 : f32
    %185 = vector.broadcast %cst_76 : f32 to vector<16x32xf32>
    %186 = arith.select %184, %182, %185 : vector<16x32xi1>, vector<16x32xf32>
    %cst_77 = arith.constant dense<0xFF800000> : vector<16xf32>
    %187 = vector.multi_reduction <maximumf>, %186, %cst_77 [1] : vector<16x32xf32> to vector<16xf32>
    %188 = vector.shape_cast %187 : vector<16xf32> to vector<16x1xf32>
    %189 = vector.broadcast %188 : vector<16x1xf32> to vector<16x32xf32>
    %190 = arith.subf %186, %189 : vector<16x32xf32>
    %191 = math.exp %190 : vector<16x32xf32>
    %192 = arith.mulf %191, %165 : vector<16x32xf32>
    %cst_78 = arith.constant dense<0.000000e+00> : vector<16xf32>
    %193 = vector.multi_reduction <add>, %192, %cst_78 [1] : vector<16x32xf32> to vector<16xf32>
    %194 = vector.shape_cast %193 : vector<16xf32> to vector<16x1xf32>
    %cst_79 = arith.constant 1.000000e-30 : f32
    %195 = vector.broadcast %cst_79 : f32 to vector<16x1xf32>
    %196 = arith.maximumf %194, %195 : vector<16x1xf32>
    %197 = tpu.reciprocal %196 {approx = true} : vector<16x1xf32> -> vector<16x1xf32>
    %198 = vector.broadcast %197 : vector<16x1xf32> to vector<16x32xf32>
    %199 = arith.mulf %192, %198 : vector<16x32xf32>
    %cst_80 = arith.constant dense<0.000000e+00> : vector<16x16xf32>
    %200 = tpu.matmul %199, %172, %cst_80 {dimension_numbers = #tpu.dot_dimension_numbers<[1], [0], [0], [1], [0, 0, 1, 1], [], []>} : vector<16x32xf32>, vector<32x16xf32>, vector<16x16xf32> -> vector<16x16xf32>
    %201 = arith.addf %171, %200 : vector<16x16xf32>
    %202 = vector.extract_strided_slice %167 {offsets = [0, 16], sizes = [32, 16], strides = [1, 1]} : vector<32x50xf32> to vector<32x16xf32>
    %203 = vector.extract_strided_slice %168 {offsets = [0, 33], sizes = [16, 1], strides = [1, 1]} : vector<16x50xf32> to vector<16x1xf32>
    %204 = vector.extract_strided_slice %170 {offsets = [1, 0], sizes = [1, 32], strides = [1, 1]} : vector<2x32xf32> to vector<1x32xf32>
    %205 = vector.broadcast %203 : vector<16x1xf32> to vector<16x32xf32>
    %206 = vector.broadcast %204 : vector<1x32xf32> to vector<16x32xf32>
    %207 = arith.addf %205, %206 : vector<16x32xf32>
    %cst_81 = arith.constant 0.000000e+00 : f32
    %208 = vector.broadcast %cst_81 : f32 to vector<16x32xf32>
    %209 = arith.cmpf ogt, %207, %208 : vector<16x32xf32>
    %cst_82 = arith.constant 2.000000e-01 : f32
    %210 = vector.broadcast %cst_82 : f32 to vector<16x32xf32>
    %211 = arith.mulf %210, %207 : vector<16x32xf32>
    %212 = arith.select %209, %207, %211 : vector<16x32xi1>, vector<16x32xf32>
    %cst_83 = arith.constant 0.000000e+00 : f32
    %213 = vector.broadcast %cst_83 : f32 to vector<16x32xf32>
    %214 = arith.cmpf ogt, %165, %213 : vector<16x32xf32>
    %cst_84 = arith.constant -1.000000e+30 : f32
    %215 = vector.broadcast %cst_84 : f32 to vector<16x32xf32>
    %216 = arith.select %214, %212, %215 : vector<16x32xi1>, vector<16x32xf32>
    %cst_85 = arith.constant dense<0xFF800000> : vector<16xf32>
    %217 = vector.multi_reduction <maximumf>, %216, %cst_85 [1] : vector<16x32xf32> to vector<16xf32>
    %218 = vector.shape_cast %217 : vector<16xf32> to vector<16x1xf32>
    %219 = vector.broadcast %218 : vector<16x1xf32> to vector<16x32xf32>
    %220 = arith.subf %216, %219 : vector<16x32xf32>
    %221 = math.exp %220 : vector<16x32xf32>
    %222 = arith.mulf %221, %165 : vector<16x32xf32>
    %cst_86 = arith.constant dense<0.000000e+00> : vector<16xf32>
    %223 = vector.multi_reduction <add>, %222, %cst_86 [1] : vector<16x32xf32> to vector<16xf32>
    %224 = vector.shape_cast %223 : vector<16xf32> to vector<16x1xf32>
    %cst_87 = arith.constant 1.000000e-30 : f32
    %225 = vector.broadcast %cst_87 : f32 to vector<16x1xf32>
    %226 = arith.maximumf %224, %225 : vector<16x1xf32>
    %227 = tpu.reciprocal %226 {approx = true} : vector<16x1xf32> -> vector<16x1xf32>
    %228 = vector.broadcast %227 : vector<16x1xf32> to vector<16x32xf32>
    %229 = arith.mulf %222, %228 : vector<16x32xf32>
    %cst_88 = arith.constant dense<0.000000e+00> : vector<16x16xf32>
    %230 = tpu.matmul %229, %202, %cst_88 {dimension_numbers = #tpu.dot_dimension_numbers<[1], [0], [0], [1], [0, 0, 1, 1], [], []>} : vector<16x32xf32>, vector<32x16xf32>, vector<16x16xf32> -> vector<16x16xf32>
    %231 = arith.addf %201, %230 : vector<16x16xf32>
    %232 = vector.extract_strided_slice %168 {offsets = [0, 34], sizes = [16, 16], strides = [1, 1]} : vector<16x50xf32> to vector<16x16xf32>
    %cst_89 = arith.constant 5.000000e-01 : f32
    %233 = vector.broadcast %cst_89 : f32 to vector<16x16xf32>
    %234 = arith.mulf %231, %233 : vector<16x16xf32>
    %235 = arith.addf %234, %232 : vector<16x16xf32>
    %c0_90 = arith.constant 0 : index
    %c0_91 = arith.constant 0 : index
    %236 = vector.load %arg15[%c0_90, %c0_91] : memref<1x16xf32, #tpu.memory_space<vmem>>, vector<1x16xf32>
    %237 = vector.broadcast %236 : vector<1x16xf32> to vector<16x16xf32>
    %238 = arith.mulf %235, %237 : vector<16x16xf32>
    %c0_92 = arith.constant 0 : index
    %c0_93 = arith.constant 0 : index
    %239 = vector.load %arg16[%c0_92, %c0_93] : memref<1x16xf32, #tpu.memory_space<vmem>>, vector<1x16xf32>
    %240 = vector.broadcast %239 : vector<1x16xf32> to vector<16x16xf32>
    %241 = arith.addf %238, %240 : vector<16x16xf32>
    %cst_94 = arith.constant 0.000000e+00 : f32
    %242 = vector.broadcast %cst_94 : f32 to vector<16x16xf32>
    %243 = arith.cmpf ogt, %241, %242 : vector<16x16xf32>
    %cst_95 = arith.constant 0.00999999977 : f32
    %244 = vector.broadcast %cst_95 : f32 to vector<16x16xf32>
    %245 = arith.mulf %244, %241 : vector<16x16xf32>
    %246 = arith.select %243, %241, %245 : vector<16x16xi1>, vector<16x16xf32>
    %247 = vector.extract_strided_slice %0 {offsets = [0, 0], sizes = [16, 3], strides = [1, 1]} : vector<64x3xf32> to vector<16x3xf32>
    %c0_96 = arith.constant 0 : index
    %c0_97 = arith.constant 0 : index
    %248 = vector.load %arg17[%c0_96, %c0_97] : memref<3x16xf32, #tpu.memory_space<vmem>>, vector<3x16xf32>
    %cst_98 = arith.constant dense<0.000000e+00> : vector<16x16xf32>
    %249 = tpu.matmul %247, %248, %cst_98 {dimension_numbers = #tpu.dot_dimension_numbers<[1], [0], [0], [1], [0, 0, 1, 1], [], []>} : vector<16x3xf32>, vector<3x16xf32>, vector<16x16xf32> -> vector<16x16xf32>
    %c0_99 = arith.constant 0 : index
    %c0_100 = arith.constant 0 : index
    %250 = vector.load %arg18[%c0_99, %c0_100] : memref<1x16xf32, #tpu.memory_space<vmem>>, vector<1x16xf32>
    %251 = vector.broadcast %250 : vector<1x16xf32> to vector<16x16xf32>
    %252 = arith.addf %249, %251 : vector<16x16xf32>
    %253 = vector.extract_strided_slice %82 {offsets = [0, 0], sizes = [16, 16], strides = [1, 1]} : vector<48x16xf32> to vector<16x16xf32>
    %254 = vector.extract_strided_slice %164 {offsets = [0, 0], sizes = [16, 16], strides = [1, 1]} : vector<32x16xf32> to vector<16x16xf32>
    %c0_101 = arith.constant 0 : index
    %c0_102 = arith.constant 0 : index
    %255 = vector.load %arg19[%c0_101, %c0_102] : memref<16x128xf32, #tpu.memory_space<vmem>>, vector<16x128xf32>
    %c0_103 = arith.constant 0 : index
    %c0_104 = arith.constant 0 : index
    %256 = vector.load %arg20[%c0_103, %c0_104] : memref<32x128xf32, #tpu.memory_space<vmem>>, vector<32x128xf32>
    %c0_105 = arith.constant 0 : index
    %c0_106 = arith.constant 0 : index
    %257 = vector.load %arg21[%c0_105, %c0_106] : memref<1x128xf32, #tpu.memory_space<vmem>>, vector<1x128xf32>
    %c0_107 = arith.constant 0 : index
    %c0_108 = arith.constant 0 : index
    %258 = vector.load %arg22[%c0_107, %c0_108] : memref<16x128xf32, #tpu.memory_space<vmem>>, vector<16x128xf32>
    %c0_109 = arith.constant 0 : index
    %c0_110 = arith.constant 0 : index
    %259 = vector.load %arg23[%c0_109, %c0_110] : memref<32x128xf32, #tpu.memory_space<vmem>>, vector<32x128xf32>
    %c0_111 = arith.constant 0 : index
    %c0_112 = arith.constant 0 : index
    %260 = vector.load %arg24[%c0_111, %c0_112] : memref<1x128xf32, #tpu.memory_space<vmem>>, vector<1x128xf32>
    %cst_113 = arith.constant 0.000000e+00 : f32
    %261 = vector.broadcast %cst_113 : f32 to vector<16x32xf32>
    %cst_114 = arith.constant 0.000000e+00 : f32
    %262 = vector.broadcast %cst_114 : f32 to vector<16x32xf32>
    %cst_115 = arith.constant dense<0.000000e+00> : vector<16x128xf32>
    %263 = tpu.matmul %252, %255, %cst_115 {dimension_numbers = #tpu.dot_dimension_numbers<[1], [0], [0], [1], [0, 0, 1, 1], [], []>} : vector<16x16xf32>, vector<16x128xf32>, vector<16x128xf32> -> vector<16x128xf32>
    %cst_116 = arith.constant dense<0.000000e+00> : vector<16x128xf32>
    %264 = tpu.matmul %261, %256, %cst_116 {dimension_numbers = #tpu.dot_dimension_numbers<[1], [0], [0], [1], [0, 0, 1, 1], [], []>} : vector<16x32xf32>, vector<32x128xf32>, vector<16x128xf32> -> vector<16x128xf32>
    %265 = arith.addf %263, %264 : vector<16x128xf32>
    %266 = vector.broadcast %257 : vector<1x128xf32> to vector<16x128xf32>
    %267 = arith.addf %265, %266 : vector<16x128xf32>
    %268 = arith.negf %267 : vector<16x128xf32>
    %269 = math.exp %268 : vector<16x128xf32>
    %cst_117 = arith.constant 1.000000e+00 : f32
    %270 = vector.broadcast %cst_117 : f32 to vector<16x128xf32>
    %271 = arith.addf %270, %269 : vector<16x128xf32>
    %272 = arith.divf %270, %271 : vector<16x128xf32>
    %273 = math.tanh %267 : vector<16x128xf32>
    %274 = vector.extract_strided_slice %272 {offsets = [0, 0], sizes = [16, 32], strides = [1, 1]} : vector<16x128xf32> to vector<16x32xf32>
    %275 = vector.extract_strided_slice %272 {offsets = [0, 32], sizes = [16, 32], strides = [1, 1]} : vector<16x128xf32> to vector<16x32xf32>
    %276 = vector.extract_strided_slice %272 {offsets = [0, 96], sizes = [16, 32], strides = [1, 1]} : vector<16x128xf32> to vector<16x32xf32>
    %277 = vector.extract_strided_slice %273 {offsets = [0, 64], sizes = [16, 32], strides = [1, 1]} : vector<16x128xf32> to vector<16x32xf32>
    %278 = arith.mulf %275, %262 : vector<16x32xf32>
    %279 = arith.mulf %274, %277 : vector<16x32xf32>
    %280 = arith.addf %278, %279 : vector<16x32xf32>
    %281 = math.tanh %280 : vector<16x32xf32>
    %282 = arith.mulf %276, %281 : vector<16x32xf32>
    %cst_118 = arith.constant dense<0.000000e+00> : vector<16x128xf32>
    %283 = tpu.matmul %253, %255, %cst_118 {dimension_numbers = #tpu.dot_dimension_numbers<[1], [0], [0], [1], [0, 0, 1, 1], [], []>} : vector<16x16xf32>, vector<16x128xf32>, vector<16x128xf32> -> vector<16x128xf32>
    %cst_119 = arith.constant dense<0.000000e+00> : vector<16x128xf32>
    %284 = tpu.matmul %282, %256, %cst_119 {dimension_numbers = #tpu.dot_dimension_numbers<[1], [0], [0], [1], [0, 0, 1, 1], [], []>} : vector<16x32xf32>, vector<32x128xf32>, vector<16x128xf32> -> vector<16x128xf32>
    %285 = arith.addf %283, %284 : vector<16x128xf32>
    %286 = vector.broadcast %257 : vector<1x128xf32> to vector<16x128xf32>
    %287 = arith.addf %285, %286 : vector<16x128xf32>
    %288 = arith.negf %287 : vector<16x128xf32>
    %289 = math.exp %288 : vector<16x128xf32>
    %cst_120 = arith.constant 1.000000e+00 : f32
    %290 = vector.broadcast %cst_120 : f32 to vector<16x128xf32>
    %291 = arith.addf %290, %289 : vector<16x128xf32>
    %292 = arith.divf %290, %291 : vector<16x128xf32>
    %293 = math.tanh %287 : vector<16x128xf32>
    %294 = vector.extract_strided_slice %292 {offsets = [0, 0], sizes = [16, 32], strides = [1, 1]} : vector<16x128xf32> to vector<16x32xf32>
    %295 = vector.extract_strided_slice %292 {offsets = [0, 32], sizes = [16, 32], strides = [1, 1]} : vector<16x128xf32> to vector<16x32xf32>
    %296 = vector.extract_strided_slice %292 {offsets = [0, 96], sizes = [16, 32], strides = [1, 1]} : vector<16x128xf32> to vector<16x32xf32>
    %297 = vector.extract_strided_slice %293 {offsets = [0, 64], sizes = [16, 32], strides = [1, 1]} : vector<16x128xf32> to vector<16x32xf32>
    %298 = arith.mulf %295, %280 : vector<16x32xf32>
    %299 = arith.mulf %294, %297 : vector<16x32xf32>
    %300 = arith.addf %298, %299 : vector<16x32xf32>
    %301 = math.tanh %300 : vector<16x32xf32>
    %302 = arith.mulf %296, %301 : vector<16x32xf32>
    %cst_121 = arith.constant dense<0.000000e+00> : vector<16x128xf32>
    %303 = tpu.matmul %254, %255, %cst_121 {dimension_numbers = #tpu.dot_dimension_numbers<[1], [0], [0], [1], [0, 0, 1, 1], [], []>} : vector<16x16xf32>, vector<16x128xf32>, vector<16x128xf32> -> vector<16x128xf32>
    %cst_122 = arith.constant dense<0.000000e+00> : vector<16x128xf32>
    %304 = tpu.matmul %302, %256, %cst_122 {dimension_numbers = #tpu.dot_dimension_numbers<[1], [0], [0], [1], [0, 0, 1, 1], [], []>} : vector<16x32xf32>, vector<32x128xf32>, vector<16x128xf32> -> vector<16x128xf32>
    %305 = arith.addf %303, %304 : vector<16x128xf32>
    %306 = vector.broadcast %257 : vector<1x128xf32> to vector<16x128xf32>
    %307 = arith.addf %305, %306 : vector<16x128xf32>
    %308 = arith.negf %307 : vector<16x128xf32>
    %309 = math.exp %308 : vector<16x128xf32>
    %cst_123 = arith.constant 1.000000e+00 : f32
    %310 = vector.broadcast %cst_123 : f32 to vector<16x128xf32>
    %311 = arith.addf %310, %309 : vector<16x128xf32>
    %312 = arith.divf %310, %311 : vector<16x128xf32>
    %313 = math.tanh %307 : vector<16x128xf32>
    %314 = vector.extract_strided_slice %312 {offsets = [0, 0], sizes = [16, 32], strides = [1, 1]} : vector<16x128xf32> to vector<16x32xf32>
    %315 = vector.extract_strided_slice %312 {offsets = [0, 32], sizes = [16, 32], strides = [1, 1]} : vector<16x128xf32> to vector<16x32xf32>
    %316 = vector.extract_strided_slice %312 {offsets = [0, 96], sizes = [16, 32], strides = [1, 1]} : vector<16x128xf32> to vector<16x32xf32>
    %317 = vector.extract_strided_slice %313 {offsets = [0, 64], sizes = [16, 32], strides = [1, 1]} : vector<16x128xf32> to vector<16x32xf32>
    %318 = arith.mulf %315, %300 : vector<16x32xf32>
    %319 = arith.mulf %314, %317 : vector<16x32xf32>
    %320 = arith.addf %318, %319 : vector<16x32xf32>
    %321 = math.tanh %320 : vector<16x32xf32>
    %322 = arith.mulf %316, %321 : vector<16x32xf32>
    %cst_124 = arith.constant dense<0.000000e+00> : vector<16x128xf32>
    %323 = tpu.matmul %246, %255, %cst_124 {dimension_numbers = #tpu.dot_dimension_numbers<[1], [0], [0], [1], [0, 0, 1, 1], [], []>} : vector<16x16xf32>, vector<16x128xf32>, vector<16x128xf32> -> vector<16x128xf32>
    %cst_125 = arith.constant dense<0.000000e+00> : vector<16x128xf32>
    %324 = tpu.matmul %322, %256, %cst_125 {dimension_numbers = #tpu.dot_dimension_numbers<[1], [0], [0], [1], [0, 0, 1, 1], [], []>} : vector<16x32xf32>, vector<32x128xf32>, vector<16x128xf32> -> vector<16x128xf32>
    %325 = arith.addf %323, %324 : vector<16x128xf32>
    %326 = vector.broadcast %257 : vector<1x128xf32> to vector<16x128xf32>
    %327 = arith.addf %325, %326 : vector<16x128xf32>
    %328 = arith.negf %327 : vector<16x128xf32>
    %329 = math.exp %328 : vector<16x128xf32>
    %cst_126 = arith.constant 1.000000e+00 : f32
    %330 = vector.broadcast %cst_126 : f32 to vector<16x128xf32>
    %331 = arith.addf %330, %329 : vector<16x128xf32>
    %332 = arith.divf %330, %331 : vector<16x128xf32>
    %333 = math.tanh %327 : vector<16x128xf32>
    %334 = vector.extract_strided_slice %332 {offsets = [0, 0], sizes = [16, 32], strides = [1, 1]} : vector<16x128xf32> to vector<16x32xf32>
    %335 = vector.extract_strided_slice %332 {offsets = [0, 32], sizes = [16, 32], strides = [1, 1]} : vector<16x128xf32> to vector<16x32xf32>
    %336 = vector.extract_strided_slice %332 {offsets = [0, 96], sizes = [16, 32], strides = [1, 1]} : vector<16x128xf32> to vector<16x32xf32>
    %337 = vector.extract_strided_slice %333 {offsets = [0, 64], sizes = [16, 32], strides = [1, 1]} : vector<16x128xf32> to vector<16x32xf32>
    %338 = arith.mulf %335, %320 : vector<16x32xf32>
    %339 = arith.mulf %334, %337 : vector<16x32xf32>
    %340 = arith.addf %338, %339 : vector<16x32xf32>
    %341 = math.tanh %340 : vector<16x32xf32>
    %342 = arith.mulf %336, %341 : vector<16x32xf32>
    %cst_127 = arith.constant 0.000000e+00 : f32
    %343 = vector.broadcast %cst_127 : f32 to vector<16x32xf32>
    %cst_128 = arith.constant 0.000000e+00 : f32
    %344 = vector.broadcast %cst_128 : f32 to vector<16x32xf32>
    %cst_129 = arith.constant dense<0.000000e+00> : vector<16x128xf32>
    %345 = tpu.matmul %246, %258, %cst_129 {dimension_numbers = #tpu.dot_dimension_numbers<[1], [0], [0], [1], [0, 0, 1, 1], [], []>} : vector<16x16xf32>, vector<16x128xf32>, vector<16x128xf32> -> vector<16x128xf32>
    %cst_130 = arith.constant dense<0.000000e+00> : vector<16x128xf32>
    %346 = tpu.matmul %343, %259, %cst_130 {dimension_numbers = #tpu.dot_dimension_numbers<[1], [0], [0], [1], [0, 0, 1, 1], [], []>} : vector<16x32xf32>, vector<32x128xf32>, vector<16x128xf32> -> vector<16x128xf32>
    %347 = arith.addf %345, %346 : vector<16x128xf32>
    %348 = vector.broadcast %260 : vector<1x128xf32> to vector<16x128xf32>
    %349 = arith.addf %347, %348 : vector<16x128xf32>
    %350 = arith.negf %349 : vector<16x128xf32>
    %351 = math.exp %350 : vector<16x128xf32>
    %cst_131 = arith.constant 1.000000e+00 : f32
    %352 = vector.broadcast %cst_131 : f32 to vector<16x128xf32>
    %353 = arith.addf %352, %351 : vector<16x128xf32>
    %354 = arith.divf %352, %353 : vector<16x128xf32>
    %355 = math.tanh %349 : vector<16x128xf32>
    %356 = vector.extract_strided_slice %354 {offsets = [0, 0], sizes = [16, 32], strides = [1, 1]} : vector<16x128xf32> to vector<16x32xf32>
    %357 = vector.extract_strided_slice %354 {offsets = [0, 32], sizes = [16, 32], strides = [1, 1]} : vector<16x128xf32> to vector<16x32xf32>
    %358 = vector.extract_strided_slice %354 {offsets = [0, 96], sizes = [16, 32], strides = [1, 1]} : vector<16x128xf32> to vector<16x32xf32>
    %359 = vector.extract_strided_slice %355 {offsets = [0, 64], sizes = [16, 32], strides = [1, 1]} : vector<16x128xf32> to vector<16x32xf32>
    %360 = arith.mulf %357, %344 : vector<16x32xf32>
    %361 = arith.mulf %356, %359 : vector<16x32xf32>
    %362 = arith.addf %360, %361 : vector<16x32xf32>
    %363 = math.tanh %362 : vector<16x32xf32>
    %364 = arith.mulf %358, %363 : vector<16x32xf32>
    %cst_132 = arith.constant dense<0.000000e+00> : vector<16x128xf32>
    %365 = tpu.matmul %254, %258, %cst_132 {dimension_numbers = #tpu.dot_dimension_numbers<[1], [0], [0], [1], [0, 0, 1, 1], [], []>} : vector<16x16xf32>, vector<16x128xf32>, vector<16x128xf32> -> vector<16x128xf32>
    %cst_133 = arith.constant dense<0.000000e+00> : vector<16x128xf32>
    %366 = tpu.matmul %364, %259, %cst_133 {dimension_numbers = #tpu.dot_dimension_numbers<[1], [0], [0], [1], [0, 0, 1, 1], [], []>} : vector<16x32xf32>, vector<32x128xf32>, vector<16x128xf32> -> vector<16x128xf32>
    %367 = arith.addf %365, %366 : vector<16x128xf32>
    %368 = vector.broadcast %260 : vector<1x128xf32> to vector<16x128xf32>
    %369 = arith.addf %367, %368 : vector<16x128xf32>
    %370 = arith.negf %369 : vector<16x128xf32>
    %371 = math.exp %370 : vector<16x128xf32>
    %cst_134 = arith.constant 1.000000e+00 : f32
    %372 = vector.broadcast %cst_134 : f32 to vector<16x128xf32>
    %373 = arith.addf %372, %371 : vector<16x128xf32>
    %374 = arith.divf %372, %373 : vector<16x128xf32>
    %375 = math.tanh %369 : vector<16x128xf32>
    %376 = vector.extract_strided_slice %374 {offsets = [0, 0], sizes = [16, 32], strides = [1, 1]} : vector<16x128xf32> to vector<16x32xf32>
    %377 = vector.extract_strided_slice %374 {offsets = [0, 32], sizes = [16, 32], strides = [1, 1]} : vector<16x128xf32> to vector<16x32xf32>
    %378 = vector.extract_strided_slice %374 {offsets = [0, 96], sizes = [16, 32], strides = [1, 1]} : vector<16x128xf32> to vector<16x32xf32>
    %379 = vector.extract_strided_slice %375 {offsets = [0, 64], sizes = [16, 32], strides = [1, 1]} : vector<16x128xf32> to vector<16x32xf32>
    %380 = arith.mulf %377, %362 : vector<16x32xf32>
    %381 = arith.mulf %376, %379 : vector<16x32xf32>
    %382 = arith.addf %380, %381 : vector<16x32xf32>
    %383 = math.tanh %382 : vector<16x32xf32>
    %384 = arith.mulf %378, %383 : vector<16x32xf32>
    %cst_135 = arith.constant dense<0.000000e+00> : vector<16x128xf32>
    %385 = tpu.matmul %253, %258, %cst_135 {dimension_numbers = #tpu.dot_dimension_numbers<[1], [0], [0], [1], [0, 0, 1, 1], [], []>} : vector<16x16xf32>, vector<16x128xf32>, vector<16x128xf32> -> vector<16x128xf32>
    %cst_136 = arith.constant dense<0.000000e+00> : vector<16x128xf32>
    %386 = tpu.matmul %384, %259, %cst_136 {dimension_numbers = #tpu.dot_dimension_numbers<[1], [0], [0], [1], [0, 0, 1, 1], [], []>} : vector<16x32xf32>, vector<32x128xf32>, vector<16x128xf32> -> vector<16x128xf32>
    %387 = arith.addf %385, %386 : vector<16x128xf32>
    %388 = vector.broadcast %260 : vector<1x128xf32> to vector<16x128xf32>
    %389 = arith.addf %387, %388 : vector<16x128xf32>
    %390 = arith.negf %389 : vector<16x128xf32>
    %391 = math.exp %390 : vector<16x128xf32>
    %cst_137 = arith.constant 1.000000e+00 : f32
    %392 = vector.broadcast %cst_137 : f32 to vector<16x128xf32>
    %393 = arith.addf %392, %391 : vector<16x128xf32>
    %394 = arith.divf %392, %393 : vector<16x128xf32>
    %395 = math.tanh %389 : vector<16x128xf32>
    %396 = vector.extract_strided_slice %394 {offsets = [0, 0], sizes = [16, 32], strides = [1, 1]} : vector<16x128xf32> to vector<16x32xf32>
    %397 = vector.extract_strided_slice %394 {offsets = [0, 32], sizes = [16, 32], strides = [1, 1]} : vector<16x128xf32> to vector<16x32xf32>
    %398 = vector.extract_strided_slice %394 {offsets = [0, 96], sizes = [16, 32], strides = [1, 1]} : vector<16x128xf32> to vector<16x32xf32>
    %399 = vector.extract_strided_slice %395 {offsets = [0, 64], sizes = [16, 32], strides = [1, 1]} : vector<16x128xf32> to vector<16x32xf32>
    %400 = arith.mulf %397, %382 : vector<16x32xf32>
    %401 = arith.mulf %396, %399 : vector<16x32xf32>
    %402 = arith.addf %400, %401 : vector<16x32xf32>
    %403 = math.tanh %402 : vector<16x32xf32>
    %404 = arith.mulf %398, %403 : vector<16x32xf32>
    %cst_138 = arith.constant dense<0.000000e+00> : vector<16x128xf32>
    %405 = tpu.matmul %252, %258, %cst_138 {dimension_numbers = #tpu.dot_dimension_numbers<[1], [0], [0], [1], [0, 0, 1, 1], [], []>} : vector<16x16xf32>, vector<16x128xf32>, vector<16x128xf32> -> vector<16x128xf32>
    %cst_139 = arith.constant dense<0.000000e+00> : vector<16x128xf32>
    %406 = tpu.matmul %404, %259, %cst_139 {dimension_numbers = #tpu.dot_dimension_numbers<[1], [0], [0], [1], [0, 0, 1, 1], [], []>} : vector<16x32xf32>, vector<32x128xf32>, vector<16x128xf32> -> vector<16x128xf32>
    %407 = arith.addf %405, %406 : vector<16x128xf32>
    %408 = vector.broadcast %260 : vector<1x128xf32> to vector<16x128xf32>
    %409 = arith.addf %407, %408 : vector<16x128xf32>
    %410 = arith.negf %409 : vector<16x128xf32>
    %411 = math.exp %410 : vector<16x128xf32>
    %cst_140 = arith.constant 1.000000e+00 : f32
    %412 = vector.broadcast %cst_140 : f32 to vector<16x128xf32>
    %413 = arith.addf %412, %411 : vector<16x128xf32>
    %414 = arith.divf %412, %413 : vector<16x128xf32>
    %415 = math.tanh %409 : vector<16x128xf32>
    %416 = vector.extract_strided_slice %414 {offsets = [0, 0], sizes = [16, 32], strides = [1, 1]} : vector<16x128xf32> to vector<16x32xf32>
    %417 = vector.extract_strided_slice %414 {offsets = [0, 32], sizes = [16, 32], strides = [1, 1]} : vector<16x128xf32> to vector<16x32xf32>
    %418 = vector.extract_strided_slice %414 {offsets = [0, 96], sizes = [16, 32], strides = [1, 1]} : vector<16x128xf32> to vector<16x32xf32>
    %419 = vector.extract_strided_slice %415 {offsets = [0, 64], sizes = [16, 32], strides = [1, 1]} : vector<16x128xf32> to vector<16x32xf32>
    %420 = arith.mulf %417, %402 : vector<16x32xf32>
    %421 = arith.mulf %416, %419 : vector<16x32xf32>
    %422 = arith.addf %420, %421 : vector<16x32xf32>
    %423 = math.tanh %422 : vector<16x32xf32>
    %424 = arith.mulf %418, %423 : vector<16x32xf32>
    %c0_141 = arith.constant 0 : index
    %c0_142 = arith.constant 0 : index
    %425 = vector.load %arg25[%c0_141, %c0_142] : memref<32x1xf32, #tpu.memory_space<vmem>>, vector<32x1xf32>
    %cst_143 = arith.constant dense<0.000000e+00> : vector<16x1xf32>
    %426 = tpu.matmul %282, %425, %cst_143 {dimension_numbers = #tpu.dot_dimension_numbers<[1], [0], [0], [1], [0, 0, 1, 1], [], []>} : vector<16x32xf32>, vector<32x1xf32>, vector<16x1xf32> -> vector<16x1xf32>
    %c0_144 = arith.constant 0 : index
    %c0_145 = arith.constant 0 : index
    %427 = vector.load %arg26[%c0_144, %c0_145] : memref<32x1xf32, #tpu.memory_space<vmem>>, vector<32x1xf32>
    %cst_146 = arith.constant dense<0.000000e+00> : vector<16x1xf32>
    %428 = tpu.matmul %424, %427, %cst_146 {dimension_numbers = #tpu.dot_dimension_numbers<[1], [0], [0], [1], [0, 0, 1, 1], [], []>} : vector<16x32xf32>, vector<32x1xf32>, vector<16x1xf32> -> vector<16x1xf32>
    %429 = arith.addf %426, %428 : vector<16x1xf32>
    %c0_147 = arith.constant 0 : index
    %c0_148 = arith.constant 0 : index
    %430 = vector.load %arg27[%c0_147, %c0_148] : memref<1x1xf32, #tpu.memory_space<vmem>>, vector<1x1xf32>
    %431 = vector.broadcast %430 : vector<1x1xf32> to vector<16x1xf32>
    %432 = arith.addf %429, %431 : vector<16x1xf32>
    %c0_149 = arith.constant 0 : index
    %c0_150 = arith.constant 0 : index
    %433 = vector.load %arg25[%c0_149, %c0_150] : memref<32x1xf32, #tpu.memory_space<vmem>>, vector<32x1xf32>
    %cst_151 = arith.constant dense<0.000000e+00> : vector<16x1xf32>
    %434 = tpu.matmul %302, %433, %cst_151 {dimension_numbers = #tpu.dot_dimension_numbers<[1], [0], [0], [1], [0, 0, 1, 1], [], []>} : vector<16x32xf32>, vector<32x1xf32>, vector<16x1xf32> -> vector<16x1xf32>
    %c0_152 = arith.constant 0 : index
    %c0_153 = arith.constant 0 : index
    %435 = vector.load %arg26[%c0_152, %c0_153] : memref<32x1xf32, #tpu.memory_space<vmem>>, vector<32x1xf32>
    %cst_154 = arith.constant dense<0.000000e+00> : vector<16x1xf32>
    %436 = tpu.matmul %404, %435, %cst_154 {dimension_numbers = #tpu.dot_dimension_numbers<[1], [0], [0], [1], [0, 0, 1, 1], [], []>} : vector<16x32xf32>, vector<32x1xf32>, vector<16x1xf32> -> vector<16x1xf32>
    %437 = arith.addf %434, %436 : vector<16x1xf32>
    %c0_155 = arith.constant 0 : index
    %c0_156 = arith.constant 0 : index
    %438 = vector.load %arg27[%c0_155, %c0_156] : memref<1x1xf32, #tpu.memory_space<vmem>>, vector<1x1xf32>
    %439 = vector.broadcast %438 : vector<1x1xf32> to vector<16x1xf32>
    %440 = arith.addf %437, %439 : vector<16x1xf32>
    %c0_157 = arith.constant 0 : index
    %c0_158 = arith.constant 0 : index
    %441 = vector.load %arg25[%c0_157, %c0_158] : memref<32x1xf32, #tpu.memory_space<vmem>>, vector<32x1xf32>
    %cst_159 = arith.constant dense<0.000000e+00> : vector<16x1xf32>
    %442 = tpu.matmul %322, %441, %cst_159 {dimension_numbers = #tpu.dot_dimension_numbers<[1], [0], [0], [1], [0, 0, 1, 1], [], []>} : vector<16x32xf32>, vector<32x1xf32>, vector<16x1xf32> -> vector<16x1xf32>
    %c0_160 = arith.constant 0 : index
    %c0_161 = arith.constant 0 : index
    %443 = vector.load %arg26[%c0_160, %c0_161] : memref<32x1xf32, #tpu.memory_space<vmem>>, vector<32x1xf32>
    %cst_162 = arith.constant dense<0.000000e+00> : vector<16x1xf32>
    %444 = tpu.matmul %384, %443, %cst_162 {dimension_numbers = #tpu.dot_dimension_numbers<[1], [0], [0], [1], [0, 0, 1, 1], [], []>} : vector<16x32xf32>, vector<32x1xf32>, vector<16x1xf32> -> vector<16x1xf32>
    %445 = arith.addf %442, %444 : vector<16x1xf32>
    %c0_163 = arith.constant 0 : index
    %c0_164 = arith.constant 0 : index
    %446 = vector.load %arg27[%c0_163, %c0_164] : memref<1x1xf32, #tpu.memory_space<vmem>>, vector<1x1xf32>
    %447 = vector.broadcast %446 : vector<1x1xf32> to vector<16x1xf32>
    %448 = arith.addf %445, %447 : vector<16x1xf32>
    %c0_165 = arith.constant 0 : index
    %c0_166 = arith.constant 0 : index
    %449 = vector.load %arg25[%c0_165, %c0_166] : memref<32x1xf32, #tpu.memory_space<vmem>>, vector<32x1xf32>
    %cst_167 = arith.constant dense<0.000000e+00> : vector<16x1xf32>
    %450 = tpu.matmul %342, %449, %cst_167 {dimension_numbers = #tpu.dot_dimension_numbers<[1], [0], [0], [1], [0, 0, 1, 1], [], []>} : vector<16x32xf32>, vector<32x1xf32>, vector<16x1xf32> -> vector<16x1xf32>
    %c0_168 = arith.constant 0 : index
    %c0_169 = arith.constant 0 : index
    %451 = vector.load %arg26[%c0_168, %c0_169] : memref<32x1xf32, #tpu.memory_space<vmem>>, vector<32x1xf32>
    %cst_170 = arith.constant dense<0.000000e+00> : vector<16x1xf32>
    %452 = tpu.matmul %364, %451, %cst_170 {dimension_numbers = #tpu.dot_dimension_numbers<[1], [0], [0], [1], [0, 0, 1, 1], [], []>} : vector<16x32xf32>, vector<32x1xf32>, vector<16x1xf32> -> vector<16x1xf32>
    %453 = arith.addf %450, %452 : vector<16x1xf32>
    %c0_171 = arith.constant 0 : index
    %c0_172 = arith.constant 0 : index
    %454 = vector.load %arg27[%c0_171, %c0_172] : memref<1x1xf32, #tpu.memory_space<vmem>>, vector<1x1xf32>
    %455 = vector.broadcast %454 : vector<1x1xf32> to vector<16x1xf32>
    %456 = arith.addf %453, %455 : vector<16x1xf32>
    %457 = arith.maximumf %432, %440 : vector<16x1xf32>
    %458 = arith.maximumf %457, %448 : vector<16x1xf32>
    %459 = arith.maximumf %458, %456 : vector<16x1xf32>
    %460 = arith.subf %432, %459 : vector<16x1xf32>
    %461 = math.exp %460 : vector<16x1xf32>
    %462 = arith.subf %440, %459 : vector<16x1xf32>
    %463 = math.exp %462 : vector<16x1xf32>
    %464 = arith.subf %448, %459 : vector<16x1xf32>
    %465 = math.exp %464 : vector<16x1xf32>
    %466 = arith.subf %456, %459 : vector<16x1xf32>
    %467 = math.exp %466 : vector<16x1xf32>
    %468 = arith.addf %461, %463 : vector<16x1xf32>
    %469 = arith.addf %468, %465 : vector<16x1xf32>
    %470 = arith.addf %469, %467 : vector<16x1xf32>
    %471 = tpu.reciprocal %470 {approx = true} : vector<16x1xf32> -> vector<16x1xf32>
    %cst_173 = arith.constant 0.000000e+00 : f32
    %472 = vector.broadcast %cst_173 : f32 to vector<16x16xf32>
    %473 = arith.mulf %461, %471 : vector<16x1xf32>
    %474 = vector.broadcast %473 : vector<16x1xf32> to vector<16x16xf32>
    %475 = arith.mulf %474, %252 : vector<16x16xf32>
    %476 = arith.addf %472, %475 : vector<16x16xf32>
    %477 = arith.mulf %463, %471 : vector<16x1xf32>
    %478 = vector.broadcast %477 : vector<16x1xf32> to vector<16x16xf32>
    %479 = arith.mulf %478, %253 : vector<16x16xf32>
    %480 = arith.addf %476, %479 : vector<16x16xf32>
    %481 = arith.mulf %465, %471 : vector<16x1xf32>
    %482 = vector.broadcast %481 : vector<16x1xf32> to vector<16x16xf32>
    %483 = arith.mulf %482, %254 : vector<16x16xf32>
    %484 = arith.addf %480, %483 : vector<16x16xf32>
    %485 = arith.mulf %467, %471 : vector<16x1xf32>
    %486 = vector.broadcast %485 : vector<16x1xf32> to vector<16x16xf32>
    %487 = arith.mulf %486, %246 : vector<16x16xf32>
    %488 = arith.addf %484, %487 : vector<16x16xf32>
    %c0_174 = arith.constant 0 : index
    %c0_175 = arith.constant 0 : index
    %489 = vector.load %arg28[%c0_174, %c0_175] : memref<16x16xf32, #tpu.memory_space<vmem>>, vector<16x16xf32>
    tpu.vector_store %arg28[%c0_174, %c0_175], %488 {strides = array<i32>} : memref<16x16xf32, #tpu.memory_space<vmem>>, vector<16x16xf32>,
    return
  }
  func.func @transform_0(%arg0: i32) -> (i32, i32) {
    %c0_i32 = arith.constant 0 : i32
    %c0_i32_0 = arith.constant 0 : i32
    %c0_i32_1 = arith.constant 0 : i32
    return %c0_i32, %c0_i32_0 : i32, i32
  }
  func.func @transform_1(%arg0: i32) -> (i32, i32) {
    %c0_i32 = arith.constant 0 : i32
    %c0_i32_0 = arith.constant 0 : i32
    %c0_i32_1 = arith.constant 0 : i32
    return %c0_i32, %c0_i32_0 : i32, i32
  }
  func.func @transform_2(%arg0: i32) -> (i32, i32) {
    %c0_i32 = arith.constant 0 : i32
    %c0_i32_0 = arith.constant 0 : i32
    %c0_i32_1 = arith.constant 0 : i32
    return %c0_i32, %c0_i32_0 : i32, i32
  }
  func.func @transform_3(%arg0: i32) -> (i32, i32) {
    %c0_i32 = arith.constant 0 : i32
    %c0_i32_0 = arith.constant 0 : i32
    %c0_i32_1 = arith.constant 0 : i32
    return %c0_i32, %c0_i32_0 : i32, i32
  }
  func.func @transform_4(%arg0: i32) -> (i32, i32) {
    %c0_i32 = arith.constant 0 : i32
    %c0_i32_0 = arith.constant 0 : i32
    %c0_i32_1 = arith.constant 0 : i32
    return %c0_i32, %c0_i32_0 : i32, i32
  }
  func.func @transform_5(%arg0: i32) -> (i32, i32) {
    %c0_i32 = arith.constant 0 : i32
    %c0_i32_0 = arith.constant 0 : i32
    %c0_i32_1 = arith.constant 0 : i32
    return %c0_i32, %c0_i32_0 : i32, i32
  }
  func.func @transform_6(%arg0: i32) -> (i32, i32) {
    %c0_i32 = arith.constant 0 : i32
    %c0_i32_0 = arith.constant 0 : i32
    %c0_i32_1 = arith.constant 0 : i32
    return %c0_i32, %c0_i32_0 : i32, i32
  }
  func.func @transform_7(%arg0: i32) -> (i32, i32) {
    %c0_i32 = arith.constant 0 : i32
    %c0_i32_0 = arith.constant 0 : i32
    %c0_i32_1 = arith.constant 0 : i32
    return %c0_i32, %c0_i32_0 : i32, i32
  }
  func.func @transform_8(%arg0: i32) -> (i32, i32) {
    %c0_i32 = arith.constant 0 : i32
    %c0_i32_0 = arith.constant 0 : i32
    %c0_i32_1 = arith.constant 0 : i32
    return %c0_i32, %c0_i32_0 : i32, i32
  }
  func.func @transform_9(%arg0: i32) -> (i32, i32) {
    %c0_i32 = arith.constant 0 : i32
    %c0_i32_0 = arith.constant 0 : i32
    %c0_i32_1 = arith.constant 0 : i32
    return %c0_i32, %c0_i32_0 : i32, i32
  }
  func.func @transform_10(%arg0: i32) -> (i32, i32) {
    %c0_i32 = arith.constant 0 : i32
    %c0_i32_0 = arith.constant 0 : i32
    %c0_i32_1 = arith.constant 0 : i32
    return %c0_i32, %c0_i32_0 : i32, i32
  }
  func.func @transform_11(%arg0: i32) -> (i32, i32) {
    %c0_i32 = arith.constant 0 : i32
    %c0_i32_0 = arith.constant 0 : i32
    %c0_i32_1 = arith.constant 0 : i32
    return %c0_i32, %c0_i32_0 : i32, i32
  }
  func.func @transform_12(%arg0: i32) -> (i32, i32) {
    %c0_i32 = arith.constant 0 : i32
    %c0_i32_0 = arith.constant 0 : i32
    %c0_i32_1 = arith.constant 0 : i32
    return %c0_i32, %c0_i32_0 : i32, i32
  }
  func.func @transform_13(%arg0: i32) -> (i32, i32) {
    %c0_i32 = arith.constant 0 : i32
    %c0_i32_0 = arith.constant 0 : i32
    %c0_i32_1 = arith.constant 0 : i32
    return %c0_i32, %c0_i32_0 : i32, i32
  }
  func.func @transform_14(%arg0: i32) -> (i32, i32) {
    %c0_i32 = arith.constant 0 : i32
    %c0_i32_0 = arith.constant 0 : i32
    %c0_i32_1 = arith.constant 0 : i32
    return %c0_i32, %c0_i32_0 : i32, i32
  }
  func.func @transform_15(%arg0: i32) -> (i32, i32) {
    %c0_i32 = arith.constant 0 : i32
    %c0_i32_0 = arith.constant 0 : i32
    %c0_i32_1 = arith.constant 0 : i32
    return %c0_i32, %c0_i32_0 : i32, i32
  }
  func.func @transform_16(%arg0: i32) -> (i32, i32) {
    %c0_i32 = arith.constant 0 : i32
    %c0_i32_0 = arith.constant 0 : i32
    %c0_i32_1 = arith.constant 0 : i32
    return %c0_i32, %c0_i32_0 : i32, i32
  }
  func.func @transform_17(%arg0: i32) -> (i32, i32) {
    %c0_i32 = arith.constant 0 : i32
    %c0_i32_0 = arith.constant 0 : i32
    %c0_i32_1 = arith.constant 0 : i32
    return %c0_i32, %c0_i32_0 : i32, i32
  }
  func.func @transform_18(%arg0: i32) -> (i32, i32) {
    %c0_i32 = arith.constant 0 : i32
    %c0_i32_0 = arith.constant 0 : i32
    %c0_i32_1 = arith.constant 0 : i32
    return %c0_i32, %c0_i32_0 : i32, i32
  }
  func.func @transform_19(%arg0: i32) -> (i32, i32) {
    %c0_i32 = arith.constant 0 : i32
    %c0_i32_0 = arith.constant 0 : i32
    %c0_i32_1 = arith.constant 0 : i32
    return %c0_i32, %c0_i32_0 : i32, i32
  }
  func.func @transform_20(%arg0: i32) -> (i32, i32) {
    %c0_i32 = arith.constant 0 : i32
    %c0_i32_0 = arith.constant 0 : i32
    %c0_i32_1 = arith.constant 0 : i32
    return %c0_i32, %c0_i32_0 : i32, i32
  }
  func.func @transform_21(%arg0: i32) -> (i32, i32) {
    %c0_i32 = arith.constant 0 : i32
    %c0_i32_0 = arith.constant 0 : i32
    %c0_i32_1 = arith.constant 0 : i32
    return %c0_i32, %c0_i32_0 : i32, i32
  }
  func.func @transform_22(%arg0: i32) -> (i32, i32) {
    %c0_i32 = arith.constant 0 : i32
    %c0_i32_0 = arith.constant 0 : i32
    %c0_i32_1 = arith.constant 0 : i32
    return %c0_i32, %c0_i32_0 : i32, i32
  }
  func.func @transform_23(%arg0: i32) -> (i32, i32) {
    %c0_i32 = arith.constant 0 : i32
    %c0_i32_0 = arith.constant 0 : i32
    %c0_i32_1 = arith.constant 0 : i32
    return %c0_i32, %c0_i32_0 : i32, i32
  }
  func.func @transform_24(%arg0: i32) -> (i32, i32) {
    %c0_i32 = arith.constant 0 : i32
    %c0_i32_0 = arith.constant 0 : i32
    %c0_i32_1 = arith.constant 0 : i32
    return %c0_i32, %c0_i32_0 : i32, i32
  }
  func.func @transform_25(%arg0: i32) -> (i32, i32) {
    %c0_i32 = arith.constant 0 : i32
    %c0_i32_0 = arith.constant 0 : i32
    %c0_i32_1 = arith.constant 0 : i32
    return %c0_i32, %c0_i32_0 : i32, i32
  }
  func.func @transform_26(%arg0: i32) -> (i32, i32) {
    %c0_i32 = arith.constant 0 : i32
    %c0_i32_0 = arith.constant 0 : i32
    %c0_i32_1 = arith.constant 0 : i32
    return %c0_i32, %c0_i32_0 : i32, i32
  }
  func.func @transform_27(%arg0: i32) -> (i32, i32) {
    %c0_i32 = arith.constant 0 : i32
    %c0_i32_0 = arith.constant 0 : i32
    %c0_i32_1 = arith.constant 0 : i32
    return %c0_i32, %c0_i32_0 : i32, i32
  }
}

</mosaic_0001>

<bundles_post_ra>
// kernel: tpu_custom_call.1
= control target key start
LH: loop header
LB: loop body
LE: loop exit
PB: predicated region body
PF: predicated region fallthrough
CT: control target
= control target key end

     0   :  { %s7962_s0 = inlined_call_operand.vmem [shape: f32[64,3], index: 0, kind: input, shape index: {}]   ;;  %s7963_s1 = inlined_call_operand.vmem [shape: f32[48,64], index: 1, kind: input, shape index: {}]   ;;  %s7964_s2 = inlined_call_operand.vmem [shape: f32[32,48], index: 2, kind: input, shape index: {}]   ;;  %s7965_s3 = inlined_call_operand.hbm [shape: f32[16,32], index: 3, kind: input, shape index: {}]   ;;  %s7966_s4 = inlined_call_operand.hbm [shape: f32[3,50], index: 4, kind: input, shape index: {}]   ;;  %s7967_s5 = inlined_call_operand.hbm [shape: f32[2,3], index: 5, kind: input, shape index: {}]   ;;  %s7968_s6 = inlined_call_operand.hbm [shape: f32[1,16], index: 6, kind: input, shape index: {}]   ;;  %s7969_s7 = inlined_call_operand.vmem [shape: f32[1,16], index: 7, kind: input, shape index: {}]   ;;  %s7970_s8 = inlined_call_operand.vmem [shape: f32[16,50], index: 8, kind: input, shape index: {}]   ;;  %s7971_s9 = inlined_call_operand.hbm [shape: f32[2,16], index: 9, kind: input, shape index: {}]   ;;  %s7972_s10 = inlined_call_operand.hbm [shape: f32[1,16], index: 10, kind: input, shape index: {}]   ;;  %s7973_s11 = inlined_call_operand.hbm [shape: f32[1,16], index: 11, kind: input, shape index: {}]   ;;  %s7974_s12 = inlined_call_operand.vmem [shape: f32[16,50], index: 12, kind: input, shape index: {}]   ;;  %s7975_s13 = inlined_call_operand.hbm [shape: f32[2,16], index: 13, kind: input, shape index: {}]   ;;  %s7976_s14 = inlined_call_operand.hbm [shape: f32[1,16], index: 14, kind: input, shape index: {}]   ;;  %s7977_s15 = inlined_call_operand.hbm [shape: f32[1,16], index: 15, kind: input, shape index: {}]   ;;  %s7978_s16 = inlined_call_operand.hbm [shape: f32[3,16], index: 16, kind: input, shape index: {}]   ;;  %s7979_s17 = inlined_call_operand.hbm [shape: f32[1,16], index: 17, kind: input, shape index: {}]   ;;  %s7980_s18 = inlined_call_operand.vmem [shape: f32[16,128], index: 18, kind: input, shape index: {}]   ;;  %s7981_s19 = inlined_call_operand.vmem [shape: f32[32,128], index: 19, kind: input, shape index: {}]   ;;  %s7982_s20 = inlined_call_operand.vmem [shape: f32[1,128], index: 20, kind: input, shape index: {}]   ;;  %s7983_s21 = inlined_call_operand.vmem [shape: f32[16,128], index: 21, kind: input, shape index: {}]   ;;  %s7984_s22 = inlined_call_operand.vmem [shape: f32[32,128], index: 22, kind: input, shape index: {}]   ;;  %s7985_s23 = inlined_call_operand.vmem [shape: f32[1,128], index: 23, kind: input, shape index: {}]   ;;  %s7986_s24 = inlined_call_operand.vmem [shape: f32[32,1], index: 24, kind: input, shape index: {}]   ;;  %s7987_s25 = inlined_call_operand.vmem [shape: f32[32,1], index: 25, kind: input, shape index: {}]   ;;  %s7988_s26 = inlined_call_operand.<no memory space> [shape: f32[1,1], index: 26, kind: input, shape index: {}]   ;;  %s7989_s27 = inlined_call_operand.hbm [shape: f32[16,16], index: 27, kind: output, shape index: {}]  }
   0x1   :  { %8001 = sst [smem:[#allocation32_spill]] %s7962_s0  ;;  %v32_v0 = vstv %s7988_s26 }
   0x2   :  { %8002 = sst [smem:[#allocation33_spill]] %s7963_s1  ;;  %33 = vst [vmem:[#allocation2] sm:$0x1] %v32_v0 }
   0x3   :  { %8003 = sst [smem:[#allocation34_spill]] %s7964_s2 }
   0x4   :  { %8004 = sst [smem:[#allocation35_spill]] %s7965_s3 }
   0x5   :  { %8005 = sst [smem:[#allocation36_spill]] %s7966_s4 }
   0x6   :  { %8006 = sst [smem:[#allocation37_spill]] %s7967_s5 }
   0x7   :  { %8007 = sst [smem:[#allocation38_spill]] %s7968_s6 }
   0x8   :  { %8008 = sst [smem:[#allocation39_spill]] %s7969_s7 }
   0x9   :  { %8009 = sst [smem:[#allocation40_spill]] %s7970_s8 }
   0xa   :  { %8010 = sst [smem:[#allocation41_spill]] %s7971_s9 }
   0xb   :  { %8011 = sst [smem:[#allocation42_spill]] %s7972_s10 }
   0xc   :  { %8012 = sst [smem:[#allocation43_spill]] %s7973_s11 }
   0xd   :  { %34 = vsyncpa [#allocation4], 0 }
   0xe   :  { %35 = vsyncpa [#allocation7], 0 }
   0xf   :  { %36 = vsyncpa [#allocation10], 0 }
  0x10   :  { %37 = vsyncpa [#allocation13], 0 }
  0x11   :  { %38 = vsyncpa [#allocation16], 0 }
  0x12   :  { %39 = vsyncpa [#allocation19], 0 }
  0x13   :  { %40 = vsyncpa [#allocation22], 0 }
  0x14   :  { %41 = vsyncpa [#allocation5], 0  ;;  %s6506_s8 = smov [#allocation6]   ;;  %s6507_s9 = smov [#allocation9]  }
  0x15   :  { %s66_s30 = sshll.u32 %s6506_s8, 4  ;;  %s86_s5 = sshll.u32 %s6507_s9, 4  ;;  %s67_s30 = int_to_ptr.vmem [resolvable:$true] %s66_s30  ;;  %s87_s5 = int_to_ptr.vmem [resolvable:$true] %s86_s5 }
  0x16   :  { %s8013_s10 = sld [smem:[#allocation36_spill]] }
  0x1c   :  { %s6204_s29 = scalar_lea.hbm %s8013_s10, 64 }
  0x1d   :  { %p6205_p0 = scmp.ne.s32.totalorder %s8013_s10, %s6204_s29  ;;  %p6208_p1 = scmp.lt.u32.totalorder %s6204_s29, %s8013_s10 }
  0x1f   :  { %p6210_p2 = pnand %p6208_p1, %p6205_p0 }
  0x21   :  { %6213 = shalt.err (!%p6210_p2)
}
  0x22   :  { %s6214_s2 = scalar_lea.vmem %s67_s30, 64  ;;  %p6219_p4 = scmp.lt.s32.totalorder %s67_s30, %s67_s30 }
  0x23   :  { %p6215_p3 = scmp.ne.s32.totalorder %s67_s30, %s6214_s2  ;;  %p6220_p5 = scmp.lt.s32.totalorder %s6214_s2, %s6214_s2 }
  0x25   :  { %p6221_p6 = por %p6220_p5, %p6219_p4 }
  0x27   :  { %p6222_p7 = pnand %p6221_p6, %p6215_p3 }
  0x29   :  { %6225 = shalt.err (!%p6222_p7)
}
  0x2a   :  { %69 = dma.hbm_to_vmem [thread:$0]  %s8013_s10, 64, %s67_s30, [#allocation7]  }
  0x2b   :  { %s8014_s9 = sld [smem:[#allocation38_spill]] }
  0x31   :  { %s6226_s28 = scalar_lea.hbm %s8014_s9, 16 }
  0x32   :  { %p6227_p8 = scmp.ne.s32.totalorder %s8014_s9, %s6226_s28  ;;  %p6230_p9 = scmp.lt.u32.totalorder %s6226_s28, %s8014_s9 }
  0x34   :  { %p6232_p10 = pnand %p6230_p9, %p6227_p8 }
  0x36   :  { %6235 = shalt.err (!%p6232_p10)
}
  0x37   :  { %s6236_s6 = scalar_lea.vmem %s87_s5, 16  ;;  %s6240_s11 = scalar_lea.vmem %s87_s5, 32 }
  0x38   :  { %p6237_p11 = scmp.ne.s32.totalorder %s87_s5, %s6236_s6  ;;  %p6241_p12 = scmp.lt.s32.totalorder %s87_s5, %s87_s5 }
  0x39   :  { %p6242_p13 = scmp.lt.s32.totalorder %s6240_s11, %s6236_s6 }
  0x3b   :  { %p6243_p0 = por %p6242_p13, %p6241_p12 }
  0x3d   :  { %p6244_p1 = pnand %p6243_p0, %p6237_p11 }
  0x3f   :  { %6247 = shalt.err (!%p6244_p1)
}
  0x40   :  { %89 = dma.hbm_to_vmem [thread:$0]  %s8014_s9, 16, %s87_s5, [#allocation10]  }
  0x41   :  { %s6508_s2 = smov [#allocation12]   ;;  %s6509_s7 = smov [#allocation15]  }
  0x42   :  { %s110_s3 = sshll.u32 %s6508_s2, 4  ;;  %s132_s4 = sshll.u32 %s6509_s7, 4  ;;  %s111_s3 = int_to_ptr.vmem [resolvable:$true] %s110_s3  ;;  %s133_s4 = int_to_ptr.vmem [resolvable:$true] %s132_s4 }
  0x43   :  { %s8015_s0 = sld [smem:[#allocation42_spill]] }
  0x49   :  { %s6248_s26 = scalar_lea.hbm %s8015_s0, 16 }
  0x4a   :  { %p6249_p2 = scmp.ne.s32.totalorder %s8015_s0, %s6248_s26  ;;  %p6252_p3 = scmp.lt.u32.totalorder %s6248_s26, %s8015_s0 }
  0x4c   :  { %p6254_p4 = pnand %p6252_p3, %p6249_p2 }
  0x4e   :  { %6257 = shalt.err (!%p6254_p4)
}
  0x4f   :  { %s6258_s5 = scalar_lea.vmem %s111_s3, 16  ;;  %s6262_s9 = scalar_lea.vmem %s111_s3, 32 }
  0x50   :  { %p6259_p5 = scmp.ne.s32.totalorder %s111_s3, %s6258_s5  ;;  %p6263_p6 = scmp.lt.s32.totalorder %s111_s3, %s111_s3 }
  0x51   :  { %p6264_p7 = scmp.lt.s32.totalorder %s6262_s9, %s6258_s5 }
  0x53   :  { %p6265_p8 = por %p6264_p7, %p6263_p6 }
  0x55   :  { %p6266_p9 = pnand %p6265_p8, %p6259_p5 }
  0x57   :  { %6269 = shalt.err (!%p6266_p9)
}
  0x58   :  { %113 = dma.hbm_to_vmem [thread:$0]  %s8015_s0, 16, %s111_s3, [#allocation13]  }
  0x59   :  { %s6270_s8 = scalar_lea.hbm %s7975_s13, 32 }
  0x5a   :  { %p6271_p10 = scmp.ne.s32.totalorder %s7975_s13, %s6270_s8  ;;  %p6274_p11 = scmp.lt.u32.totalorder %s6270_s8, %s7975_s13 }
  0x5c   :  { %p6276_p12 = pnand %p6274_p11, %p6271_p10 }
  0x5e   :  { %6279 = shalt.err (!%p6276_p12)
}
  0x5f   :  { %s6280_s6 = scalar_lea.vmem %s133_s4, 32  ;;  %p6285_p0 = scmp.lt.s32.totalorder %s133_s4, %s133_s4 }
  0x60   :  { %p6281_p13 = scmp.ne.s32.totalorder %s133_s4, %s6280_s6  ;;  %p6286_p1 = scmp.lt.s32.totalorder %s6280_s6, %s6280_s6 }
  0x62   :  { %p6287_p2 = por %p6286_p1, %p6285_p0 }
  0x64   :  { %p6288_p3 = pnand %p6287_p2, %p6281_p13 }
  0x66   :  { %6291 = shalt.err (!%p6288_p3)
}
  0x67   :  { %135 = dma.hbm_to_vmem [thread:$0]  %s7975_s13, 32, %s133_s4, [#allocation16]  }
  0x68   :  { %s6510_s11 = smov [#allocation18]   ;;  %s6511_s9 = smov [#allocation3]  }
  0x69   :  { %s152_s5 = sshll.u32 %s6510_s11, 4  ;;  %s53_s30 = sshll.u32 %s6511_s9, 4  ;;  %s153_s5 = int_to_ptr.vmem [resolvable:$true] %s152_s5  ;;  %s6722_s30 = int_to_ptr.vmem [resolvable:$true] %s53_s30 }
  0x6a   :  { %s6292_s7 = scalar_lea.hbm %s7977_s15, 16 }
  0x6b   :  { %p6293_p4 = scmp.ne.s32.totalorder %s7977_s15, %s6292_s7  ;;  %p6296_p5 = scmp.lt.u32.totalorder %s6292_s7, %s7977_s15 }
  0x6d   :  { %p6298_p6 = pnand %p6296_p5, %p6293_p4 }
  0x6f   :  { %6301 = shalt.err (!%p6298_p6)
}
  0x70   :  { %s6302_s13 = scalar_lea.vmem %s153_s5, 16  ;;  %s6306_s4 = scalar_lea.vmem %s153_s5, 32 }
  0x71   :  { %p6303_p7 = scmp.ne.s32.totalorder %s153_s5, %s6302_s13  ;;  %p6307_p8 = scmp.lt.s32.totalorder %s153_s5, %s153_s5 }
  0x72   :  { %p6308_p9 = scmp.lt.s32.totalorder %s6306_s4, %s6302_s13 }
  0x74   :  { %p6309_p10 = por %p6308_p9, %p6307_p8 }
  0x76   :  { %p6310_p11 = pnand %p6309_p10, %p6303_p7 }
  0x78   :  { %6313 = shalt.err (!%p6310_p11)
}
  0x79   :  { %155 = dma.hbm_to_vmem [thread:$0]  %s7977_s15, 16, %s153_s5, [#allocation19]  }
  0x7a   :  { %s8016_s11 = sld [smem:[#allocation35_spill]] }
  0x80   :  { %s6314_s9 = scalar_lea.hbm %s8016_s11, 256 }
  0x81   :  { %p6315_p12 = scmp.ne.s32.totalorder %s8016_s11, %s6314_s9  ;;  %p6318_p13 = scmp.lt.u32.totalorder %s6314_s9, %s8016_s11 }
  0x83   :  { %p6320_p0 = pnand %p6318_p13, %p6315_p12 }
  0x85   :  { %6323 = shalt.err (!%p6320_p0)
}
  0x86   :  { %s6324_s28 = scalar_lea.vmem %s6722_s30, 256  ;;  %p6329_p2 = scmp.lt.s32.totalorder %s6722_s30, %s6722_s30 }
  0x87   :  { %p6325_p1 = scmp.ne.s32.totalorder %s6722_s30, %s6324_s28  ;;  %p6330_p3 = scmp.lt.s32.totalorder %s6324_s28, %s6324_s28 }
  0x89   :  { %p6331_p4 = por %p6330_p3, %p6329_p2 }
  0x8b   :  { %p6332_p5 = pnand %p6331_p4, %p6325_p1 }
  0x8d   :  { %6335 = shalt.err (!%p6332_p5)
}
  0x8e   :  { %s6512_s15 = smov 128   ;;  %s6513_s5 = smov 8  }
  0x8f   :  { %59 = dma.hbm_to_vmem [thread:$0]  %s8016_s11, 256, %s6722_s30, [#allocation4], %s6512_s15, %s6512_s15, %s6513_s5  }
  0x90   :  { %s6514_s13 = smov [#allocation8]   ;;  %s6515_s1 = smov [#allocation11]  }
  0x91   :  { %s76_s4 = sshll.u32 %s6514_s13, 4  ;;  %s100_s6 = sshll.u32 %s6515_s1, 4  ;;  %s77_s4 = int_to_ptr.vmem [resolvable:$true] %s76_s4  ;;  %s101_s6 = int_to_ptr.vmem [resolvable:$true] %s100_s6 }
  0x92   :  { %s8017_s9 = sld [smem:[#allocation37_spill]] }
  0x98   :  { %s6336_s10 = scalar_lea.hbm %s8017_s9, 32 }
  0x99   :  { %p6337_p6 = scmp.ne.s32.totalorder %s8017_s9, %s6336_s10  ;;  %p6340_p7 = scmp.lt.u32.totalorder %s6336_s10, %s8017_s9 }
  0x9b   :  { %p6342_p8 = pnand %p6340_p7, %p6337_p6 }
  0x9d   :  { %6345 = shalt.err (!%p6342_p8)
}
  0x9e   :  { %s6346_s30 = scalar_lea.vmem %s77_s4, 32  ;;  %p6351_p10 = scmp.lt.s32.totalorder %s77_s4, %s77_s4 }
  0x9f   :  { %p6347_p9 = scmp.ne.s32.totalorder %s77_s4, %s6346_s30  ;;  %p6352_p11 = scmp.lt.s32.totalorder %s6346_s30, %s6346_s30 }
  0xa1   :  { %p6353_p12 = por %p6352_p11, %p6351_p10 }
  0xa3   :  { %p6354_p13 = pnand %p6353_p12, %p6347_p9 }
  0xa5   :  { %6357 = shalt.err (!%p6354_p13)
}
  0xa6   :  { %79 = dma.hbm_to_vmem [thread:$0]  %s8017_s9, 32, %s77_s4, [#allocation7]  }
  0xa7   :  { %s8018_s1 = sld [smem:[#allocation41_spill]] }
  0xad   :  { %s6358_s3 = scalar_lea.hbm %s8018_s1, 32 }
  0xae   :  { %p6359_p0 = scmp.ne.s32.totalorder %s8018_s1, %s6358_s3  ;;  %p6362_p1 = scmp.lt.u32.totalorder %s6358_s3, %s8018_s1 }
  0xb0   :  { %p6364_p2 = pnand %p6362_p1, %p6359_p0 }
  0xb2   :  { %6367 = shalt.err (!%p6364_p2)
}
  0xb3   :  { %s6368_s8 = scalar_lea.vmem %s101_s6, 32  ;;  %p6373_p4 = scmp.lt.s32.totalorder %s101_s6, %s101_s6 }
  0xb4   :  { %p6369_p3 = scmp.ne.s32.totalorder %s101_s6, %s6368_s8  ;;  %p6374_p5 = scmp.lt.s32.totalorder %s6368_s8, %s6368_s8 }
  0xb6   :  { %p6375_p6 = por %p6374_p5, %p6373_p4 }
  0xb8   :  { %p6376_p7 = pnand %p6375_p6, %p6369_p3 }
  0xba   :  { %6379 = shalt.err (!%p6376_p7)
}
  0xbb   :  { %103 = dma.hbm_to_vmem [thread:$0]  %s8018_s1, 32, %s101_s6, [#allocation10]  }
  0xbc   :  { %s6516_s28 = smov [#allocation14]   ;;  %s6517_s11 = smov [#allocation17]  }
  0xbd   :  { %s120_s30 = sshll.u32 %s6516_s28, 4  ;;  %s142_s26 = sshll.u32 %s6517_s11, 4  ;;  %s121_s30 = int_to_ptr.vmem [resolvable:$true] %s120_s30  ;;  %s143_s26 = int_to_ptr.vmem [resolvable:$true] %s142_s26 }
  0xbe   :  { %s8019_s3 = sld [smem:[#allocation43_spill]] }
  0xc4   :  { %s6380_s0 = scalar_lea.hbm %s8019_s3, 16 }
  0xc5   :  { %p6381_p8 = scmp.ne.s32.totalorder %s8019_s3, %s6380_s0  ;;  %p6384_p9 = scmp.lt.u32.totalorder %s6380_s0, %s8019_s3 }
  0xc7   :  { %p6386_p10 = pnand %p6384_p9, %p6381_p8 }
  0xc9   :  { %6389 = shalt.err (!%p6386_p10)
}
  0xca   :  { %s6390_s6 = scalar_lea.vmem %s121_s30, 16  ;;  %s6394_s1 = scalar_lea.vmem %s121_s30, 32 }
  0xcb   :  { %p6391_p11 = scmp.ne.s32.totalorder %s121_s30, %s6390_s6  ;;  %p6395_p12 = scmp.lt.s32.totalorder %s121_s30, %s121_s30 }
  0xcc   :  { %p6396_p13 = scmp.lt.s32.totalorder %s6394_s1, %s6390_s6 }
  0xce   :  { %p6397_p0 = por %p6396_p13, %p6395_p12 }
  0xd0   :  { %p6398_p1 = pnand %p6397_p0, %p6391_p11 }
  0xd2   :  { %6401 = shalt.err (!%p6398_p1)
}
  0xd3   :  { %123 = dma.hbm_to_vmem [thread:$0]  %s8019_s3, 16, %s121_s30, [#allocation13]  }
  0xd4   :  { %s6402_s29 = scalar_lea.hbm %s7976_s14, 16 }
  0xd5   :  { %p6403_p2 = scmp.ne.s32.totalorder %s7976_s14, %s6402_s29  ;;  %p6406_p3 = scmp.lt.u32.totalorder %s6402_s29, %s7976_s14 }
  0xd7   :  { %p6408_p4 = pnand %p6406_p3, %p6403_p2 }
  0xd9   :  { %6411 = shalt.err (!%p6408_p4)
}
  0xda   :  { %s6412_s7 = scalar_lea.vmem %s143_s26, 16  ;;  %s6416_s8 = scalar_lea.vmem %s143_s26, 32 }
  0xdb   :  { %p6413_p5 = scmp.ne.s32.totalorder %s143_s26, %s6412_s7  ;;  %p6417_p6 = scmp.lt.s32.totalorder %s143_s26, %s143_s26 }
  0xdc   :  { %p6418_p7 = scmp.lt.s32.totalorder %s6416_s8, %s6412_s7 }
  0xde   :  { %p6419_p8 = por %p6418_p7, %p6417_p6 }
  0xe0   :  { %p6420_p9 = pnand %p6419_p8, %p6413_p5 }
  0xe2   :  { %6423 = shalt.err (!%p6420_p9)
}
  0xe3   :  { %145 = dma.hbm_to_vmem [thread:$0]  %s7976_s14, 16, %s143_s26, [#allocation16]  }
  0xe4   :  { %s6518_s6 = smov [#allocation20]   ;;  %s6519_s4 = smov [#allocation21]  }
  0xe5   :  { %s162_s1 = sshll.u32 %s6518_s6, 4  ;;  %s172_s9 = sshll.u32 %s6519_s4, 4  ;;  %s163_s1 = int_to_ptr.vmem [resolvable:$true] %s162_s1  ;;  %s173_s9 = int_to_ptr.vmem [resolvable:$true] %s172_s9 }
  0xe6   :  { %s6424_s29 = scalar_lea.hbm %s7978_s16, 64 }
  0xe7   :  { %p6425_p10 = scmp.ne.s32.totalorder %s7978_s16, %s6424_s29  ;;  %p6428_p11 = scmp.lt.u32.totalorder %s6424_s29, %s7978_s16 }
  0xe9   :  { %p6430_p12 = pnand %p6428_p11, %p6425_p10 }
  0xeb   :  { %6433 = shalt.err (!%p6430_p12)
}
  0xec   :  { %s6434_s14 = scalar_lea.vmem %s163_s1, 64  ;;  %p6439_p0 = scmp.lt.s32.totalorder %s163_s1, %s163_s1 }
  0xed   :  { %p6435_p13 = scmp.ne.s32.totalorder %s163_s1, %s6434_s14  ;;  %p6440_p1 = scmp.lt.s32.totalorder %s6434_s14, %s6434_s14 }
  0xef   :  { %p6441_p2 = por %p6440_p1, %p6439_p0 }
  0xf1   :  { %p6442_p3 = pnand %p6441_p2, %p6435_p13 }
  0xf3   :  { %6445 = shalt.err (!%p6442_p3)
}
  0xf4   :  { %165 = dma.hbm_to_vmem [thread:$0]  %s7978_s16, 64, %s163_s1, [#allocation19]  }
  0xf5   :  { %s6446_s3 = scalar_lea.hbm %s7979_s17, 16 }
  0xf6   :  { %p6447_p4 = scmp.ne.s32.totalorder %s7979_s17, %s6446_s3  ;;  %p6450_p5 = scmp.lt.u32.totalorder %s6446_s3, %s7979_s17 }
  0xf8   :  { %p6452_p6 = pnand %p6450_p5, %p6447_p4 }
  0xfa   :  { %6455 = shalt.err (!%p6452_p6)
}
  0xfb   :  { %s6456_s29 = scalar_lea.vmem %s173_s9, 16  ;;  %s6460_s13 = scalar_lea.vmem %s173_s9, 32 }
  0xfc   :  { %p6457_p7 = scmp.ne.s32.totalorder %s173_s9, %s6456_s29  ;;  %p6461_p8 = scmp.lt.s32.totalorder %s173_s9, %s173_s9 }
  0xfd   :  { %p6462_p9 = scmp.lt.s32.totalorder %s6460_s13, %s6456_s29 }
  0xff   :  { %p6463_p10 = por %p6462_p9, %p6461_p8 }
 0x101   :  { %p6464_p11 = pnand %p6463_p10, %p6457_p7 }
 0x103   :  { %6467 = shalt.err (!%p6464_p11)
}
 0x104   :  { %175 = dma.hbm_to_vmem [thread:$0]  %s7979_s17, 16, %s173_s9, [#allocation22]  }
 0x105   :  { %6490 = dma.done.wait [#allocation4], 256  }
 0x106   :  { %6491 = vsyncadd [#allocation4], 4294967040 }
 0x107   :  { %6492 = dma.done.wait [#allocation7], 96  }
 0x108   :  { %6493 = vsyncadd [#allocation7], 4294967200 }
 0x109   :  { %6494 = dma.done.wait [#allocation10], 48  }
 0x10a   :  { %6495 = vsyncadd [#allocation10], 4294967248 }
 0x10b   :  { %6496 = dma.done.wait [#allocation13], 32  }
 0x10c   :  { %6497 = vsyncadd [#allocation13], 4294967264 }
 0x10d   :  { %6498 = dma.done.wait [#allocation16], 48  }
 0x10e   :  { %6499 = vsyncadd [#allocation16], 4294967248 }
 0x10f   :  { %6500 = dma.done.wait [#allocation19], 80  }
 0x110   :  { %6501 = vsyncadd [#allocation19], 4294967216 }
 0x111   :  { %6502 = dma.done.wait [#allocation22], 16  }
 0x112   :  { %6503 = vsyncadd [#allocation22], 4294967280  ;;  %v6520_v1 = vmov 0.0|0.0   ;;  %vm6521_vm0 = vmmov 0   ;;  %v6522_v2 = vmov 0.0   ;;  %vm270_vm1 = vcmask 1042432  }
 0x113   :  { %5561 = vmatprep.subr.bf16.mxu1 %v6520_v1  ;;  %5164 = vmatprep.mubr.msk.f32.mxu1 %vm6521_vm0, %v6522_v2  ;;  %vm245_vm2 = vcmask 23552   ;;  %v244_v4 = vld [vmem:[#allocation6] sm:$0x7]  ;;  %s8022_s0 = sld [smem:[#allocation32_spill]]  ;;  %v379_v17 = vld [vmem:[#allocation8] sm:$0x3]  ;;  %v483_v34 = vlaneseq }
 0x114   :  { %vm6833_vm3 = vmpackc.low %vm245_vm2, %vm245_vm2  ;;  %5134 = vmatprep.subr.msk.mxu0 %vm270_vm1, %v244_v4  ;;  %v6523_v18 = vmov 32   ;;  %v6524_v19 = vmov 33   ;;  %s8023_s17 = sld [smem:[#allocation33_spill]]  ;;  %vm523_vm9 = vcmask 523264   ;;  %s6525_s4 = smov 112  }
 0x115   :  { %5135 = vmatpush3.msk.msra.mxu0 %vm270_vm1, %v244_v4  ;;  %5899 = vset.pattern.permute.xlu0 %v6523_v18  ;;  %v484_v35 = vshrl.u32 %v483_v34, 7  ;;  %s6526_s28 = smov 94   ;;  %s8024_s13 = sld [smem:[#allocation40_spill]] }
 0x116   :  { %5898 = vset.pattern.permute.xlu1 %v6524_v19  ;;  %s8025_s2 = sld [smem:[#allocation39_spill]]  ;;  %s8028_s26 = sld [smem:[#allocation34_spill]] }
 0x117   :  { %v6932_v37 = vsub.s32 0, %v484_v35  ;;  %v6937_v41 = vsub.s32 1, %v484_v35 }
 0x119   :  { %v230_v5 = vld [vmem:[%s8022_s0] sm:$0xff]  ;;  %v231_v6 = vld [vmem:[%s8022_s0 + $0x8] sm:$0xff]  ;;  %v232_v7 = vld [vmem:[%s8022_s0 + $0x10] sm:$0xff] }
 0x11a   :  { %5136 = vmatprep.mubr.msk.f32.mxu0 %vm245_vm2, %v230_v5  ;;  %v5562_v8 = vpack.c.bf16 %v231_v6, %v230_v5  ;;  %v233_v9 = vld [vmem:[%s8022_s0 + $0x18] sm:$0xff]  ;;  %v234_v10 = vld [vmem:[%s8022_s0 + $0x20] sm:$0xff]  ;;  %v235_v12 = vld [vmem:[%s8022_s0 + $0x28] sm:$0xff] }
 0x11b   :  { %5137 = vmatmul.mubr.msk.f32.vlgmr.msra.gmra.mrb[0].mxu0 %vm245_vm2, %v231_v6  ;;  %v5566_v11 = vpack.c.bf16 %v233_v9, %v232_v7  ;;  %v236_v13 = vld [vmem:[%s8022_s0 + $0x30] sm:$0xff]  ;;  %v237_v14 = vld [vmem:[%s8022_s0 + $0x38] sm:$0xff]  ;;  %v5570_v15 = vpack.c.bf16 %v235_v12, %v234_v10  ;;  %v6944_v50 = vld [vmem:[%s8023_s17 + $0x8] sm:$0xff] }
 0x11c   :  { %5564 = vmatpush3.bf16.xpose.msk.msra.mxu1 %vm6833_vm3, %v5562_v8  ;;  %5139 = vmatprep.mubr.msk.f32.mxu0 %vm245_vm2, %v232_v7  ;;  %v5574_v16 = vpack.c.bf16 %v237_v14, %v236_v13  ;;  %v6949_v53 = vld [vmem:[%s8023_s17] sm:$0xff]  ;;  %vm512_vm5 = vcmp.gt.f32.partialorder %v6944_v50, 0.0  ;;  %v6956_v59 = vld [vmem:[%s8023_s17 + $0x10] sm:$0xff] }
 0x11d   :  { %5565 = vmatprep.subr.bf16.mxu1 %v6520_v1  ;;  %vm511_vm7 = vcmp.gt.f32.partialorder %v6949_v53, 0.0  ;;  %vm513_vm12 = vcmp.gt.f32.partialorder %v6956_v59, 0.0 }
 0x11f   :  { %5140 = vmatmul.mubr.msk.f32.gmra.mrb[2].mxu0 %vm245_vm2, %v233_v9 }
 0x120   :  { %5142 = vmatprep.mubr.msk.f32.mxu0 %vm245_vm2, %v234_v10 }
 0x123   :  { %5143 = vmatmul.mubr.msk.f32.gmra.mrb[4].mxu0 %vm245_vm2, %v235_v12 }
 0x124   :  { %5568 = vmatpush3.bf16.xpose.msk.msra.mxu1 %vm6833_vm3, %v5566_v11  ;;  %5145 = vmatprep.mubr.msk.f32.mxu0 %vm245_vm2, %v236_v13 }
 0x125   :  { %5569 = vmatprep.subr.bf16.mxu1 %v6520_v1 }
 0x127   :  { %5146 = vmatmul.mubr.msk.f32.gmra.mrb[6].mxu0 %vm245_vm2, %v237_v14 }
 0x12c   :  { %5572 = vmatpush3.bf16.xpose.msk.msra.mxu1 %vm6833_vm3, %v5570_v15 }
 0x12d   :  { %5573 = vmatprep.subr.bf16.mxu1 %v6520_v1 }
 0x134   :  { %5576 = vmatpush3.bf16.xpose.msk.msra.mxu1 %vm6833_vm3, %v5574_v16 }
 0x13b   :  { %5165 = vmatmul.mubr.msk.f32.vlgmr.msra.gmra.mrb[0].mxu1 %vm245_vm2, %v379_v17 }
 0x1ee   :  { %v6885_v20 = vpop.f32.mrb[0].mxu0 }
 0x1ef   :  { %v6887_v21 = vpop.f32.mrb[1].mxu0 }
 0x1f0   :  { %455 = vperm.xlu0 %5899, %v6887_v21   ;;  %v5903_v22 = vpack.i.bf16 %v6885_v20, %v6887_v21  ;;  %v6894_v23 = vpack.c.bf16 %v6885_v20, %v6887_v21 }
 0x1f2   :  { %v6896_v24 = vpop.f32.mrb[2].mxu0 }
 0x1f3   :  { %v6898_v25 = vpop.f32.mrb[3].mxu0 }
 0x1f4   :  { %470 = vperm.xlu0 %5899, %v6896_v24   ;;  %611 = vperm.xlu1 %5898, %v6898_v25   ;;  %v5908_v26 = vpack.i.bf16 %v6896_v24, %v6898_v25  ;;  %v6906_v27 = vpack.c.bf16 %v6896_v24, %v6898_v25 }
 0x1f6   :  { %v6908_v28 = vpop.f32.mrb[4].mxu0 }
 0x1f7   :  { %v6910_v29 = vpop.f32.mrb[5].mxu0 }
 0x1f8   :  { %5901 = vset.pattern.permute.xlu0 %v6524_v19  ;;  %615 = vperm.xlu1 %5898, %v6896_v24   ;;  %v5913_v30 = vpack.i.bf16 %v6908_v28, %v6910_v29  ;;  %v6918_v31 = vpack.c.bf16 %v6908_v28, %v6910_v29 }
 0x1f9   :  { %603 = vperm.xlu0 %5901, %v6887_v21  }
 0x1fc   :  { %623 = vperm.xlu1 %5898, %v6908_v28  }
 0x1fd   :  { %607 = vperm.xlu0 %5901, %v6885_v20  }
 0x200   :  { %5900 = vset.pattern.permute.xlu1 %v6523_v18 }
 0x201   :  { %460 = vperm.xlu1 %5900, %v6885_v20   ;;  %619 = vperm.xlu0 %5901, %v6910_v29  }
 0x205   :  { %465 = vperm.xlu1 %5900, %v6898_v25   ;;  %5902 = vset.pattern.permute.xlu0 %v6523_v18 }
 0x206   :  { %480 = vperm.xlu0 %5902, %v6908_v28  }
 0x209   :  { %475 = vperm.xlu1 %5900, %v6910_v29  }
 0x20a   :  { %5923 = vset.pattern.permute.xlu0 %v6524_v19 }
 0x20d   :  { %5924 = vset.pattern.permute.xlu1 %v6524_v19 }
 0x20e   :  { %v449_v32 = vpop.f32.mrb[0].mxu1 }
 0x20f   :  { %v5166_v33 = vpop.f32.mrb[1].mxu1  ;;  %v6935_v40 = vrot.slane %v449_v32, %v6932_v37  ;;  %v629_v43 = vrot.slane %v449_v32, %v6937_v41  ;;  %v6983_v32 = vld [vmem:[%s8023_s17 + $0x18] sm:$0xff] }
 0x26f   :  { %v456_v36 = vpop.permute.xlu0 %455 }
 0x270   :  { %v487_v44 = vadd.f32 %v6935_v40, %v456_v36 }
 0x272   :  { %v499_v47 = vmul.f32 0.2, %v487_v44  ;;  %vm493_vm4 = vcmp.gt.f32.partialorder %v487_v44, 0.0 }
 0x273   :  { %v471_v38 = vpop.permute.xlu0 %470  ;;  %v612_v39 = vpop.permute.xlu1 %611 }
 0x274   :  { %v632_v48 = vadd.f32 %v629_v43, %v612_v39  ;;  %v505_v58 = vsel %vm493_vm4, %v487_v44, %v499_v47  ;;  %v490_v5 = vadd.f32 %v6935_v40, %v471_v38  ;;  %v6996_v44 = vld [vmem:[%s8023_s17 + $0x20] sm:$0xff]  ;;  %vm514_vm4 = vcmp.gt.f32.partialorder %v6983_v32, 0.0 }
 0x275   :  { %v6969_v8 = vsel %vm511_vm7, %v505_v58, -1e+30 }
 0x276   :  { %v644_v55 = vmul.f32 0.2, %v632_v48  ;;  %vm638_vm8 = vcmp.gt.f32.partialorder %v632_v48, 0.0  ;;  %v524_v17 = vsel %vm523_vm9, %v6969_v8, -inf  ;;  %v502_v33 = vmul.f32 0.2, %v490_v5 }
 0x277   :  { %v616_v42 = vpop.permute.xlu1 %615  ;;  %vm496_vm15 = vcmp.gt.f32.partialorder %v490_v5, 0.0 }
 0x278   :  { %v604_v45 = vpop.permute.xlu0 %603  ;;  %v633_v56 = vadd.f32 %v629_v43, %v616_v42  ;;  %v650_v9 = vsel %vm638_vm8, %v632_v48, %v644_v55 }
 0x279   :  { %v630_v51 = vadd.f32 %v629_v43, %v604_v45  ;;  %v6991_v35 = vsel %vm513_vm12, %v650_v9, -1e+30 }
 0x27a   :  { %v645_v6 = vmul.f32 0.2, %v633_v56  ;;  %vm639_vm13 = vcmp.gt.f32.partialorder %v633_v56, 0.0  ;;  %v666_v47 = vsel %vm523_vm9, %v6991_v35, -inf }
 0x27b   :  { %v624_v46 = vpop.permute.xlu1 %623  ;;  %v642_v60 = vmul.f32 0.2, %v630_v51  ;;  %vm636_vm10 = vcmp.gt.f32.partialorder %v630_v51, 0.0 }
 0x27c   :  { %v608_v49 = vpop.permute.xlu0 %607  ;;  %v635_v36 = vadd.f32 %v629_v43, %v624_v46  ;;  %v651_v39 = vsel %vm639_vm13, %v633_v56, %v645_v6  ;;  %v7045_v6 = vpop.f32.mrb[6].mxu0 }
 0x27d   :  { %v631_v52 = vadd.f32 %v629_v43, %v608_v49  ;;  %v648_v13 = vsel %vm636_vm10, %v630_v51, %v642_v60  ;;  %v508_v49 = vsel %vm496_vm15, %v490_v5, %v502_v33 }
 0x27e   :  { %v6987_v34 = vsel %vm511_vm7, %v648_v13, -1e+30  ;;  %v647_v48 = vmul.f32 0.2, %v635_v36  ;;  %v7019_v56 = vsel %vm514_vm4, %v508_v49, -1e+30 }
 0x27f   :  { %v643_v54 = vmul.f32 0.2, %v631_v52  ;;  %vm637_vm6 = vcmp.gt.f32.partialorder %v631_v52, 0.0  ;;  %v660_v45 = vsel %vm523_vm9, %v6987_v34, -inf  ;;  %v533_v60 = vsel %vm523_vm9, %v7019_v56, -inf }
 0x280   :  { %v461_v57 = vpop.permute.xlu1 %460  ;;  %v620_v63 = vpop.permute.xlu0 %619 }
 0x281   :  { %v488_v61 = vadd.f32 %v6935_v40, %v461_v57  ;;  %v649_v62 = vsel %vm637_vm6, %v631_v52, %v643_v54  ;;  %v634_v10 = vadd.f32 %v629_v43, %v620_v63  ;;  %v7003_v43 = vsel %vm514_vm4, %v651_v39, -1e+30  ;;  %v7013_v52 = vld [vmem:[%s8023_s17 + $0x28] sm:$0xff] }
 0x282   :  { %v6961_v0 = vsel %vm512_vm5, %v649_v62, -1e+30  ;;  %vm641_vm6 = vcmp.gt.f32.partialorder %v635_v36, 0.0  ;;  %v669_v54 = vsel %vm523_vm9, %v7003_v43, -inf  ;;  %vm516_vm7 = vcmp.gt.f32.partialorder %v7013_v52, 0.0 }
 0x283   :  { %v500_v3 = vmul.f32 0.2, %v488_v61  ;;  %v663_v4 = vsel %vm523_vm9, %v6961_v0, -inf  ;;  %vm494_vm11 = vcmp.gt.f32.partialorder %v488_v61, 0.0  ;;  %v646_v38 = vmul.f32 0.2, %v634_v10 }
 0x284   :  { %v466_v7 = vpop.permute.xlu1 %465  ;;  %664 = vmax.xlane.f32.xlu0 %v663_v4  ;;  %vm640_vm3 = vcmp.gt.f32.partialorder %v634_v10, 0.0  ;;  %v653_v58 = vsel %vm641_vm6, %v635_v36, %v647_v48 }
 0x285   :  { %v489_v11 = vadd.f32 %v6935_v40, %v466_v7  ;;  %v506_v12 = vsel %vm494_vm11, %v488_v61, %v500_v3  ;;  %v652_v51 = vsel %vm640_vm3, %v634_v10, %v646_v38  ;;  %v7032_v62 = vsel %vm516_vm7, %v653_v58, -1e+30  ;;  %v481_v5 = vpop.permute.xlu0 %480  ;;  %v7047_v7 = vpop.f32.mrb[7].mxu0 }
 0x286   :  { %v6974_v14 = vsel %vm512_vm5, %v506_v12, -1e+30  ;;  %vm515_vm5 = vcmp.gt.f32.partialorder %v6996_v44, 0.0  ;;  %v675_v63 = vsel %vm523_vm9, %v7032_v62, -inf  ;;  %v492_v9 = vadd.f32 %v6935_v40, %v481_v5 }
 0x287   :  { %v501_v15 = vmul.f32 0.2, %v489_v11  ;;  %v527_v16 = vsel %vm523_vm9, %v6974_v14, -inf  ;;  %vm495_vm14 = vcmp.gt.f32.partialorder %v489_v11, 0.0  ;;  %v7023_v57 = vsel %vm515_vm5, %v652_v51, -1e+30 }
 0x288   :  { %528 = vmax.xlane.f32.xlu1 %v527_v16  ;;  %525 = vmax.xlane.f32.xlu0 %v524_v17  ;;  %v672_v61 = vsel %vm523_vm9, %v7023_v57, -inf  ;;  %v476_v3 = vpop.permute.xlu1 %475  ;;  %vm498_vm10 = vcmp.gt.f32.partialorder %v492_v9, 0.0 }
 0x289   :  { %v507_v42 = vsel %vm495_vm14, %v489_v11, %v501_v15  ;;  %v491_v4 = vadd.f32 %v6935_v40, %v476_v3  ;;  %v5918_v11 = vpack.i.bf16 %v7045_v6, %v7047_v7 }
 0x28a   :  { %v7007_v46 = vsel %vm513_vm12, %v507_v42, -1e+30 }
 0x28b   :  { %v530_v55 = vsel %vm523_vm9, %v7007_v46, -inf  ;;  %v503_v10 = vmul.f32 0.2, %v491_v4  ;;  %vm497_vm8 = vcmp.gt.f32.partialorder %v491_v4, 0.0 }
 0x28c   :  { %661 = vmax.xlane.f32.xlu1 %v660_v45  ;;  %667 = vmax.xlane.f32.xlu0 %v666_v47 }
 0x28d   :  { %v509_v12 = vsel %vm497_vm8, %v491_v4, %v503_v10 }
 0x28e   :  { %v7058_v13 = vsel %vm515_vm5, %v509_v12, -1e+30 }
 0x28f   :  { %v536_v40 = vsel %vm523_vm9, %v7058_v13, -inf }
 0x290   :  { %670 = vmax.xlane.f32.xlu1 %v669_v54  ;;  %531 = vmax.xlane.f32.xlu0 %v530_v55 }
 0x294   :  { %534 = vmax.xlane.f32.xlu1 %v533_v60  ;;  %673 = vmax.xlane.f32.xlu0 %v672_v61 }
 0x298   :  { %676 = vmax.xlane.f32.xlu1 %v675_v63 }
 0x2a9   :  { %5904 = vrot.lane.b32.xlu1 %v5903_v22, %s6525_s4  ;;  %v7054_v22 = vpack.c.bf16 %v7045_v6, %v7047_v7 }
 0x2aa   :  { %5909 = vrot.lane.b32.xlu0 %v5908_v26, %s6525_s4  ;;  %v504_v26 = vmul.f32 0.2, %v492_v9 }
 0x2ac   :  { %v510_v15 = vsel %vm498_vm10, %v492_v9, %v504_v26 }
 0x2ad   :  { %v7064_v16 = vsel %vm516_vm7, %v510_v15, -1e+30  ;;  %vm1306_vm7 = vcmask 392192  }
 0x2ae   :  { %v539_v17 = vsel %vm523_vm9, %v7064_v16, -inf }
 0x2c9   :  { %537 = vmax.xlane.f32.xlu0 %v536_v40 }
 0x2cd   :  { %540 = vmax.xlane.f32.xlu1 %v539_v17 }
 0x311   :  { %v665_v33 = vpop.xlane.xlu0 %664 }
 0x312   :  { %v679_v36 = vsub.f32 %v6961_v0, %v665_v33 }
 0x314   :  { %v686_v38 = vmul.f32 1.442695, %v679_v36 }
 0x315   :  { %v529_v39 = vpop.xlane.xlu1 %528  ;;  %v526_v42 = vpop.xlane.xlu0 %525 }
 0x316   :  { %5958 = vpow2.f32 %v686_v38  ;;  %v543_v45 = vsub.f32 %v6974_v14, %v529_v39  ;;  %v542_v47 = vsub.f32 %v6969_v8, %v526_v42 }
 0x318   :  { %v550_v48 = vmul.f32 1.442695, %v543_v45  ;;  %v548_v49 = vmul.f32 1.442695, %v542_v47 }
 0x319   :  { %v662_v51 = vpop.xlane.xlu1 %661  ;;  %v668_v54 = vpop.xlane.xlu0 %667 }
 0x31a   :  { %5960 = vpow2.f32 %v550_v48  ;;  %v678_v55 = vsub.f32 %v6987_v34, %v662_v51  ;;  %v680_v58 = vsub.f32 %v6991_v35, %v668_v54 }
 0x31b   :  { %5962 = vpow2.f32 %v548_v49 }
 0x31c   :  { %v684_v60 = vmul.f32 1.442695, %v678_v55  ;;  %v688_v0 = vmul.f32 1.442695, %v680_v58 }
 0x31d   :  { %v671_v61 = vpop.xlane.xlu1 %670  ;;  %v7073_v63 = vpop.xlane.xlu0 %531 }
 0x31e   :  { %5964 = vpow2.f32 %v684_v60  ;;  %v681_v14 = vsub.f32 %v7003_v43, %v671_v61  ;;  %v544_v6 = vsub.f32 %v7007_v46, %v7073_v63 }
 0x31f   :  { %5966 = vpow2.f32 %v688_v0 }
 0x320   :  { %v5959_v3 = vpop.eup %5958  ;;  %v690_v8 = vmul.f32 1.442695, %v681_v14 }
 0x321   :  { %v535_v4 = vpop.xlane.xlu1 %534  ;;  %v674_v5 = vpop.xlane.xlu0 %673  ;;  %v7077_v9 = vmul.f32 %v5959_v3, %v6944_v50 }
 0x322   :  { %5968 = vpow2.f32 %v690_v8  ;;  %v545_v34 = vsub.f32 %v7019_v56, %v535_v4  ;;  %v682_v35 = vsub.f32 %v7023_v57, %v674_v5 }
 0x323   :  { %v705_v10 = vsel %vm523_vm9, %v7077_v9, 0.0 }
 0x324   :  { %v5961_v26 = vpop.eup %5960  ;;  %v554_v12 = vmul.f32 1.442695, %v545_v34  ;;  %706 = vadd.xlane.f32.xlu1 %v705_v10  ;;  %v692_v43 = vmul.f32 1.442695, %v682_v35 }
 0x325   :  { %v677_v15 = vpop.xlane.xlu1 %676  ;;  %v7084_v40 = vmul.f32 %v5961_v26, %v6944_v50  ;;  %v5963_v33 = vpop.eup %5962 }
 0x326   :  { %5970 = vpow2.f32 %v554_v12  ;;  %v683_v17 = vsub.f32 %v7032_v62, %v677_v15  ;;  %v5910_v38 = vpop.permute.xlu0 %5909  ;;  %v7095_v51 = vmul.f32 %v5963_v33, %v6949_v53 }
 0x327   :  { %v569_v56 = vsel %vm523_vm9, %v7084_v40, 0.0  ;;  %5972 = vpow2.f32 %v692_v43  ;;  %v5912_v48 = vunpack.i.h.bf16 %v5910_v38  ;;  %v5911_v49 = vunpack.i.l.bf16 %v5910_v38 }
 0x328   :  { %v5965_v36 = vpop.eup %5964  ;;  %v694_v57 = vmul.f32 1.442695, %v683_v17  ;;  %570 = vadd.xlane.f32.xlu1 %v569_v56  ;;  %v566_v0 = vsel %vm523_vm9, %v7095_v51, 0.0 }
 0x329   :  { %v5905_v39 = vpop.permute.xlu1 %5904  ;;  %v7090_v42 = vmul.f32 %v5965_v36, %v6949_v53  ;;  %v5967_v47 = vpop.eup %5966  ;;  %v5581_v61 = vpack.c.bf16 %v5912_v48, %v5911_v49 }
 0x32a   :  { %5974 = vpow2.f32 %v694_v57  ;;  %v5907_v45 = vunpack.i.h.bf16 %v5905_v39  ;;  %v5906_v50 = vunpack.i.l.bf16 %v5905_v39  ;;  %v7105_v14 = vmul.f32 %v5967_v47, %v6956_v59 }
 0x32b   :  { %v702_v62 = vsel %vm523_vm9, %v7090_v42, 0.0 }
 0x32c   :  { %v5969_v54 = vpop.eup %5968  ;;  %703 = vadd.xlane.f32.xlu0 %v702_v62  ;;  %v5577_v55 = vpack.c.bf16 %v5907_v45, %v5906_v50  ;;  %v708_v5 = vsel %vm523_vm9, %v7105_v14, 0.0 }
 0x32d   :  { %v7098_v58 = vmul.f32 %v5969_v54, %v6983_v32 }
 0x32e   :  { %5578 = vmatprep.subr.bf16.mxu0 %v5577_v55 }
 0x32f   :  { %5580 = vmatpush3.bf16.msra.mxu0 %v5577_v55  ;;  %v711_v60 = vsel %vm523_vm9, %v7098_v58, 0.0 }
 0x330   :  { %v5971_v53 = vpop.eup %5970  ;;  %712 = vadd.xlane.f32.xlu1 %v711_v60  ;;  %567 = vadd.xlane.f32.xlu0 %v566_v0 }
 0x331   :  { %5582 = vmatprep.subr.bf16.mxu0 %v5581_v61  ;;  %v7108_v3 = vmul.f32 %v5971_v53, %v6983_v32  ;;  %v5973_v8 = vpop.eup %5972 }
 0x332   :  { %v7120_v32 = vmul.f32 %v5973_v8, %v6996_v44 }
 0x333   :  { %5584 = vmatpush3.bf16.msra.mxu0 %v5581_v61  ;;  %v575_v4 = vsel %vm523_vm9, %v7108_v3, 0.0 }
 0x334   :  { %v5975_v34 = vpop.eup %5974  ;;  %576 = vadd.xlane.f32.xlu1 %v575_v4  ;;  %709 = vadd.xlane.f32.xlu0 %v708_v5  ;;  %v714_v26 = vsel %vm523_vm9, %v7120_v32, 0.0 }
 0x335   :  { %v7115_v35 = vmul.f32 %v5975_v34, %v7013_v52 }
 0x337   :  { %v717_v10 = vsel %vm523_vm9, %v7115_v35, 0.0 }
 0x338   :  { %718 = vadd.xlane.f32.xlu0 %v717_v10 }
 0x33c   :  { %715 = vadd.xlane.f32.xlu0 %v714_v26 }
 0x345   :  { %5919 = vrot.lane.b32.xlu1 %v5918_v11, %s6525_s4 }
 0x349   :  { %996 = vrot.lane.b32.xlu1 %v6887_v21, %s6526_s28  ;;  %v552_v21 = vmul.f32 1.442695, %v544_v6 }
 0x34b   :  { %5976 = vpow2.f32 %v552_v21 }
 0x34d   :  { %1000 = vrot.lane.b32.xlu1 %v6898_v25, %s6526_s28 }
 0x351   :  { %1002 = vrot.lane.b32.xlu1 %v6896_v24, %s6526_s28 }
 0x352   :  { %5914 = vrot.lane.b32.xlu0 %v5913_v30, %s6525_s4 }
 0x355   :  { %1004 = vrot.lane.b32.xlu1 %v6910_v29, %s6526_s28  ;;  %v5977_v43 = vpop.eup %5976 }
 0x356   :  { %v538_v7 = vpop.xlane.xlu0 %537  ;;  %v7147_v29 = vmul.f32 %v5977_v43, %v6956_v59 }
 0x357   :  { %v546_v25 = vsub.f32 %v7058_v13, %v538_v7 }
 0x358   :  { %v572_v63 = vsel %vm523_vm9, %v7147_v29, 0.0 }
 0x359   :  { %1006 = vrot.lane.b32.xlu1 %v6908_v28, %s6526_s28  ;;  %v556_v24 = vmul.f32 1.442695, %v546_v25 }
 0x35a   :  { %v541_v11 = vpop.xlane.xlu1 %540 }
 0x35b   :  { %v547_v12 = vsub.f32 %v7064_v16, %v541_v11  ;;  %5978 = vpow2.f32 %v556_v24 }
 0x35d   :  { %v558_v30 = vmul.f32 1.442695, %v547_v12 }
 0x35f   :  { %5980 = vpow2.f32 %v558_v30 }
 0x365   :  { %v5979_v46 = vpop.eup %5978 }
 0x366   :  { %v7152_v28 = vmul.f32 %v5979_v46, %v6996_v44 }
 0x368   :  { %v578_v15 = vsel %vm523_vm9, %v7152_v28, 0.0 }
 0x369   :  { %v5981_v13 = vpop.eup %5980 }
 0x36a   :  { %v7157_v16 = vmul.f32 %v5981_v13, %v7013_v52 }
 0x36c   :  { %v581_v59 = vsel %vm523_vm9, %v7157_v16, 0.0 }
 0x371   :  { %573 = vadd.xlane.f32.xlu0 %v572_v63 }
 0x375   :  { %579 = vadd.xlane.f32.xlu0 %v578_v15 }
 0x379   :  { %582 = vadd.xlane.f32.xlu0 %v581_v59 }
 0x38f   :  { %998 = vrot.lane.b32.xlu0 %v6885_v20, %s6526_s28 }
 0x3b1   :  { %v707_v17 = vpop.xlane.xlu1 %706 }
 0x3b2   :  { %v721_v50 = vmax.f32 %v707_v17, 1e-30 }
 0x3b5   :  { %v571_v56 = vpop.xlane.xlu1 %570 }
 0x3b6   :  { %v585_v26 = vmax.f32 %v571_v56, 1e-30 }
 0x3b9   :  { %v704_v33 = vpop.xlane.xlu0 %703 }
 0x3ba   :  { %v720_v44 = vmax.f32 %v704_v33, 1e-30 }
 0x3bc   :  { %5982 = vrcp.f32 %v720_v44 }
 0x3bd   :  { %v568_v36 = vpop.xlane.xlu0 %567  ;;  %v713_v57 = vpop.xlane.xlu1 %712  ;;  %5984 = vrcp.f32 %v721_v50 }
 0x3be   :  { %v723_v20 = vmax.f32 %v713_v57, 1e-30  ;;  %v584_v4 = vmax.f32 %v568_v36, 1e-30  ;;  %v4792_v57 = vld [vmem:[#allocation9] ss:$0 sm:$0xff] }
 0x3c1   :  { %v710_v38 = vpop.xlane.xlu0 %709  ;;  %v7163_v39 = vpop.xlane.xlu1 %576 }
 0x3c2   :  { %v722_v48 = vmax.f32 %v710_v38, 1e-30 }
 0x3c4   :  { %5986 = vrcp.f32 %v722_v48 }
 0x3c5   :  { %v719_v52 = vpop.xlane.xlu0 %718  ;;  %v5920_v62 = vpop.permute.xlu1 %5919  ;;  %5988 = vrcp.f32 %v723_v20 }
 0x3c6   :  { %v5983_v45 = vpop.eup %5982  ;;  %v5922_v54 = vunpack.i.h.bf16 %v5920_v62  ;;  %v5921_v55 = vunpack.i.l.bf16 %v5920_v62  ;;  %v725_v8 = vmax.f32 %v719_v52, 1e-30 }
 0x3c7   :  { %v732_v47 = vmul.f32 %v5983_v45, %v7090_v42  ;;  %v5985_v34 = vpop.eup %5984  ;;  %v4793_v45 = vld [vmem:[%s8025_s2] ss:$0 sm:$0xff] }
 0x3c8   :  { %v5589_v42 = vpack.c.bf16 %v5922_v54, %v5921_v55  ;;  %v733_v6 = vmul.f32 %v5985_v34, %v7077_v9 }
 0x3c9   :  { %5183 = vmatprep.mubr.msk.f32.mxu0 %vm523_vm9, %v732_v47  ;;  %v716_v49 = vpop.xlane.xlu0 %715 }
 0x3ca   :  { %v724_v60 = vmax.f32 %v716_v49, 1e-30 }
 0x3cc   :  { %5990 = vrcp.f32 %v724_v60 }
 0x3cd   :  { %v5915_v0 = vpop.permute.xlu0 %5914  ;;  %5992 = vrcp.f32 %v725_v8 }
 0x3ce   :  { %v5917_v61 = vunpack.i.h.bf16 %v5915_v0  ;;  %v5916_v53 = vunpack.i.l.bf16 %v5915_v0  ;;  %5994 = vrcp.f32 %v584_v4  ;;  %v5987_v10 = vpop.eup %5986 }
 0x3cf   :  { %v5989_v7 = vpop.eup %5988  ;;  %v734_v21 = vmul.f32 %v5987_v10, %v7105_v14  ;;  %5996 = vrcp.f32 %v585_v26 }
 0x3d0   :  { %v5585_v5 = vpack.c.bf16 %v5917_v61, %v5916_v53  ;;  %v735_v11 = vmul.f32 %v5989_v7, %v7098_v58 }
 0x3d2   :  { %5586 = vmatprep.subr.bf16.mxu0 %v5585_v5 }
 0x3d3   :  { %5588 = vmatpush3.bf16.msra.mxu0 %v5585_v5 }
 0x3d4   :  { %5590 = vmatprep.subr.bf16.mxu0 %v5589_v42 }
 0x3d6   :  { %v5991_v25 = vpop.eup %5990 }
 0x3d7   :  { %5592 = vmatpush3.bf16.msra.mxu0 %v5589_v42  ;;  %v5993_v24 = vpop.eup %5992  ;;  %v736_v9 = vmul.f32 %v5991_v25, %v7120_v32 }
 0x3d8   :  { %5594 = vmatprep.subr.bf16.mxu0 %v6894_v23  ;;  %v5995_v12 = vpop.eup %5994  ;;  %v737_v14 = vmul.f32 %v5993_v24, %v7115_v35 }
 0x3d9   :  { %v5997_v58 = vpop.eup %5996 }
 0x3da   :  { %5184 = vmatmul.mubr.msk.f32.vlgmr.msra.gmra.mrb[8].mxu0 %vm523_vm9, %v733_v6  ;;  %v597_v32 = vmul.f32 %v5997_v58, %v7084_v40 }
 0x3db   :  { %5186 = vmatprep.mubr.msk.f32.mxu0 %vm523_vm9, %v734_v21  ;;  %5596 = vmatpush3.bf16.msra.mxu0 %v6894_v23  ;;  %v596_v23 = vmul.f32 %v5995_v12, %v7095_v51 }
 0x3dc   :  { %5598 = vmatprep.subr.bf16.mxu0 %v6906_v27 }
 0x3de   :  { %5187 = vmatmul.mubr.msk.f32.gmra.mrb[10].mxu0 %vm523_vm9, %v735_v11 }
 0x3df   :  { %5189 = vmatprep.mubr.msk.f32.mxu0 %vm523_vm9, %v736_v9  ;;  %5600 = vmatpush3.bf16.msra.mxu0 %v6906_v27  ;;  %v587_v27 = vmax.f32 %v7163_v39, 1e-30  ;;  %v997_v39 = vpop.permute.xlu1 %996 }
 0x3e0   :  { %5602 = vmatprep.subr.bf16.mxu0 %v6918_v31 }
 0x3e1   :  { %5998 = vrcp.f32 %v587_v27 }
 0x3e2   :  { %5190 = vmatmul.mubr.msk.f32.gmra.mrb[12].mxu0 %vm523_vm9, %v737_v14 }
 0x3e3   :  { %5604 = vmatpush3.bf16.msra.mxu0 %v6918_v31  ;;  %5208 = vmatprep.mubr.msk.f32.mxu0 %vm523_vm9, %v596_v23  ;;  %v1001_v53 = vpop.permute.xlu1 %1000 }
 0x3e4   :  { %5606 = vmatprep.subr.bf16.mxu0 %v7054_v22 }
 0x3e7   :  { %5608 = vmatpush3.bf16.msra.mxu0 %v7054_v22  ;;  %v1003_v8 = vpop.permute.xlu1 %1002 }
 0x3e8   :  { %5613 = vmatprep.subr.bf16.mxu0 %v6520_v1 }
 0x3ea   :  { %5209 = vmatmul.mubr.msk.f32.vlgmr.msra.gmra.mrb[8].mxu0 %vm523_vm9, %v597_v32 }
 0x3eb   :  { %v5999_v63 = vpop.eup %5998  ;;  %v1005_v10 = vpop.permute.xlu1 %1004 }
 0x3ec   :  { %v599_v13 = vmul.f32 %v5999_v63, %v7108_v3  ;;  %v1068_v3 = vld [vmem:[%s8024_s13] sm:$0xff] }
 0x3ef   :  { %v1007_v14 = vpop.permute.xlu1 %1006 }
 0x3fe   :  { %v574_v51 = vpop.xlane.xlu0 %573 }
 0x3ff   :  { %v586_v35 = vmax.f32 %v574_v51, 1e-30 }
 0x401   :  { %6000 = vrcp.f32 %v586_v35 }
 0x402   :  { %v580_v31 = vpop.xlane.xlu0 %579 }
 0x403   :  { %v588_v30 = vmax.f32 %v580_v31, 1e-30 }
 0x405   :  { %6002 = vrcp.f32 %v588_v30 }
 0x406   :  { %v583_v43 = vpop.xlane.xlu0 %582 }
 0x407   :  { %v589_v46 = vmax.f32 %v583_v43, 1e-30 }
 0x409   :  { %6004 = vrcp.f32 %v589_v46 }
 0x40b   :  { %v6001_v22 = vpop.eup %6000 }
 0x40c   :  { %v598_v40 = vmul.f32 %v6001_v22, %v7147_v29  ;;  %v1069_v29 = vld [vmem:[%s8024_s13 + $0x8] sm:$0xff]  ;;  %s6527_s13 = smov 64  }
 0x40d   :  { %v5609_v44 = vpack.c.bf16 %v1069_v29, %v1068_v3 }
 0x40e   :  { %5211 = vmatprep.mubr.msk.f32.mxu0 %vm523_vm9, %v598_v40 }
 0x40f   :  { %v6003_v15 = vpop.eup %6002  ;;  %5212 = vmatmul.mubr.msk.f32.gmra.mrb[10].mxu0 %vm523_vm9, %v599_v13  ;;  %5610 = vmatprep.subr.bf16.mxu1 %v5609_v44 }
 0x410   :  { %v600_v59 = vmul.f32 %v6003_v15, %v7152_v28  ;;  %5612 = vmatpush3.bf16.msra.mxu1 %v5609_v44 }
 0x412   :  { %5214 = vmatprep.mubr.msk.f32.mxu0 %vm523_vm9, %v600_v59 }
 0x413   :  { %v6005_v17 = vpop.eup %6004 }
 0x414   :  { %v601_v33 = vmul.f32 %v6005_v17, %v7157_v16  ;;  %v999_v16 = vpop.permute.xlu0 %998 }
 0x416   :  { %5215 = vmatmul.mubr.msk.f32.gmra.mrb[12].mxu0 %vm523_vm9, %v601_v33  ;;  %vm1070_vm9 = vcmask 130048   ;;  %v1184_v33 = vld [vmem:[#allocation11] sm:$0x3] }
 0x417   :  { %5242 = vmatprep.mubr.msk.f32.mxu0 %vm6521_vm0, %v6522_v2  ;;  %vm7216_vm13 = vmpackc.low %vm1070_vm9, %vm1070_vm9 }
 0x4bd   :  { %v5210_v28 = vpop.f32.mrb[8].mxu0 }
 0x4be   :  { %v991_v56 = vmul.f32 0.5, %v5210_v28  ;;  %v961_v36 = vpop.f32.mrb[9].mxu0 }
 0x4bf   :  { %v990_v38 = vmul.f32 0.5, %v961_v36 }
 0x4c0   :  { %v1015_v52 = vadd.f32 %v999_v16, %v991_v56 }
 0x4c1   :  { %v1014_v50 = vadd.f32 %v997_v39, %v990_v38 }
 0x4c2   :  { %v1028_v47 = vmul.f32 %v4792_v57, %v1015_v52 }
 0x4c3   :  { %v1027_v48 = vmul.f32 %v4792_v57, %v1014_v50 }
 0x4c4   :  { %v1041_v49 = vadd.f32 %v4793_v45, %v1028_v47 }
 0x4c5   :  { %v1040_v20 = vadd.f32 %v4793_v45, %v1027_v48 }
 0x4c6   :  { %vm1047_vm11 = vcmp.gt.f32.partialorder %v1041_v49, 0.0  ;;  %v1053_v62 = vmul.f32 0.01, %v1041_v49 }
 0x4c7   :  { %vm1046_vm12 = vcmp.gt.f32.partialorder %v1040_v20, 0.0  ;;  %v1052_v54 = vmul.f32 0.01, %v1040_v20 }
 0x4c8   :  { %v7210_v55 = vsel %vm1047_vm11, %v1041_v49, %v1053_v62 }
 0x4c9   :  { %v7212_v60 = vsel %vm1046_vm12, %v1040_v20, %v1052_v54  ;;  %v7285_v20 = vld [vmem:[%s8028_s26 + $0x8] sm:$0xff] }
 0x4ca   :  { %5221 = vmatprep.mubr.msk.f32.mxu1 %vm1070_vm9, %v7212_v60  ;;  %v5614_v61 = vpack.c.bf16 %v7210_v55, %v7212_v60  ;;  %vm1299_vm5 = vcmp.gt.f32.partialorder %v7285_v20, 0.0 }
 0x4cb   :  { %5222 = vmatmul.mubr.msk.f32.vlgmr.msra.gmra.mrb[2].mxu1 %vm1070_vm9, %v7210_v55 }
 0x4cc   :  { %5616 = vmatpush3.bf16.xpose.msk.msra.mxu0 %vm7216_vm13, %v5614_v61  ;;  %v7290_v61 = vld [vmem:[%s8028_s26] sm:$0xff] }
 0x4cd   :  { %5617 = vmatprep.subr.bf16.mxu0 %v6520_v1  ;;  %vm1298_vm8 = vcmp.gt.f32.partialorder %v7290_v61, 0.0 }
 0x4e2   :  { %v5213_v4 = vpop.f32.mrb[10].mxu0 }
 0x4e3   :  { %v993_v5 = vmul.f32 0.5, %v5213_v4  ;;  %v971_v42 = vpop.f32.mrb[11].mxu0 }
 0x4e4   :  { %v992_v34 = vmul.f32 0.5, %v971_v42 }
 0x4e5   :  { %v1017_v26 = vadd.f32 %v1003_v8, %v993_v5 }
 0x4e6   :  { %v1016_v6 = vadd.f32 %v1001_v53, %v992_v34 }
 0x4e7   :  { %v1030_v7 = vmul.f32 %v4792_v57, %v1017_v26 }
 0x4e8   :  { %v1029_v21 = vmul.f32 %v4792_v57, %v1016_v6 }
 0x4e9   :  { %v1043_v25 = vadd.f32 %v4793_v45, %v1030_v7  ;;  %v5216_v11 = vpop.f32.mrb[12].mxu0 }
 0x4ea   :  { %v1042_v24 = vadd.f32 %v4793_v45, %v1029_v21  ;;  %v995_v9 = vmul.f32 0.5, %v5216_v11  ;;  %v981_v12 = vpop.f32.mrb[13].mxu0  ;;  %v7307_v11 = vld [vmem:[%s8028_s26 + $0x10] sm:$0xff] }
 0x4eb   :  { %v994_v23 = vmul.f32 0.5, %v981_v12  ;;  %vm1049_vm14 = vcmp.gt.f32.partialorder %v1043_v25, 0.0  ;;  %v1055_v58 = vmul.f32 0.01, %v1043_v25  ;;  %vm1300_vm12 = vcmp.gt.f32.partialorder %v7307_v11, 0.0 }
 0x4ec   :  { %v1019_v32 = vadd.f32 %v1007_v14, %v995_v9  ;;  %vm1048_vm15 = vcmp.gt.f32.partialorder %v1042_v24, 0.0  ;;  %v1054_v27 = vmul.f32 0.01, %v1042_v24 }
 0x4ed   :  { %v1018_v51 = vadd.f32 %v1005_v10, %v994_v23  ;;  %v1061_v35 = vsel %vm1049_vm14, %v1043_v25, %v1055_v58 }
 0x4ee   :  { %v1032_v31 = vmul.f32 %v4792_v57, %v1019_v32  ;;  %v1060_v30 = vsel %vm1048_vm15, %v1042_v24, %v1054_v27 }
 0x4ef   :  { %v1031_v43 = vmul.f32 %v4792_v57, %v1018_v51  ;;  %5224 = vmatprep.mubr.msk.f32.mxu1 %vm1070_vm9, %v1060_v30  ;;  %v5618_v46 = vpack.c.bf16 %v1061_v35, %v1060_v30 }
 0x4f0   :  { %v1045_v63 = vadd.f32 %v4793_v45, %v1032_v31  ;;  %5225 = vmatmul.mubr.msk.f32.gmra.mrb[4].mxu1 %vm1070_vm9, %v1061_v35  ;;  %v7315_v31 = vld [vmem:[%s8028_s26 + $0x18] sm:$0xff] }
 0x4f1   :  { %v1044_v22 = vadd.f32 %v4793_v45, %v1031_v43  ;;  %5620 = vmatpush3.bf16.xpose.msk.msra.mxu0 %vm7216_vm13, %v5618_v46 }
 0x4f2   :  { %vm1051_vm3 = vcmp.gt.f32.partialorder %v1045_v63, 0.0  ;;  %v1057_v40 = vmul.f32 0.01, %v1045_v63  ;;  %5621 = vmatprep.subr.bf16.mxu0 %v6520_v1 }
 0x4f3   :  { %vm1050_vm4 = vcmp.gt.f32.partialorder %v1044_v22, 0.0  ;;  %v1056_v13 = vmul.f32 0.01, %v1044_v22 }
 0x4f4   :  { %v1063_v15 = vsel %vm1051_vm3, %v1045_v63, %v1057_v40  ;;  %vm1301_vm3 = vcmp.gt.f32.partialorder %v7315_v31, 0.0 }
 0x4f5   :  { %v1062_v59 = vsel %vm1050_vm4, %v1044_v22, %v1056_v13 }
 0x4f6   :  { %5227 = vmatprep.mubr.msk.f32.mxu1 %vm1070_vm9, %v1062_v59  ;;  %v5622_v17 = vpack.c.bf16 %v1063_v15, %v1062_v59 }
 0x4f7   :  { %5228 = vmatmul.mubr.msk.f32.gmra.mrb[6].mxu1 %vm1070_vm9, %v1063_v15 }
 0x4f9   :  { %5624 = vmatpush3.bf16.xpose.msk.msra.mxu0 %vm7216_vm13, %v5622_v17 }
 0x500   :  { %5243 = vmatmul.mubr.msk.f32.vlgmr.msra.gmra.mrb[14].mxu0 %vm1070_vm9, %v1184_v33 }
 0x59e   :  { %v7239_v3 = vpop.f32.mrb[2].mxu1 }
 0x59f   :  { %1364 = vperm.xlu0 %5923, %v7239_v3   ;;  %v7242_v29 = vpop.f32.mrb[3].mxu1 }
 0x5a0   :  { %1360 = vperm.xlu1 %5924, %v7242_v29   ;;  %v5927_v44 = vpack.i.bf16 %v7239_v3, %v7242_v29  ;;  %v7249_v28 = vpack.c.bf16 %v7239_v3, %v7242_v29 }
 0x5a3   :  { %5925 = vset.pattern.permute.xlu0 %v6523_v18 }
 0x5a4   :  { %1260 = vperm.xlu0 %5925, %v7242_v29  }
 0x5c3   :  { %v7253_v56 = vpop.f32.mrb[4].mxu1 }
 0x5c4   :  { %1275 = vperm.xlu0 %5925, %v7253_v56   ;;  %v7256_v36 = vpop.f32.mrb[5].mxu1 }
 0x5c5   :  { %1368 = vperm.xlu1 %5924, %v7256_v36   ;;  %v5932_v16 = vpack.i.bf16 %v7253_v56, %v7256_v36  ;;  %v7263_v57 = vpack.c.bf16 %v7253_v56, %v7256_v36 }
 0x5c8   :  { %5942 = vset.pattern.permute.xlu0 %v6524_v19 }
 0x5c9   :  { %1372 = vperm.xlu1 %5924, %v7253_v56  }
 0x5ca   :  { %v7267_v38 = vpop.f32.mrb[6].mxu1 }
 0x5cb   :  { %v7269_v39 = vpop.f32.mrb[7].mxu1 }
 0x5cc   :  { %v5937_v52 = vpack.i.bf16 %v7267_v38, %v7269_v39  ;;  %v7275_v45 = vpack.c.bf16 %v7267_v38, %v7269_v39 }
 0x5cd   :  { %5926 = vset.pattern.permute.xlu1 %v6523_v18 }
 0x5ce   :  { %1265 = vperm.xlu1 %5926, %v7239_v3  }
 0x5d2   :  { %1270 = vperm.xlu1 %5926, %v7256_v36  }
 0x5d3   :  { %v1254_v50 = vpop.f32.mrb[14].mxu0 }
 0x5d4   :  { %v5244_v47 = vpop.f32.mrb[15].mxu0  ;;  %v1378_v48 = vrot.slane %v1254_v50, %v6937_v41  ;;  %v1281_v6 = vrot.slane %v1254_v50, %v6932_v37 }
 0x5d6   :  { %5943 = vset.pattern.permute.xlu1 %v6524_v19 }
 0x61e   :  { %v1365_v49 = vpop.permute.xlu0 %1364 }
 0x61f   :  { %v1380_v62 = vadd.f32 %v1378_v48, %v1365_v49  ;;  %v1361_v54 = vpop.permute.xlu1 %1360 }
 0x620   :  { %v1379_v53 = vadd.f32 %v1378_v48, %v1361_v54 }
 0x621   :  { %v1388_v8 = vmul.f32 0.2, %v1380_v62  ;;  %vm1384_vm6 = vcmp.gt.f32.partialorder %v1380_v62, 0.0 }
 0x622   :  { %v1387_v19 = vmul.f32 0.2, %v1379_v53  ;;  %vm1383_vm10 = vcmp.gt.f32.partialorder %v1379_v53, 0.0 }
 0x623   :  { %v1392_v4 = vsel %vm1384_vm6, %v1380_v62, %v1388_v8  ;;  %v1261_v7 = vpop.permute.xlu0 %1260 }
 0x624   :  { %v7296_v5 = vsel %vm1299_vm5, %v1392_v4, -1e+30  ;;  %v1391_v42 = vsel %vm1383_vm10, %v1379_v53, %v1387_v19  ;;  %v1282_v21 = vadd.f32 %v1281_v6, %v1261_v7 }
 0x625   :  { %v1402_v34 = vsel %vm1306_vm7, %v7296_v5, -inf  ;;  %v1395_v10 = vsel %vm1298_vm8, %v1391_v42, -1e+30 }
 0x626   :  { %1403 = vmax.xlane.f32.xlu0 %v1402_v34  ;;  %v1399_v26 = vsel %vm1306_vm7, %v1395_v10, -inf  ;;  %v1290_v24 = vmul.f32 0.2, %v1282_v21  ;;  %vm1286_vm11 = vcmp.gt.f32.partialorder %v1282_v21, 0.0 }
 0x627   :  { %1400 = vmax.xlane.f32.xlu1 %v1399_v26 }
 0x628   :  { %v1294_v27 = vsel %vm1286_vm11, %v1282_v21, %v1290_v24 }
 0x629   :  { %v1302_v46 = vsel %vm1298_vm8, %v1294_v27, -1e+30 }
 0x62a   :  { %v1307_v17 = vsel %vm1306_vm7, %v1302_v46, -inf }
 0x643   :  { %v1276_v12 = vpop.permute.xlu0 %1275 }
 0x644   :  { %v1369_v25 = vpop.permute.xlu1 %1368  ;;  %v1285_v51 = vadd.f32 %v1281_v6, %v1276_v12 }
 0x645   :  { %v1381_v9 = vadd.f32 %v1378_v48, %v1369_v25 }
 0x646   :  { %v1293_v40 = vmul.f32 0.2, %v1285_v51  ;;  %vm1289_vm4 = vcmp.gt.f32.partialorder %v1285_v51, 0.0 }
 0x647   :  { %v1389_v14 = vmul.f32 0.2, %v1381_v9  ;;  %vm1385_vm14 = vcmp.gt.f32.partialorder %v1381_v9, 0.0 }
 0x648   :  { %v1373_v23 = vpop.permute.xlu1 %1372  ;;  %v1297_v49 = vsel %vm1289_vm4, %v1285_v51, %v1293_v40 }
 0x649   :  { %v1382_v58 = vadd.f32 %v1378_v48, %v1373_v23  ;;  %v1393_v32 = vsel %vm1385_vm14, %v1381_v9, %v1389_v14  ;;  %v7330_v8 = vsel %vm1301_vm3, %v1297_v49, -1e+30 }
 0x64a   :  { %v1397_v35 = vsel %vm1300_vm12, %v1393_v32, -1e+30  ;;  %v1316_v42 = vsel %vm1306_vm7, %v7330_v8, -inf }
 0x64b   :  { %v1390_v30 = vmul.f32 0.2, %v1382_v58  ;;  %v1405_v43 = vsel %vm1306_vm7, %v1397_v35, -inf  ;;  %vm1386_vm15 = vcmp.gt.f32.partialorder %v1382_v58, 0.0 }
 0x64c   :  { %1406 = vmax.xlane.f32.xlu0 %v1405_v43 }
 0x64d   :  { %v1266_v63 = vpop.permute.xlu1 %1265  ;;  %v1394_v22 = vsel %vm1386_vm15, %v1382_v58, %v1390_v30 }
 0x64e   :  { %v1283_v13 = vadd.f32 %v1281_v6, %v1266_v63  ;;  %v1398_v15 = vsel %vm1301_vm3, %v1394_v22, -1e+30 }
 0x64f   :  { %v1408_v59 = vsel %vm1306_vm7, %v1398_v15, -inf }
 0x650   :  { %v1291_v33 = vmul.f32 0.2, %v1283_v13  ;;  %1409 = vmax.xlane.f32.xlu1 %v1408_v59  ;;  %1308 = vmax.xlane.f32.xlu0 %v1307_v17  ;;  %vm1287_vm6 = vcmp.gt.f32.partialorder %v1283_v13, 0.0 }
 0x651   :  { %v1271_v50 = vpop.permute.xlu1 %1270 }
 0x652   :  { %v1284_v47 = vadd.f32 %v1281_v6, %v1271_v50  ;;  %v1295_v48 = vsel %vm1287_vm6, %v1283_v13, %v1291_v33 }
 0x653   :  { %v1303_v62 = vsel %vm1299_vm5, %v1295_v48, -1e+30 }
 0x654   :  { %v1292_v54 = vmul.f32 0.2, %v1284_v47  ;;  %v1310_v53 = vsel %vm1306_vm7, %v1303_v62, -inf  ;;  %vm1288_vm8 = vcmp.gt.f32.partialorder %v1284_v47, 0.0 }
 0x655   :  { %1311 = vmax.xlane.f32.xlu1 %v1310_v53 }
 0x656   :  { %v1296_v19 = vsel %vm1288_vm8, %v1284_v47, %v1292_v54 }
 0x657   :  { %v1304_v4 = vsel %vm1300_vm12, %v1296_v19, -1e+30 }
 0x658   :  { %v1313_v34 = vsel %vm1306_vm7, %v1304_v4, -inf }
 0x659   :  { %1317 = vmax.xlane.f32.xlu1 %v1316_v42  ;;  %1314 = vmax.xlane.f32.xlu0 %v1313_v34 }
 0x6b3   :  { %v1404_v26 = vpop.xlane.xlu0 %1403 }
 0x6b4   :  { %v1412_v6 = vsub.f32 %v7296_v5, %v1404_v26  ;;  %v1401_v7 = vpop.xlane.xlu1 %1400 }
 0x6b5   :  { %v1411_v21 = vsub.f32 %v1395_v10, %v1401_v7 }
 0x6b6   :  { %v1417_v25 = vmul.f32 1.442695, %v1412_v6 }
 0x6b7   :  { %v1415_v24 = vmul.f32 1.442695, %v1411_v21 }
 0x6b8   :  { %6006 = vpow2.f32 %v1417_v25 }
 0x6b9   :  { %6008 = vpow2.f32 %v1415_v24 }
 0x6c2   :  { %v6007_v9 = vpop.eup %6006 }
 0x6c3   :  { %v6009_v12 = vpop.eup %6008  ;;  %v7339_v14 = vmul.f32 %v6007_v9, %v7285_v20 }
 0x6c4   :  { %v7342_v23 = vmul.f32 %v6009_v12, %v7290_v61 }
 0x6c5   :  { %v1430_v58 = vsel %vm1306_vm7, %v7339_v14, 0.0 }
 0x6c6   :  { %1431 = vadd.xlane.f32.xlu1 %v1430_v58  ;;  %v1427_v5 = vsel %vm1306_vm7, %v7342_v23, 0.0 }
 0x6c7   :  { %1428 = vadd.xlane.f32.xlu0 %v1427_v5 }
 0x6d9   :  { %v1407_v10 = vpop.xlane.xlu0 %1406 }
 0x6da   :  { %v1413_v32 = vsub.f32 %v1397_v35, %v1407_v10 }
 0x6dc   :  { %v1419_v30 = vmul.f32 1.442695, %v1413_v32 }
 0x6dd   :  { %v1410_v27 = vpop.xlane.xlu1 %1409  ;;  %v1309_v51 = vpop.xlane.xlu0 %1308 }
 0x6de   :  { %v1414_v43 = vsub.f32 %v1398_v15, %v1410_v27  ;;  %v1319_v63 = vsub.f32 %v1302_v46, %v1309_v51  ;;  %6010 = vpow2.f32 %v1419_v30 }
 0x6e0   :  { %v1323_v22 = vmul.f32 1.442695, %v1319_v63  ;;  %v1421_v40 = vmul.f32 1.442695, %v1414_v43 }
 0x6e2   :  { %v1312_v13 = vpop.xlane.xlu1 %1311  ;;  %6012 = vpow2.f32 %v1323_v22 }
 0x6e3   :  { %v1320_v59 = vsub.f32 %v1303_v62, %v1312_v13  ;;  %6014 = vpow2.f32 %v1421_v40 }
 0x6e5   :  { %v1325_v17 = vmul.f32 1.442695, %v1320_v59 }
 0x6e6   :  { %v1318_v34 = vpop.xlane.xlu1 %1317 }
 0x6e7   :  { %6016 = vpow2.f32 %v1325_v17  ;;  %v1322_v26 = vsub.f32 %v7330_v8, %v1318_v34 }
 0x6e8   :  { %v6011_v33 = vpop.eup %6010 }
 0x6e9   :  { %v7354_v46 = vmul.f32 %v6011_v33, %v7307_v11  ;;  %v1329_v6 = vmul.f32 1.442695, %v1322_v26 }
 0x6eb   :  { %v1433_v62 = vsel %vm1306_vm7, %v7354_v46, 0.0 }
 0x6ec   :  { %v6013_v50 = vpop.eup %6012 }
 0x6ed   :  { %v7349_v47 = vmul.f32 %v6013_v50, %v7290_v61  ;;  %v6015_v35 = vpop.eup %6014 }
 0x6ee   :  { %v7364_v61 = vmul.f32 %v6015_v35, %v7315_v31 }
 0x6ef   :  { %v1335_v48 = vsel %vm1306_vm7, %v7349_v47, 0.0 }
 0x6f0   :  { %1336 = vadd.xlane.f32.xlu0 %v1335_v48  ;;  %v1436_v53 = vsel %vm1306_vm7, %v7364_v61, 0.0 }
 0x6f1   :  { %v6017_v15 = vpop.eup %6016 }
 0x6f2   :  { %v7357_v49 = vmul.f32 %v6017_v15, %v7285_v20  ;;  %v1315_v20 = vpop.xlane.xlu0 %1314 }
 0x6f3   :  { %v1321_v19 = vsub.f32 %v1304_v4, %v1315_v20 }
 0x6f4   :  { %v1338_v54 = vsel %vm1306_vm7, %v7357_v49, 0.0  ;;  %1434 = vadd.xlane.f32.xlu0 %v1433_v62 }
 0x6f5   :  { %1339 = vadd.xlane.f32.xlu1 %v1338_v54  ;;  %v1327_v42 = vmul.f32 1.442695, %v1321_v19  ;;  %v1722_v19 = vld [vmem:[%s7974_s12 + $0x8] sm:$0xff] }
 0x6f7   :  { %6018 = vpow2.f32 %v1327_v42 }
 0x6f8   :  { %6020 = vpow2.f32 %v1329_v6 }
 0x6f9   :  { %1437 = vadd.xlane.f32.xlu1 %v1436_v53 }
 0x70a   :  { %5933 = vrot.lane.b32.xlu1 %v5932_v16, %s6525_s4  ;;  %5928 = vrot.lane.b32.xlu0 %v5927_v44, %s6525_s4  ;;  %v6019_v16 = vpop.eup %6018 }
 0x70b   :  { %v7382_v7 = vmul.f32 %v6019_v16, %v7307_v11  ;;  %v6021_v21 = vpop.eup %6020 }
 0x70c   :  { %v7387_v38 = vmul.f32 %v6021_v21, %v7315_v31 }
 0x70d   :  { %v1341_v44 = vsel %vm1306_vm7, %v7382_v7, 0.0 }
 0x70e   :  { %5938 = vrot.lane.b32.xlu1 %v5937_v52, %s6525_s4  ;;  %v1344_v39 = vsel %vm1306_vm7, %v7387_v38, 0.0 }
 0x729   :  { %1342 = vadd.xlane.f32.xlu0 %v1341_v44 }
 0x732   :  { %1345 = vadd.xlane.f32.xlu1 %v1344_v39  ;;  %v4816_v39 = vld [vmem:[#allocation14] ss:$0 sm:$0xff] }
 0x73f   :  { %1669 = vrot.lane.b32.xlu0 %v7242_v29, %s6526_s28 }
 0x743   :  { %1671 = vrot.lane.b32.xlu1 %v7239_v3, %s6526_s28  ;;  %1673 = vrot.lane.b32.xlu0 %v7256_v36, %s6526_s28 }
 0x747   :  { %1675 = vrot.lane.b32.xlu1 %v7253_v56, %s6526_s28 }
 0x753   :  { %v1432_v4 = vpop.xlane.xlu1 %1431 }
 0x754   :  { %v1429_v52 = vpop.xlane.xlu0 %1428  ;;  %v1440_v9 = vmax.f32 %v1432_v4, 1e-30 }
 0x755   :  { %v1439_v11 = vmax.f32 %v1429_v52, 1e-30 }
 0x757   :  { %6022 = vrcp.f32 %v1439_v11 }
 0x758   :  { %6024 = vrcp.f32 %v1440_v9 }
 0x761   :  { %v6023_v31 = vpop.eup %6022 }
 0x762   :  { %v1447_v8 = vmul.f32 %v6023_v31, %v7342_v23  ;;  %v6025_v59 = vpop.eup %6024 }
 0x763   :  { %v1448_v33 = vmul.f32 %v6025_v59, %v7339_v14  ;;  %v1820_v59 = vld [vmem:[#allocation15] sm:$0x3] }
 0x764   :  { %5257 = vmatprep.mubr.msk.f32.mxu1 %vm1306_vm7, %v1447_v8 }
 0x77d   :  { %v1337_v25 = vpop.xlane.xlu0 %1336 }
 0x77e   :  { %v1347_v10 = vmax.f32 %v1337_v25, 1e-30 }
 0x781   :  { %v1435_v29 = vpop.xlane.xlu0 %1434 }
 0x782   :  { %v1340_v24 = vpop.xlane.xlu1 %1339  ;;  %v1441_v3 = vmax.f32 %v1435_v29, 1e-30 }
 0x783   :  { %v1348_v40 = vmax.f32 %v1340_v24, 1e-30 }
 0x784   :  { %6026 = vrcp.f32 %v1441_v3 }
 0x785   :  { %v5929_v12 = vpop.permute.xlu0 %5928 }
 0x786   :  { %v1438_v58 = vpop.xlane.xlu1 %1437  ;;  %v5931_v36 = vunpack.i.h.bf16 %v5929_v12  ;;  %v5930_v5 = vunpack.i.l.bf16 %v5929_v12 }
 0x787   :  { %v1442_v56 = vmax.f32 %v1438_v58, 1e-30 }
 0x788   :  { %v5625_v32 = vpack.c.bf16 %v5931_v36, %v5930_v5 }
 0x789   :  { %6028 = vrcp.f32 %v1442_v56 }
 0x78a   :  { %v5934_v27 = vpop.permute.xlu1 %5933  ;;  %5626 = vmatprep.subr.bf16.mxu1 %v5625_v32  ;;  %6030 = vrcp.f32 %v1347_v10 }
 0x78b   :  { %v5936_v51 = vunpack.i.h.bf16 %v5934_v27  ;;  %v5935_v23 = vunpack.i.l.bf16 %v5934_v27  ;;  %5628 = vmatpush3.bf16.msra.mxu1 %v5625_v32  ;;  %6032 = vrcp.f32 %v1348_v40 }
 0x78d   :  { %v5629_v30 = vpack.c.bf16 %v5936_v51, %v5935_v23 }
 0x78e   :  { %v5939_v43 = vpop.permute.xlu1 %5938  ;;  %v6027_v17 = vpop.eup %6026 }
 0x78f   :  { %v5941_v63 = vunpack.i.h.bf16 %v5939_v43  ;;  %v5940_v22 = vunpack.i.l.bf16 %v5939_v43  ;;  %5630 = vmatprep.subr.bf16.mxu1 %v5629_v30  ;;  %v1449_v35 = vmul.f32 %v6027_v17, %v7354_v46  ;;  %v6202_v17 = vld [vmem:[%s8022_s0] sm:$0xff] }
 0x790   :  { %5632 = vmatpush3.bf16.msra.mxu1 %v5629_v30 }
 0x791   :  { %v5633_v13 = vpack.c.bf16 %v5941_v63, %v5940_v22 }
 0x793   :  { %5634 = vmatprep.subr.bf16.mxu1 %v5633_v13  ;;  %v6029_v50 = vpop.eup %6028 }
 0x794   :  { %5636 = vmatpush3.bf16.msra.mxu1 %v5633_v13  ;;  %v6031_v48 = vpop.eup %6030  ;;  %v1450_v15 = vmul.f32 %v6029_v50, %v7364_v61 }
 0x795   :  { %5638 = vmatprep.subr.bf16.mxu1 %v7249_v28  ;;  %v1355_v62 = vmul.f32 %v6031_v48, %v7349_v47  ;;  %v6033_v14 = vpop.eup %6032  ;;  %v2205_v48 = vld [vmem:[#allocation20] sm:$0x7] }
 0x796   :  { %v1356_v46 = vmul.f32 %v6033_v14, %v7357_v49  ;;  %v1721_v49 = vld [vmem:[%s7974_s12] sm:$0xff] }
 0x797   :  { %5258 = vmatmul.mubr.msk.f32.vlgmr.msra.gmra.mrb[8].mxu1 %vm1306_vm7, %v1448_v33  ;;  %v5649_v42 = vpack.c.bf16 %v1722_v19, %v1721_v49 }
 0x798   :  { %5260 = vmatprep.mubr.msk.f32.mxu1 %vm1306_vm7, %v1449_v35  ;;  %5640 = vmatpush3.bf16.msra.mxu1 %v7249_v28 }
 0x799   :  { %5642 = vmatprep.subr.bf16.mxu1 %v7263_v57  ;;  %5650 = vmatprep.subr.bf16.mxu0 %v5649_v42 }
 0x79a   :  { %5652 = vmatpush3.bf16.msra.mxu0 %v5649_v42 }
 0x79b   :  { %5261 = vmatmul.mubr.msk.f32.gmra.mrb[10].mxu1 %vm1306_vm7, %v1450_v15  ;;  %v6203_v15 = vld [vmem:[%s8022_s0 + $0x8] sm:$0xff] }
 0x79c   :  { %5644 = vmatpush3.bf16.msra.mxu1 %v7263_v57  ;;  %5275 = vmatprep.mubr.msk.f32.mxu1 %vm1306_vm7, %v1355_v62 }
 0x79d   :  { %5646 = vmatprep.subr.bf16.mxu1 %v7275_v45 }
 0x7a0   :  { %5648 = vmatpush3.bf16.msra.mxu1 %v7275_v45 }
 0x7a1   :  { %5653 = vmatprep.subr.bf16.mxu1 %v6520_v1 }
 0x7a3   :  { %5276 = vmatmul.mubr.msk.f32.vlgmr.msra.gmra.mrb[8].mxu1 %vm1306_vm7, %v1356_v46 }
 0x7b6   :  { %v1343_v28 = vpop.xlane.xlu0 %1342 }
 0x7b7   :  { %v1349_v54 = vmax.f32 %v1343_v28, 1e-30 }
 0x7b9   :  { %6034 = vrcp.f32 %v1349_v54 }
 0x7ba   :  { %v1670_v21 = vpop.permute.xlu0 %1669 }
 0x7be   :  { %v1674_v10 = vpop.permute.xlu0 %1673 }
 0x7bf   :  { %v1346_v47 = vpop.xlane.xlu1 %1345 }
 0x7c0   :  { %v1350_v61 = vmax.f32 %v1346_v47, 1e-30 }
 0x7c2   :  { %6036 = vrcp.f32 %v1350_v61 }
 0x7c3   :  { %v6035_v57 = vpop.eup %6034  ;;  %v1672_v16 = vpop.permute.xlu1 %1671 }
 0x7c4   :  { %v1357_v53 = vmul.f32 %v6035_v57, %v7382_v7  ;;  %v4815_v7 = vld [vmem:[#allocation12] ss:$0 sm:$0xff]  ;;  %v7485_v57 = vld [vmem:[#allocation3 + $0x8] sm:$0xff] }
 0x7c6   :  { %5278 = vmatprep.mubr.msk.f32.mxu1 %vm1306_vm7, %v1357_v53 }
 0x7c7   :  { %v1676_v5 = vpop.permute.xlu1 %1675 }
 0x7cc   :  { %v6037_v20 = vpop.eup %6036 }
 0x7cd   :  { %v1358_v45 = vmul.f32 %v6037_v20, %v7387_v38 }
 0x7cf   :  { %5279 = vmatmul.mubr.msk.f32.gmra.mrb[10].mxu1 %vm1306_vm7, %v1358_v45  ;;  %v1719_v45 = vld [vmem:[#allocation3] sm:$0xff] }
 0x7d0   :  { %5299 = vmatprep.mubr.msk.f32.mxu1 %vm6521_vm0, %v6522_v2  ;;  %vm1916_vm11 = vcmp.gt.f32.partialorder %v1719_v45, 0.0 }
 0x876   :  { %v5277_v34 = vpop.f32.mrb[8].mxu1 }
 0x877   :  { %v1666_v26 = vmul.f32 0.5, %v5277_v34  ;;  %v1646_v6 = vpop.f32.mrb[9].mxu1 }
 0x878   :  { %v1665_v44 = vmul.f32 0.5, %v1646_v6 }
 0x879   :  { %v1682_v38 = vadd.f32 %v1672_v16, %v1666_v26 }
 0x87a   :  { %v1681_v52 = vadd.f32 %v1670_v21, %v1665_v44 }
 0x87b   :  { %v1693_v11 = vmul.f32 %v4815_v7, %v1682_v38 }
 0x87c   :  { %v1692_v31 = vmul.f32 %v4815_v7, %v1681_v52 }
 0x87d   :  { %v1704_v8 = vadd.f32 %v4816_v39, %v1693_v11 }
 0x87e   :  { %v1703_v4 = vadd.f32 %v4816_v39, %v1692_v31 }
 0x87f   :  { %vm1708_vm0 = vcmp.gt.f32.partialorder %v1704_v8, 0.0  ;;  %v1712_v25 = vmul.f32 0.01, %v1704_v8 }
 0x880   :  { %vm1707_vm5 = vcmp.gt.f32.partialorder %v1703_v4, 0.0  ;;  %v1711_v29 = vmul.f32 0.01, %v1703_v4 }
 0x881   :  { %v7430_v24 = vsel %vm1708_vm0, %v1704_v8, %v1712_v25 }
 0x882   :  { %v7432_v9 = vsel %vm1707_vm5, %v1703_v4, %v1711_v29 }
 0x883   :  { %5285 = vmatprep.mubr.msk.f32.mxu0 %vm1070_vm9, %v7432_v9  ;;  %v5654_v3 = vpack.c.bf16 %v7430_v24, %v7432_v9 }
 0x884   :  { %5286 = vmatmul.mubr.msk.f32.vlgmr.msra.gmra.mrb[16].mxu0 %vm1070_vm9, %v7430_v24 }
 0x885   :  { %5656 = vmatpush3.bf16.xpose.msk.msra.mxu1 %vm7216_vm13, %v5654_v3 }
 0x886   :  { %5657 = vmatprep.subr.bf16.mxu1 %v6520_v1 }
 0x8a2   :  { %v5280_v12 = vpop.f32.mrb[10].mxu1 }
 0x8a3   :  { %v1668_v58 = vmul.f32 0.5, %v5280_v12  ;;  %v1656_v36 = vpop.f32.mrb[11].mxu1 }
 0x8a4   :  { %v1667_v56 = vmul.f32 0.5, %v1656_v36 }
 0x8a5   :  { %v1684_v32 = vadd.f32 %v1676_v5, %v1668_v58 }
 0x8a6   :  { %v1683_v27 = vadd.f32 %v1674_v10, %v1667_v56 }
 0x8a7   :  { %v1695_v51 = vmul.f32 %v4815_v7, %v1684_v32 }
 0x8a8   :  { %v1694_v23 = vmul.f32 %v4815_v7, %v1683_v27 }
 0x8a9   :  { %v1706_v30 = vadd.f32 %v4816_v39, %v1695_v51 }
 0x8aa   :  { %v1705_v43 = vadd.f32 %v4816_v39, %v1694_v23 }
 0x8ab   :  { %vm1710_vm7 = vcmp.gt.f32.partialorder %v1706_v30, 0.0  ;;  %v1714_v63 = vmul.f32 0.01, %v1706_v30 }
 0x8ac   :  { %vm1709_vm10 = vcmp.gt.f32.partialorder %v1705_v43, 0.0  ;;  %v1713_v22 = vmul.f32 0.01, %v1705_v43 }
 0x8ad   :  { %v1718_v40 = vsel %vm1710_vm7, %v1706_v30, %v1714_v63 }
 0x8ae   :  { %v1717_v13 = vsel %vm1709_vm10, %v1705_v43, %v1713_v22 }
 0x8af   :  { %5288 = vmatprep.mubr.msk.f32.mxu0 %vm1070_vm9, %v1717_v13  ;;  %v5658_v1 = vpack.c.bf16 %v1718_v40, %v1717_v13 }
 0x8b0   :  { %5289 = vmatmul.mubr.msk.f32.gmra.mrb[18].mxu0 %vm1070_vm9, %v1718_v40 }
 0x8b1   :  { %5660 = vmatpush3.bf16.xpose.msk.msra.mxu1 %vm7216_vm13, %v5658_v1 }
 0x8b2   :  { %5324 = vmatprep.subr.msk.mxu1 %vm270_vm1, %v2205_v48 }
 0x8b8   :  { %5300 = vmatmul.mubr.msk.f32.vlgmr.msra.gmra.mrb[12].mxu1 %vm1070_vm9, %v1820_v59 }
 0x8b9   :  { %5326 = vmatprep.mubr.msk.f32.mxu1 %vm245_vm2, %v6202_v17  ;;  %5325 = vmatpush3.msk.msra.mxu1 %vm270_vm1, %v2205_v48  ;;  %vm1917_vm1 = vcmp.gt.f32.partialorder %v7485_v57, 0.0 }
 0x8bc   :  { %5327 = vmatmul.mubr.msk.f32.vlgmr.msra.gmra.mrb[14].mxu1 %vm245_vm2, %v6203_v15  ;;  %vm1920_vm2 = vcmask 261120  }
 0x957   :  { %v7452_v33 = vpop.f32.mrb[16].mxu0 }
 0x958   :  { %1952 = vperm.xlu1 %5943, %v7452_v33   ;;  %v7455_v50 = vpop.f32.mrb[17].mxu0 }
 0x959   :  { %1948 = vperm.xlu0 %5942, %v7455_v50   ;;  %v5946_v0 = vpack.i.bf16 %v7452_v33, %v7455_v50  ;;  %v7462_v35 = vpack.c.bf16 %v7452_v33, %v7455_v50 }
 0x95c   :  { %5944 = vset.pattern.permute.xlu1 %v6523_v18 }
 0x95d   :  { %1896 = vperm.xlu1 %5944, %v7455_v50   ;;  %5945 = vset.pattern.permute.xlu0 %v6523_v18 }
 0x95e   :  { %1901 = vperm.xlu0 %5945, %v7452_v33  }
 0x983   :  { %v7474_v62 = vpop.f32.mrb[18].mxu0 }
 0x984   :  { %v7476_v14 = vpop.f32.mrb[19].mxu0 }
 0x985   :  { %v5951_v18 = vpack.i.bf16 %v7474_v62, %v7476_v14  ;;  %v7482_v46 = vpack.c.bf16 %v7474_v62, %v7476_v14  ;;  %v2291_v14 = vld [vmem:[%s7980_s18] sm:$0xff] }
 0x98b   :  { %v1890_v28 = vpop.f32.mrb[12].mxu1 }
 0x98c   :  { %v5301_v54 = vpop.f32.mrb[13].mxu1  ;;  %v1958_v47 = vrot.slane %v1890_v28, %v6937_v41  ;;  %v1907_v42 = vrot.slane %v1890_v28, %v6932_v37 }
 0x9d7   :  { %v1953_v61 = vpop.permute.xlu1 %1952 }
 0x9d8   :  { %v1960_v53 = vadd.f32 %v1958_v47, %v1953_v61  ;;  %v1949_v20 = vpop.permute.xlu0 %1948  ;;  %v2293_v61 = vld [vmem:[%s7981_s19] sm:$0xff] }
 0x9d9   :  { %v1959_v49 = vadd.f32 %v1958_v47, %v1949_v20  ;;  %v2295_v20 = vld [vmem:[%s7981_s19 + $0x10] sm:$0xff] }
 0x9da   :  { %v1964_v19 = vmul.f32 0.2, %v1960_v53  ;;  %vm1962_vm13 = vcmp.gt.f32.partialorder %v1960_v53, 0.0 }
 0x9db   :  { %v1963_v34 = vmul.f32 0.2, %v1959_v49  ;;  %vm1961_vm12 = vcmp.gt.f32.partialorder %v1959_v49, 0.0 }
 0x9dc   :  { %v1897_v26 = vpop.permute.xlu1 %1896  ;;  %v1966_v6 = vsel %vm1962_vm13, %v1960_v53, %v1964_v19 }
 0x9dd   :  { %v1908_v41 = vadd.f32 %v1907_v42, %v1897_v26  ;;  %v1902_v16 = vpop.permute.xlu0 %1901  ;;  %v1968_v7 = vsel %vm1917_vm1, %v1966_v6, -1e+30  ;;  %v1965_v44 = vsel %vm1961_vm12, %v1959_v49, %v1963_v34  ;;  %v5328_v49 = vpop.f32.mrb[14].mxu1 }
 0x9de   :  { %v1909_v21 = vadd.f32 %v1907_v42, %v1902_v16  ;;  %v1972_v38 = vsel %vm1920_vm2, %v1968_v7, -inf  ;;  %v1967_v39 = vsel %vm1916_vm11, %v1965_v44, -1e+30  ;;  %v2282_v19 = vpop.f32.mrb[15].mxu1 }
 0x9df   :  { %v1912_v52 = vmul.f32 0.2, %v1908_v41  ;;  %1973 = vmax.xlane.f32.xlu0 %v1972_v38  ;;  %v1969_v37 = vsel %vm1920_vm2, %v1967_v39, -inf  ;;  %vm1910_vm14 = vcmp.gt.f32.partialorder %v1908_v41, 0.0 }
 0x9e0   :  { %v1913_v11 = vmul.f32 0.2, %v1909_v21  ;;  %1970 = vmax.xlane.f32.xlu1 %v1969_v37  ;;  %vm1911_vm15 = vcmp.gt.f32.partialorder %v1909_v21, 0.0 }
 0x9e1   :  { %v1914_v31 = vsel %vm1910_vm14, %v1908_v41, %v1912_v52 }
 0x9e2   :  { %v1918_v8 = vsel %vm1916_vm11, %v1914_v31, -1e+30  ;;  %v1915_v4 = vsel %vm1911_vm15, %v1909_v21, %v1913_v11 }
 0x9e3   :  { %v1921_v25 = vsel %vm1920_vm2, %v1918_v8, -inf  ;;  %v1919_v29 = vsel %vm1917_vm1, %v1915_v4, -1e+30 }
 0x9e4   :  { %1922 = vmax.xlane.f32.xlu1 %v1921_v25  ;;  %v1924_v3 = vsel %vm1920_vm2, %v1919_v29, -inf }
 0x9e5   :  { %1925 = vmax.xlane.f32.xlu0 %v1924_v3 }
 0xa6c   :  { %v1974_v12 = vpop.xlane.xlu0 %1973 }
 0xa6d   :  { %v1976_v58 = vsub.f32 %v1968_v7, %v1974_v12  ;;  %v1971_v36 = vpop.xlane.xlu1 %1970 }
 0xa6e   :  { %v1975_v5 = vsub.f32 %v1967_v39, %v1971_v36 }
 0xa6f   :  { %v1979_v56 = vmul.f32 1.442695, %v1976_v58 }
 0xa70   :  { %v1977_v10 = vmul.f32 1.442695, %v1975_v5 }
 0xa71   :  { %6038 = vpow2.f32 %v1979_v56  ;;  %v1923_v32 = vpop.xlane.xlu1 %1922  ;;  %v4832_v56 = vld [vmem:[#allocation21] ss:$0 sm:$0xff] }
 0xa72   :  { %6040 = vpow2.f32 %v1977_v10  ;;  %v1927_v27 = vsub.f32 %v1918_v8, %v1923_v32  ;;  %v1926_v51 = vpop.xlane.xlu0 %1925 }
 0xa73   :  { %v1928_v23 = vsub.f32 %v1919_v29, %v1926_v51 }
 0xa74   :  { %v1929_v30 = vmul.f32 1.442695, %v1927_v27  ;;  %v7578_v27 = vld [vmem:[%s7982_s20] ss:$0 sm:$0xff]  ;;  %s6528_s20 = smov 32  }
 0xa75   :  { %v1931_v43 = vmul.f32 1.442695, %v1928_v23 }
 0xa76   :  { %6042 = vpow2.f32 %v1929_v30 }
 0xa77   :  { %6044 = vpow2.f32 %v1931_v43 }
 0xa7b   :  { %v6039_v63 = vpop.eup %6038 }
 0xa7c   :  { %v6041_v22 = vpop.eup %6040  ;;  %v1982_v40 = vmul.f32 %v6039_v63, %v7485_v57 }
 0xa7d   :  { %v1981_v13 = vmul.f32 %v6041_v22, %v1719_v45 }
 0xa7e   :  { %v1986_v1 = vsel %vm1920_vm2, %v1982_v40, 0.0 }
 0xa7f   :  { %1987 = vadd.xlane.f32.xlu0 %v1986_v1  ;;  %v1983_v59 = vsel %vm1920_vm2, %v1981_v13, 0.0 }
 0xa80   :  { %v6043_v17 = vpop.eup %6042  ;;  %1984 = vadd.xlane.f32.xlu1 %v1983_v59 }
 0xa81   :  { %v6045_v48 = vpop.eup %6044  ;;  %v1933_v15 = vmul.f32 %v6043_v17, %v1719_v45 }
 0xa82   :  { %v1934_v28 = vmul.f32 %v6045_v48, %v7485_v57  ;;  %v2294_v57 = vld [vmem:[%s7981_s19 + $0x8] sm:$0xff] }
 0xa83   :  { %v1935_v54 = vsel %vm1920_vm2, %v1933_v15, 0.0  ;;  %v7519_v53 = vpack.c.bf16 %v2294_v57, %v2293_v61 }
 0xa84   :  { %1936 = vadd.xlane.f32.xlu1 %v1935_v54  ;;  %v1938_v47 = vsel %vm1920_vm2, %v1934_v28, 0.0 }
 0xa85   :  { %1939 = vadd.xlane.f32.xlu0 %v1938_v47  ;;  %5690 = vmatprep.subr.bf16.mxu1 %v7519_v53 }
 0xa86   :  { %5692 = vmatpush3.bf16.msra.mxu1 %v7519_v53 }
 0xa95   :  { %5947 = vrot.lane.b32.xlu1 %v5946_v0, %s6525_s4  ;;  %v2296_v0 = vld [vmem:[%s7981_s19 + $0x18] sm:$0xff] }
 0xa96   :  { %v7527_v62 = vpack.c.bf16 %v2296_v0, %v2295_v20 }
 0xa98   :  { %5694 = vmatprep.subr.bf16.mxu1 %v7527_v62 }
 0xa99   :  { %5696 = vmatpush3.bf16.msra.mxu1 %v7527_v62 }
 0xa9b   :  { %5952 = vrot.lane.b32.xlu0 %v5951_v18, %s6525_s4  ;;  %v2292_v18 = vld [vmem:[%s7980_s18 + $0x8] sm:$0xff] }
 0xa9c   :  { %v7539_v45 = vpack.c.bf16 %v2292_v18, %v2291_v14 }
 0xa9e   :  { %5698 = vmatprep.subr.bf16.mxu1 %v7539_v45 }
 0xb0c   :  { %v1988_v42 = vpop.xlane.xlu0 %1987 }
 0xb0d   :  { %v1985_v34 = vpop.xlane.xlu1 %1984  ;;  %v1990_v6 = vmax.f32 %v1988_v42, 1e-30 }
 0xb0e   :  { %v1989_v26 = vmax.f32 %v1985_v34, 1e-30 }
 0xb10   :  { %6046 = vrcp.f32 %v1989_v26 }
 0xb11   :  { %v1937_v41 = vpop.xlane.xlu1 %1936  ;;  %6048 = vrcp.f32 %v1990_v6 }
 0xb12   :  { %v1941_v16 = vmax.f32 %v1937_v41, 1e-30  ;;  %v1940_v7 = vpop.xlane.xlu0 %1939 }
 0xb13   :  { %v1942_v52 = vmax.f32 %v1940_v7, 1e-30 }
 0xb14   :  { %6050 = vrcp.f32 %v1941_v16 }
 0xb15   :  { %v5948_v44 = vpop.permute.xlu1 %5947  ;;  %6052 = vrcp.f32 %v1942_v52 }
 0xb16   :  { %v5950_v21 = vunpack.i.h.bf16 %v5948_v44  ;;  %v5949_v38 = vunpack.i.l.bf16 %v5948_v44  ;;  %v5953_v39 = vpop.permute.xlu0 %5952 }
 0xb17   :  { %v5955_v37 = vunpack.i.h.bf16 %v5953_v39  ;;  %v5954_v11 = vunpack.i.l.bf16 %v5953_v39 }
 0xb18   :  { %v5661_v31 = vpack.c.bf16 %v5950_v21, %v5949_v38 }
 0xb19   :  { %v5665_v8 = vpack.c.bf16 %v5955_v37, %v5954_v11 }
 0xb1a   :  { %v6047_v4 = vpop.eup %6046  ;;  %5662 = vmatprep.subr.bf16.mxu0 %v5661_v31 }
 0xb1b   :  { %5664 = vmatpush3.bf16.msra.mxu0 %v5661_v31  ;;  %v1993_v25 = vmul.f32 %v6047_v4, %v1981_v13  ;;  %v6049_v29 = vpop.eup %6048 }
 0xb1c   :  { %5666 = vmatprep.subr.bf16.mxu0 %v5665_v8  ;;  %v1994_v12 = vmul.f32 %v6049_v29, %v1982_v40 }
 0xb1d   :  { %5310 = vmatprep.mubr.msk.f32.mxu0 %vm1920_vm2, %v1993_v25 }
 0xb1e   :  { %v6051_v3 = vpop.eup %6050 }
 0xb1f   :  { %5668 = vmatpush3.bf16.msra.mxu0 %v5665_v8  ;;  %v1945_v58 = vmul.f32 %v6051_v3, %v1933_v15  ;;  %v6053_v36 = vpop.eup %6052 }
 0xb20   :  { %5670 = vmatprep.subr.bf16.mxu0 %v7462_v35  ;;  %v1946_v5 = vmul.f32 %v6053_v36, %v1934_v28 }
 0xb22   :  { %5311 = vmatmul.mubr.msk.f32.vlgmr.msra.gmra.mrb[20].mxu0 %vm1920_vm2, %v1994_v12 }
 0xb23   :  { %5672 = vmatpush3.bf16.msra.mxu0 %v7462_v35  ;;  %5321 = vmatprep.mubr.msk.f32.mxu0 %vm1920_vm2, %v1945_v58  ;;  %v7555_v35 = vadd.f32 %v4832_v56, %v2282_v19 }
 0xb24   :  { %5674 = vmatprep.subr.bf16.mxu0 %v7482_v46 }
 0xb27   :  { %5676 = vmatpush3.bf16.msra.mxu0 %v7482_v46  ;;  %v7563_v46 = vadd.f32 %v5328_v49, %v4832_v56 }
 0xb28   :  { %5678 = vmatprep.subr.bf16.mxu0 %v7519_v53 }
 0xb2a   :  { %5322 = vmatmul.mubr.msk.f32.vlgmr.msra.gmra.mrb[20].mxu0 %vm1920_vm2, %v1946_v5 }
 0xb2b   :  { %5680 = vmatpush3.bf16.msra.mxu0 %v7519_v53  ;;  %5337 = vmatprep.mubr.f32.mxu0 %v6522_v2 }
 0xb2c   :  { %5682 = vmatprep.subr.bf16.mxu0 %v7527_v62 }
 0xb2f   :  { %5684 = vmatpush3.bf16.msra.mxu0 %v7527_v62 }
 0xb30   :  { %5686 = vmatprep.subr.bf16.mxu0 %v7539_v45 }
 0xb32   :  { %5338 = vmatmul.mubr.f32.vlgmr.msra.gmra.mrb[22].mxu0 %v6522_v2 }
 0xb33   :  { %5688 = vmatpush3.bf16.msra.mxu0 %v7539_v45  ;;  %5344 = vmatprep.mubr.msk.f32.mxu0 %vm1070_vm9, %v7555_v35 }
 0xb34   :  { %5702 = vmatprep.subr.bf16.mxu0 %v7519_v53 }
 0xb3a   :  { %5345 = vmatmul.mubr.msk.f32.vlgmr.msra.gmra.mrb[22].mxu0 %vm1070_vm9, %v7563_v46 }
 0xb3b   :  { %5704 = vmatpush3.bf16.msra.mxu0 %v7519_v53 }
 0xb3c   :  { %5706 = vmatprep.subr.bf16.mxu0 %v7527_v62 }
 0xb3f   :  { %5708 = vmatpush3.bf16.msra.mxu0 %v7527_v62 }
 0xb40   :  { %5710 = vmatprep.subr.bf16.mxu0 %v7539_v45 }
 0xbfd   :  { %v7571_v10 = vpop.f32.mrb[20].mxu0 }
 0xbfe   :  { %v7573_v32 = vpop.f32.mrb[21].mxu0 }
 0xc0d   :  { %v5346_v51 = vpop.f32.mrb[22].mxu0 }
 0xc0e   :  { %v2455_v23 = vpop.f32.mrb[23].mxu0  ;;  %v2471_v43 = vadd.f32 %v5346_v51, %v7578_v27 }
 0xc0f   :  { %v2470_v30 = vadd.f32 %v7578_v27, %v2455_v23 }
 0xc10   :  { %v4840_v13 = vmul.f32 -1.442695, %v2471_v43 }
 0xc11   :  { %6054 = vtanh.f32 %v2470_v30  ;;  %v4839_v40 = vmul.f32 -1.442695, %v2470_v30 }
 0xc12   :  { %6056 = vtanh.f32 %v2471_v43 }
 0xc13   :  { %6058 = vpow2.f32 %v4839_v40 }
 0xc14   :  { %6060 = vpow2.f32 %v4840_v13 }
 0xc1b   :  { %v6055_v63 = vpop.eup %6054 }
 0xc1c   :  { %2490 = vrot.lane.b32.xlu1 %v6055_v63, %s6527_s13  ;;  %v6057_v22 = vpop.eup %6056 }
 0xc1d   :  { %v6059_v1 = vpop.eup %6058 }
 0xc1e   :  { %v2478_v59 = vadd.f32 1.0, %v6059_v1  ;;  %v6061_v17 = vpop.eup %6060 }
 0xc1f   :  { %v2479_v48 = vadd.f32 1.0, %v6061_v17 }
 0xc20   :  { %2492 = vrot.lane.b32.xlu1 %v6057_v22, %s6527_s13  ;;  %6062 = vrcp.f32 %v2478_v59 }
 0xc21   :  { %6064 = vrcp.f32 %v2479_v48  ;;  %v2300_v48 = vld [vmem:[%s7984_s22] sm:$0xff] }
 0xc2a   :  { %v6063_v15 = vpop.eup %6062 }
 0xc2b   :  { %v6065_v47 = vpop.eup %6064  ;;  %v2486_v20 = vmul.f32 0.0, %v6063_v15 }
 0xc2c   :  { %v2487_v18 = vmul.f32 0.0, %v6065_v47 }
 0xc8e   :  { %v2491_v28 = vpop.permute.xlu1 %2490 }
 0xc8f   :  { %v2496_v54 = vmul.f32 %v6063_v15, %v2491_v28 }
 0xc91   :  { %2500 = vrot.lane.b32.xlu0 %v2496_v54, %s6528_s20 }
 0xc92   :  { %v2493_v61 = vpop.permute.xlu1 %2492 }
 0xc93   :  { %v2497_v57 = vmul.f32 %v6065_v47, %v2493_v61 }
 0xc95   :  { %2502 = vrot.lane.b32.xlu1 %v2497_v57, %s6528_s20 }
 0xd03   :  { %v2501_v0 = vpop.permute.xlu0 %2500 }
 0xd04   :  { %v2506_v14 = vadd.f32 %v2501_v0, %v2486_v20  ;;  %v2302_v20 = vld [vmem:[%s7984_s22 + $0x10] sm:$0xff]  ;;  %v2303_v0 = vld [vmem:[%s7984_s22 + $0x18] sm:$0xff] }
 0xd06   :  { %6066 = vtanh.f32 %v2506_v14 }
 0xd07   :  { %v2503_v49 = vpop.permute.xlu1 %2502 }
 0xd08   :  { %v2507_v19 = vadd.f32 %v2503_v49, %v2487_v18  ;;  %v4831_v18 = vld [vmem:[#allocation18] ss:$0 sm:$0xff] }
 0xd0a   :  { %6068 = vtanh.f32 %v2507_v19 }
 0xd10   :  { %v6067_v42 = vpop.eup %6066 }
 0xd11   :  { %2512 = vrot.lane.b32.xlu0 %v6067_v42, %s6527_s13 }
 0xd14   :  { %v6069_v34 = vpop.eup %6068 }
 0xd15   :  { %2514 = vrot.lane.b32.xlu1 %v6069_v34, %s6527_s13  ;;  %v2298_v34 = vld [vmem:[%s7983_s21] sm:$0xff] }
 0xd83   :  { %v2513_v26 = vpop.permute.xlu0 %2512 }
 0xd84   :  { %v2518_v6 = vmul.f32 %v6063_v15, %v2513_v26  ;;  %v2301_v15 = vld [vmem:[%s7984_s22 + $0x8] sm:$0xff] }
 0xd85   :  { %v2299_v26 = vld [vmem:[%s7983_s21 + $0x8] sm:$0xff] }
 0xd86   :  { %2522 = vrot.lane.b32.xlu0 %v2518_v6, %s6528_s20 }
 0xd87   :  { %v2515_v41 = vpop.permute.xlu1 %2514 }
 0xd88   :  { %v2519_v16 = vmul.f32 %v6065_v47, %v2515_v41  ;;  %v7638_v47 = vpack.c.bf16 %v2301_v15, %v2300_v48 }
 0xd8a   :  { %2524 = vrot.lane.b32.xlu1 %v2519_v16, %s6528_s20 }
 0xdf8   :  { %v7590_v7 = vpop.permute.xlu0 %2522 }
 0xdf9   :  { %5355 = vmatprep.mubr.msk.f32.mxu1 %vm1920_vm2, %v7590_v7 }
 0xdfc   :  { %v7594_v44 = vpop.permute.xlu1 %2524 }
 0xdfd   :  { %5356 = vmatmul.mubr.msk.f32.vlgmr.msra.gmra.mrb[16].mxu1 %vm1920_vm2, %v7594_v44 }
 0xdfe   :  { %5700 = vmatpush3.bf16.msra.mxu1 %v7539_v45  ;;  %5362 = vmatprep.mubr.msk.f32.mxu1 %vm1070_vm9, %v7212_v60 }
 0xdff   :  { %5714 = vmatprep.subr.bf16.mxu1 %v7519_v53 }
 0xe05   :  { %5363 = vmatmul.mubr.msk.f32.vlgmr.msra.gmra.mrb[16].mxu1 %vm1070_vm9, %v7210_v55 }
 0xe06   :  { %5716 = vmatpush3.bf16.msra.mxu1 %v7519_v53 }
 0xe07   :  { %5718 = vmatprep.subr.bf16.mxu1 %v7527_v62 }
 0xe0a   :  { %5720 = vmatpush3.bf16.msra.mxu1 %v7527_v62 }
 0xe0b   :  { %5722 = vmatprep.subr.bf16.mxu1 %v7539_v45 }
 0xed8   :  { %v5364_v21 = vpop.f32.mrb[16].mxu1 }
 0xed9   :  { %v2681_v38 = vadd.f32 %v5364_v21, %v7578_v27  ;;  %v2671_v39 = vpop.f32.mrb[17].mxu1 }
 0xeda   :  { %v2680_v52 = vadd.f32 %v7578_v27, %v2671_v39 }
 0xedb   :  { %6070 = vtanh.f32 %v2681_v38  ;;  %v4846_v53 = vmul.f32 -1.442695, %v2681_v38 }
 0xedc   :  { %6072 = vtanh.f32 %v2680_v52  ;;  %v4845_v31 = vmul.f32 -1.442695, %v2680_v52 }
 0xedd   :  { %6074 = vpow2.f32 %v4846_v53 }
 0xede   :  { %6076 = vpow2.f32 %v4845_v31 }
 0xee5   :  { %v6071_v37 = vpop.eup %6070 }
 0xee6   :  { %v6073_v11 = vpop.eup %6072  ;;  %2702 = vrot.lane.b32.xlu1 %v6071_v37, %s6527_s13 }
 0xee7   :  { %2700 = vrot.lane.b32.xlu0 %v6073_v11, %s6527_s13  ;;  %v6075_v62 = vpop.eup %6074 }
 0xee8   :  { %v6077_v8 = vpop.eup %6076  ;;  %v2689_v4 = vadd.f32 1.0, %v6075_v62 }
 0xee9   :  { %v2688_v25 = vadd.f32 1.0, %v6077_v8  ;;  %v7694_v8 = vld [vmem:[%s7985_s23] ss:$0 sm:$0xff] }
 0xeea   :  { %6078 = vrcp.f32 %v2689_v4 }
 0xeeb   :  { %6080 = vrcp.f32 %v2688_v25 }
 0xef4   :  { %v6079_v29 = vpop.eup %6078 }
 0xef5   :  { %v6081_v12 = vpop.eup %6080  ;;  %v2697_v56 = vmul.f32 %v6079_v29, %v2507_v19  ;;  %v7656_v19 = vpack.c.bf16 %v2303_v0, %v2302_v20 }
 0xef6   :  { %v2696_v23 = vmul.f32 %v6081_v12, %v2506_v14 }
 0xf58   :  { %v2703_v3 = vpop.permute.xlu1 %2702 }
 0xf59   :  { %v2707_v58 = vmul.f32 %v6079_v29, %v2703_v3  ;;  %v2701_v36 = vpop.permute.xlu0 %2700 }
 0xf5a   :  { %v2706_v5 = vmul.f32 %v6081_v12, %v2701_v36 }
 0xf5b   :  { %2712 = vrot.lane.b32.xlu1 %v2707_v58, %s6528_s20 }
 0xf5c   :  { %2710 = vrot.lane.b32.xlu0 %v2706_v5, %s6528_s20 }
 0xfcd   :  { %v2713_v51 = vpop.permute.xlu1 %2712 }
 0xfce   :  { %v7614_v30 = vadd.f32 %v2713_v51, %v2697_v56  ;;  %v2711_v43 = vpop.permute.xlu0 %2710 }
 0xfcf   :  { %v7616_v63 = vadd.f32 %v2711_v43, %v2696_v23 }
 0xfd0   :  { %6082 = vtanh.f32 %v7614_v30 }
 0xfd1   :  { %6084 = vtanh.f32 %v7616_v63 }
 0xfda   :  { %v6083_v22 = vpop.eup %6082 }
 0xfdb   :  { %v6085_v40 = vpop.eup %6084  ;;  %2724 = vrot.lane.b32.xlu1 %v6083_v22, %s6527_s13 }
 0xfdc   :  { %2722 = vrot.lane.b32.xlu0 %v6085_v40, %s6527_s13 }
0x104d   :  { %v2725_v13 = vpop.permute.xlu1 %2724 }
0x104e   :  { %v2729_v1 = vmul.f32 %v6079_v29, %v2725_v13  ;;  %v2723_v59 = vpop.permute.xlu0 %2722 }
0x104f   :  { %v2728_v17 = vmul.f32 %v6081_v12, %v2723_v59 }
0x1050   :  { %2734 = vrot.lane.b32.xlu1 %v2729_v1, %s6528_s20 }
0x1051   :  { %2732 = vrot.lane.b32.xlu0 %v2728_v17, %s6528_s20 }
0x1054   :  { %2175 = vrot.lane.b32.xlu1 %v7452_v33, %s6526_s28  ;;  %v2171_v33 = vmul.f32 0.5, %v7573_v32  ;;  %v2172_v32 = vmul.f32 0.5, %v7571_v10  ;;  %v7669_v10 = vpack.c.bf16 %v2299_v26, %v2298_v34 }
0x1055   :  { %2173 = vrot.lane.b32.xlu0 %v7455_v50, %s6526_s28  ;;  %v4830_v50 = vld [vmem:[#allocation17] ss:$0 sm:$0xff] }
0x10c2   :  { %v7634_v28 = vpop.permute.xlu1 %2734 }
0x10c3   :  { %v7636_v54 = vpop.permute.xlu0 %2732 }
0x10c4   :  { %5373 = vmatprep.mubr.msk.f32.mxu0 %vm1920_vm2, %v7636_v54 }
0x10c5   :  { %5374 = vmatmul.mubr.msk.f32.vlgmr.msra.gmra.mrb[24].mxu0 %vm1920_vm2, %v7634_v28 }
0x10c6   :  { %5712 = vmatpush3.bf16.msra.mxu0 %v7539_v45  ;;  %5380 = vmatprep.mubr.msk.f32.mxu0 %vm1070_vm9, %v7432_v9  ;;  %v2176_v14 = vpop.permute.xlu1 %2175 }
0x10c7   :  { %v2174_v61 = vpop.permute.xlu0 %2173  ;;  %5726 = vmatprep.subr.bf16.mxu0 %v7638_v47  ;;  %v2180_v42 = vadd.f32 %v2176_v14, %v2172_v32 }
0x10c8   :  { %v2179_v57 = vadd.f32 %v2174_v61, %v2171_v33 }
0x10c9   :  { %v2189_v41 = vmul.f32 %v4830_v50, %v2180_v42 }
0x10ca   :  { %v2188_v49 = vmul.f32 %v4830_v50, %v2179_v57 }
0x10cb   :  { %v2198_v21 = vadd.f32 %v4831_v18, %v2189_v41 }
0x10cc   :  { %v2197_v6 = vadd.f32 %v4831_v18, %v2188_v49 }
0x10cd   :  { %5381 = vmatmul.mubr.msk.f32.vlgmr.msra.gmra.mrb[24].mxu0 %vm1070_vm9, %v7430_v24  ;;  %v2202_v39 = vmul.f32 0.01, %v2198_v21  ;;  %vm2200_vm4 = vcmp.gt.f32.partialorder %v2198_v21, 0.0 }
0x10ce   :  { %5728 = vmatpush3.bf16.msra.mxu0 %v7638_v47  ;;  %5409 = vmatprep.mubr.f32.mxu0 %v6522_v2  ;;  %v2201_v16 = vmul.f32 0.01, %v2197_v6  ;;  %vm2199_vm3 = vcmp.gt.f32.partialorder %v2197_v6, 0.0 }
0x10cf   :  { %5730 = vmatprep.subr.bf16.mxu0 %v7656_v19  ;;  %v7680_v52 = vsel %vm2200_vm4, %v2198_v21, %v2202_v39 }
0x10d0   :  { %v7674_v38 = vsel %vm2199_vm3, %v2197_v6, %v2201_v16 }
0x10d2   :  { %5732 = vmatpush3.bf16.msra.mxu0 %v7656_v19 }
0x10d3   :  { %5734 = vmatprep.subr.bf16.mxu0 %v7669_v10 }
0x10d5   :  { %5410 = vmatmul.mubr.f32.vlgmr.msra.gmra.mrb[26].mxu0 %v6522_v2 }
0x10d6   :  { %5736 = vmatpush3.bf16.msra.mxu0 %v7669_v10  ;;  %5416 = vmatprep.mubr.msk.f32.mxu0 %vm1070_vm9, %v7674_v38 }
0x10d7   :  { %5750 = vmatprep.subr.bf16.mxu0 %v7638_v47 }
0x10dd   :  { %5417 = vmatmul.mubr.msk.f32.vlgmr.msra.gmra.mrb[26].mxu0 %vm1070_vm9, %v7680_v52 }
0x10de   :  { %5752 = vmatpush3.bf16.msra.mxu0 %v7638_v47 }
0x10df   :  { %5754 = vmatprep.subr.bf16.mxu0 %v7656_v19 }
0x10e2   :  { %5756 = vmatpush3.bf16.msra.mxu0 %v7656_v19 }
0x10e3   :  { %5758 = vmatprep.subr.bf16.mxu0 %v7669_v10 }
0x11a0   :  { %v5382_v2 = vpop.f32.mrb[24].mxu0 }
0x11a1   :  { %v2891_v37 = vadd.f32 %v5382_v2, %v7578_v27  ;;  %v2881_v11 = vpop.f32.mrb[25].mxu0 }
0x11a2   :  { %v2890_v53 = vadd.f32 %v7578_v27, %v2881_v11 }
0x11a3   :  { %6086 = vtanh.f32 %v2891_v37  ;;  %v4852_v36 = vmul.f32 -1.442695, %v2891_v37 }
0x11a4   :  { %6088 = vtanh.f32 %v2890_v53  ;;  %v4851_v5 = vmul.f32 -1.442695, %v2890_v53 }
0x11ad   :  { %v6087_v31 = vpop.eup %6086 }
0x11ae   :  { %v6089_v62 = vpop.eup %6088  ;;  %2912 = vrot.lane.b32.xlu1 %v6087_v31, %s6527_s13 }
0x11af   :  { %2910 = vrot.lane.b32.xlu0 %v6089_v62, %s6527_s13 }
0x11b0   :  { %v5418_v4 = vpop.f32.mrb[26].mxu0 }
0x11b1   :  { %v3313_v25 = vadd.f32 %v5418_v4, %v7694_v8  ;;  %v3297_v29 = vpop.f32.mrb[27].mxu0 }
0x11b2   :  { %v3312_v3 = vadd.f32 %v7694_v8, %v3297_v29 }
0x11b3   :  { %6090 = vtanh.f32 %v3313_v25  ;;  %v4863_v43 = vmul.f32 -1.442695, %v3313_v25 }
0x11b4   :  { %6092 = vtanh.f32 %v3312_v3  ;;  %v4862_v40 = vmul.f32 -1.442695, %v3312_v3 }
0x11b5   :  { %6094 = vpow2.f32 %v4852_v36 }
0x11b6   :  { %6096 = vpow2.f32 %v4851_v5 }
0x11bd   :  { %v6091_v12 = vpop.eup %6090 }
0x11be   :  { %3334 = vrot.lane.b32.xlu1 %v6091_v12, %s6527_s13  ;;  %v6093_v58 = vpop.eup %6092 }
0x11bf   :  { %3332 = vrot.lane.b32.xlu0 %v6093_v58, %s6527_s13  ;;  %v6095_v56 = vpop.eup %6094 }
0x11c0   :  { %v6097_v51 = vpop.eup %6096  ;;  %v2899_v23 = vadd.f32 1.0, %v6095_v56 }
0x11c1   :  { %v2898_v22 = vadd.f32 1.0, %v6097_v51 }
0x11c2   :  { %6098 = vrcp.f32 %v2899_v23 }
0x11c3   :  { %6100 = vpow2.f32 %v4863_v43 }
0x11c4   :  { %6102 = vrcp.f32 %v2898_v22 }
0x11c5   :  { %6104 = vpow2.f32 %v4862_v40 }
0x11cc   :  { %v6099_v13 = vpop.eup %6098 }
0x11cd   :  { %v6101_v1 = vpop.eup %6100  ;;  %v2907_v42 = vmul.f32 %v6099_v13, %v7614_v30 }
0x11ce   :  { %v6103_v17 = vpop.eup %6102  ;;  %v3321_v61 = vadd.f32 1.0, %v6101_v1 }
0x11cf   :  { %v6105_v50 = vpop.eup %6104  ;;  %v2906_v26 = vmul.f32 %v6103_v17, %v7616_v63 }
0x11d0   :  { %v3320_v57 = vadd.f32 1.0, %v6105_v50  ;;  %6106 = vrcp.f32 %v3321_v61 }
0x11d2   :  { %6108 = vrcp.f32 %v3320_v57 }
0x11da   :  { %v6107_v20 = vpop.eup %6106 }
0x11db   :  { %v3329_v2 = vmul.f32 0.0, %v6107_v20 }
0x11dc   :  { %v6109_v32 = vpop.eup %6108 }
0x11dd   :  { %v3328_v63 = vmul.f32 0.0, %v6109_v32 }
0x1220   :  { %v2913_v59 = vpop.permute.xlu1 %2912 }
0x1221   :  { %v2917_v48 = vmul.f32 %v6099_v13, %v2913_v59  ;;  %v2911_v15 = vpop.permute.xlu0 %2910 }
0x1222   :  { %v2916_v33 = vmul.f32 %v6103_v17, %v2911_v15 }
0x1223   :  { %2922 = vrot.lane.b32.xlu1 %v2917_v48, %s6528_s20 }
0x1224   :  { %2920 = vrot.lane.b32.xlu0 %v2916_v33, %s6528_s20 }
0x1230   :  { %v3335_v0 = vpop.permute.xlu1 %3334 }
0x1231   :  { %v3339_v14 = vmul.f32 %v6107_v20, %v3335_v0  ;;  %v3333_v18 = vpop.permute.xlu0 %3332 }
0x1232   :  { %v3338_v49 = vmul.f32 %v6109_v32, %v3333_v18 }
0x1233   :  { %3344 = vrot.lane.b32.xlu1 %v3339_v14, %s6528_s20 }
0x1234   :  { %3342 = vrot.lane.b32.xlu0 %v3338_v49, %s6528_s20 }
0x1295   :  { %v2923_v34 = vpop.permute.xlu1 %2922 }
0x1296   :  { %v7707_v6 = vadd.f32 %v2923_v34, %v2907_v42  ;;  %v2921_v41 = vpop.permute.xlu0 %2920 }
0x1297   :  { %v7709_v16 = vadd.f32 %v2921_v41, %v2906_v26 }
0x1298   :  { %6110 = vtanh.f32 %v7707_v6 }
0x1299   :  { %6112 = vtanh.f32 %v7709_v16 }
0x12a2   :  { %v6111_v21 = vpop.eup %6110 }
0x12a3   :  { %v6113_v39 = vpop.eup %6112  ;;  %2934 = vrot.lane.b32.xlu1 %v6111_v21, %s6527_s13 }
0x12a4   :  { %2932 = vrot.lane.b32.xlu0 %v6113_v39, %s6527_s13 }
0x12a5   :  { %v3345_v30 = vpop.permute.xlu1 %3344 }
0x12a6   :  { %v7715_v37 = vadd.f32 %v3345_v30, %v3329_v2  ;;  %v3343_v11 = vpop.permute.xlu0 %3342 }
0x12a7   :  { %v7718_v53 = vadd.f32 %v3343_v11, %v3328_v63 }
0x12a8   :  { %6114 = vtanh.f32 %v7715_v37 }
0x12a9   :  { %6116 = vtanh.f32 %v7718_v53 }
0x12b2   :  { %v6115_v31 = vpop.eup %6114 }
0x12b3   :  { %3356 = vrot.lane.b32.xlu1 %v6115_v31, %s6527_s13  ;;  %v6117_v62 = vpop.eup %6116 }
0x12b4   :  { %3354 = vrot.lane.b32.xlu0 %v6117_v62, %s6527_s13 }
0x1315   :  { %v2935_v4 = vpop.permute.xlu1 %2934 }
0x1316   :  { %v2939_v25 = vmul.f32 %v6099_v13, %v2935_v4  ;;  %v2933_v29 = vpop.permute.xlu0 %2932 }
0x1317   :  { %v2938_v3 = vmul.f32 %v6103_v17, %v2933_v29 }
0x1318   :  { %2944 = vrot.lane.b32.xlu1 %v2939_v25, %s6528_s20 }
0x1319   :  { %2942 = vrot.lane.b32.xlu0 %v2938_v3, %s6528_s20 }
0x1325   :  { %v3357_v12 = vpop.permute.xlu1 %3356 }
0x1326   :  { %v3361_v58 = vmul.f32 %v6107_v20, %v3357_v12  ;;  %v3355_v36 = vpop.permute.xlu0 %3354 }
0x1327   :  { %v3360_v5 = vmul.f32 %v6109_v32, %v3355_v36 }
0x1328   :  { %3366 = vrot.lane.b32.xlu1 %v3361_v58, %s6528_s20 }
0x1329   :  { %3364 = vrot.lane.b32.xlu0 %v3360_v5, %s6528_s20 }
0x138a   :  { %v7729_v51 = vpop.permute.xlu1 %2944 }
0x138b   :  { %v7727_v56 = vpop.permute.xlu0 %2942 }
0x138c   :  { %5391 = vmatprep.mubr.msk.f32.mxu1 %vm1920_vm2, %v7727_v56 }
0x138d   :  { %5392 = vmatmul.mubr.msk.f32.vlgmr.msra.gmra.mrb[18].mxu1 %vm1920_vm2, %v7729_v51 }
0x138e   :  { %5724 = vmatpush3.bf16.msra.mxu1 %v7539_v45  ;;  %5398 = vmatprep.mubr.msk.f32.mxu1 %vm1070_vm9, %v7674_v38 }
0x138f   :  { %5738 = vmatprep.subr.bf16.mxu1 %v7638_v47 }
0x1395   :  { %5399 = vmatmul.mubr.msk.f32.vlgmr.msra.gmra.mrb[18].mxu1 %vm1070_vm9, %v7680_v52 }
0x1396   :  { %5740 = vmatpush3.bf16.msra.mxu1 %v7638_v47 }
0x1397   :  { %5742 = vmatprep.subr.bf16.mxu1 %v7656_v19 }
0x139a   :  { %5744 = vmatpush3.bf16.msra.mxu1 %v7656_v19  ;;  %v7747_v43 = vpop.permute.xlu1 %3366 }
0x139b   :  { %5746 = vmatprep.subr.bf16.mxu1 %v7669_v10  ;;  %v7745_v23 = vpop.permute.xlu0 %3364 }
0x139c   :  { %5427 = vmatprep.mubr.msk.f32.mxu1 %vm1920_vm2, %v7745_v23 }
0x139d   :  { %5428 = vmatmul.mubr.msk.f32.vlgmr.msra.gmra.mrb[20].mxu1 %vm1920_vm2, %v7747_v43 }
0x139e   :  { %5748 = vmatpush3.bf16.msra.mxu1 %v7669_v10  ;;  %5434 = vmatprep.mubr.msk.f32.mxu1 %vm1070_vm9, %v7432_v9 }
0x139f   :  { %5762 = vmatprep.subr.bf16.mxu1 %v7638_v47 }
0x13a5   :  { %5435 = vmatmul.mubr.msk.f32.vlgmr.msra.gmra.mrb[20].mxu1 %vm1070_vm9, %v7430_v24 }
0x13a6   :  { %5764 = vmatpush3.bf16.msra.mxu1 %v7638_v47 }
0x13a7   :  { %5766 = vmatprep.subr.bf16.mxu1 %v7656_v19 }
0x13aa   :  { %5768 = vmatpush3.bf16.msra.mxu1 %v7656_v19 }
0x13ab   :  { %5770 = vmatprep.subr.bf16.mxu1 %v7669_v10 }
0x1468   :  { %v7763_v45 = vpop.f32.mrb[18].mxu1 }
0x1469   :  { %v7765_v22 = vpop.f32.mrb[19].mxu1 }
0x1478   :  { %v5436_v40 = vpop.f32.mrb[20].mxu1 }
0x1479   :  { %v3523_v13 = vadd.f32 %v5436_v40, %v7694_v8  ;;  %v3513_v1 = vpop.f32.mrb[21].mxu1 }
0x147a   :  { %v3522_v59 = vadd.f32 %v7694_v8, %v3513_v1 }
0x147b   :  { %6118 = vtanh.f32 %v3523_v13  ;;  %v4869_v19 = vmul.f32 -1.442695, %v3523_v13 }
0x147c   :  { %6120 = vtanh.f32 %v3522_v59  ;;  %v4868_v48 = vmul.f32 -1.442695, %v3522_v59 }
0x147d   :  { %6122 = vpow2.f32 %v4869_v19 }
0x147e   :  { %6124 = vpow2.f32 %v4868_v48 }
0x1485   :  { %v6119_v17 = vpop.eup %6118 }
0x1486   :  { %v6121_v47 = vpop.eup %6120  ;;  %3544 = vrot.lane.b32.xlu1 %v6119_v17, %s6527_s13 }
0x1487   :  { %3542 = vrot.lane.b32.xlu0 %v6121_v47, %s6527_s13  ;;  %v6123_v15 = vpop.eup %6122 }
0x1488   :  { %v6125_v33 = vpop.eup %6124  ;;  %v3531_v50 = vadd.f32 1.0, %v6123_v15 }
0x1489   :  { %v3530_v61 = vadd.f32 1.0, %v6125_v33 }
0x148a   :  { %6126 = vrcp.f32 %v3531_v50 }
0x148b   :  { %6128 = vrcp.f32 %v3530_v61 }
0x1494   :  { %v6127_v57 = vpop.eup %6126 }
0x1495   :  { %v6129_v0 = vpop.eup %6128  ;;  %v3539_v49 = vmul.f32 %v6127_v57, %v7715_v37 }
0x1496   :  { %v3538_v34 = vmul.f32 %v6129_v0, %v7718_v53 }
0x14f8   :  { %v3545_v20 = vpop.permute.xlu1 %3544 }
0x14f9   :  { %v3549_v14 = vmul.f32 %v6127_v57, %v3545_v20  ;;  %v3543_v32 = vpop.permute.xlu0 %3542 }
0x14fa   :  { %v3548_v18 = vmul.f32 %v6129_v0, %v3543_v32 }
0x14fb   :  { %3554 = vrot.lane.b32.xlu1 %v3549_v14, %s6528_s20 }
0x14fc   :  { %3552 = vrot.lane.b32.xlu0 %v3548_v18, %s6528_s20  ;;  %v3996_v18 = vld [vmem:[%s7987_s25] sm:$0xff] }
0x156d   :  { %v3555_v42 = vpop.permute.xlu1 %3554 }
0x156e   :  { %v3559_v26 = vadd.f32 %v3555_v42, %v3539_v49  ;;  %v3553_v41 = vpop.permute.xlu0 %3552  ;;  %v3997_v49 = vld [vmem:[%s7987_s25 + $0x8] sm:$0xff] }
0x156f   :  { %v3558_v21 = vadd.f32 %v3553_v41, %v3538_v34  ;;  %v7812_v42 = vpack.c.bf16 %v3997_v49, %v3996_v18 }
0x1570   :  { %6130 = vtanh.f32 %v3559_v26 }
0x1571   :  { %6132 = vtanh.f32 %v3558_v21 }
0x157a   :  { %v6131_v39 = vpop.eup %6130 }
0x157b   :  { %v6133_v2 = vpop.eup %6132  ;;  %3566 = vrot.lane.b32.xlu1 %v6131_v39, %s6527_s13  ;;  %v3999_v39 = vld [vmem:[%s7987_s25 + $0x18] sm:$0xff] }
0x157c   :  { %3564 = vrot.lane.b32.xlu0 %v6133_v2, %s6527_s13 }
0x15ed   :  { %v3567_v30 = vpop.permute.xlu1 %3566 }
0x15ee   :  { %v3571_v63 = vmul.f32 %v6127_v57, %v3567_v30  ;;  %v3565_v11 = vpop.permute.xlu0 %3564 }
0x15ef   :  { %v3570_v31 = vmul.f32 %v6129_v0, %v3565_v11  ;;  %v3993_v11 = vld [vmem:[%s7986_s24 + $0x8] sm:$0xff] }
0x15f0   :  { %3576 = vrot.lane.b32.xlu1 %v3571_v63, %s6528_s20  ;;  %v3992_v63 = vld [vmem:[%s7986_s24] sm:$0xff] }
0x15f1   :  { %3574 = vrot.lane.b32.xlu0 %v3570_v31, %s6528_s20  ;;  %v7834_v31 = vpack.c.bf16 %v3993_v11, %v3992_v63 }
0x1662   :  { %v7781_v53 = vpop.permute.xlu1 %3576 }
0x1663   :  { %v7779_v37 = vpop.permute.xlu0 %3574 }
0x1664   :  { %5445 = vmatprep.mubr.msk.f32.mxu0 %vm1920_vm2, %v7779_v37 }
0x1665   :  { %5446 = vmatmul.mubr.msk.f32.vlgmr.msra.gmra.mrb[28].mxu0 %vm1920_vm2, %v7781_v53 }
0x1666   :  { %5760 = vmatpush3.bf16.msra.mxu0 %v7669_v10  ;;  %5452 = vmatprep.mubr.msk.f32.mxu0 %vm1070_vm9, %v7212_v60 }
0x1667   :  { %5774 = vmatprep.subr.bf16.mxu0 %v7812_v42 }
0x166d   :  { %5453 = vmatmul.mubr.msk.f32.vlgmr.msra.gmra.mrb[28].mxu0 %vm1070_vm9, %v7210_v55 }
0x166e   :  { %5776 = vmatpush3.bf16.msra.mxu0 %v7812_v42 }
0x1740   :  { %v5454_v62 = vpop.f32.mrb[28].mxu0 }
0x1741   :  { %v3733_v4 = vadd.f32 %v5454_v62, %v7694_v8  ;;  %v3723_v25 = vpop.f32.mrb[29].mxu0 }
0x1742   :  { %v3732_v29 = vadd.f32 %v7694_v8, %v3723_v25  ;;  %v3994_v25 = vld [vmem:[%s7986_s24 + $0x10] sm:$0xff] }
0x1743   :  { %6134 = vtanh.f32 %v3733_v4  ;;  %v4875_v58 = vmul.f32 -1.442695, %v3733_v4 }
0x1744   :  { %6136 = vtanh.f32 %v3732_v29  ;;  %v4874_v36 = vmul.f32 -1.442695, %v3732_v29 }
0x1745   :  { %6138 = vpow2.f32 %v4875_v58  ;;  %v3106_v58 = vadd.f32 %v7578_v27, %v7765_v22 }
0x1746   :  { %6140 = vpow2.f32 %v4874_v36 }
0x174d   :  { %v6135_v3 = vpop.eup %6134 }
0x174e   :  { %v6137_v12 = vpop.eup %6136  ;;  %3754 = vrot.lane.b32.xlu1 %v6135_v3, %s6527_s13 }
0x174f   :  { %3752 = vrot.lane.b32.xlu0 %v6137_v12, %s6527_s13  ;;  %v6139_v5 = vpop.eup %6138  ;;  %v3107_v12 = vadd.f32 %v7763_v45, %v7578_v27 }
0x1750   :  { %v6141_v40 = vpop.eup %6140  ;;  %v3741_v13 = vadd.f32 1.0, %v6139_v5 }
0x1751   :  { %v3740_v1 = vadd.f32 1.0, %v6141_v40  ;;  %v4858_v22 = vmul.f32 -1.442695, %v3107_v12 }
0x1752   :  { %6142 = vrcp.f32 %v3741_v13 }
0x1753   :  { %6144 = vrcp.f32 %v3740_v1  ;;  %v4857_v1 = vmul.f32 -1.442695, %v3106_v58 }
0x175c   :  { %v6143_v59 = vpop.eup %6142 }
0x175d   :  { %v6145_v47 = vpop.eup %6144  ;;  %v3749_v33 = vmul.f32 %v6143_v59, %v3559_v26 }
0x175e   :  { %v3748_v61 = vmul.f32 %v6145_v47, %v3558_v21  ;;  %v3998_v21 = vld [vmem:[%s7987_s25 + $0x10] sm:$0xff] }
0x175f   :  { %v7822_v30 = vpack.c.bf16 %v3999_v39, %v3998_v21 }
0x1761   :  { %5778 = vmatprep.subr.bf16.mxu0 %v7822_v30 }
0x1762   :  { %5780 = vmatpush3.bf16.msra.mxu0 %v7822_v30 }
0x1763   :  { %5782 = vmatprep.subr.bf16.mxu0 %v7834_v31 }
0x17c0   :  { %v3755_v17 = vpop.permute.xlu1 %3754 }
0x17c1   :  { %v3759_v19 = vmul.f32 %v6143_v59, %v3755_v17  ;;  %v3753_v48 = vpop.permute.xlu0 %3752 }
0x17c2   :  { %v3758_v15 = vmul.f32 %v6145_v47, %v3753_v48 }
0x17c3   :  { %3764 = vrot.lane.b32.xlu1 %v3759_v19, %s6528_s20 }
0x17c4   :  { %3762 = vrot.lane.b32.xlu0 %v3758_v15, %s6528_s20 }
0x1835   :  { %v3765_v50 = vpop.permute.xlu1 %3764 }
0x1836   :  { %v7798_v57 = vadd.f32 %v3765_v50, %v3749_v33  ;;  %v3763_v20 = vpop.permute.xlu0 %3762 }
0x1837   :  { %v7800_v0 = vadd.f32 %v3763_v20, %v3748_v61 }
0x1838   :  { %6146 = vtanh.f32 %v7798_v57 }
0x1839   :  { %6148 = vtanh.f32 %v7800_v0 }
0x1842   :  { %v6147_v14 = vpop.eup %6146 }
0x1843   :  { %v6149_v32 = vpop.eup %6148  ;;  %3776 = vrot.lane.b32.xlu1 %v6147_v14, %s6527_s13 }
0x1844   :  { %3774 = vrot.lane.b32.xlu0 %v6149_v32, %s6527_s13 }
0x18b5   :  { %v3777_v34 = vpop.permute.xlu1 %3776 }
0x18b6   :  { %v3781_v26 = vmul.f32 %v6143_v59, %v3777_v34  ;;  %v3775_v41 = vpop.permute.xlu0 %3774 }
0x18b7   :  { %v3780_v2 = vmul.f32 %v6145_v47, %v3775_v41 }
0x18b8   :  { %3786 = vrot.lane.b32.xlu1 %v3781_v26, %s6528_s20 }
0x18b9   :  { %3784 = vrot.lane.b32.xlu0 %v3780_v2, %s6528_s20 }
0x192a   :  { %v3787_v4 = vpop.permute.xlu1 %3786 }
0x192b   :  { %v3785_v62 = vpop.permute.xlu0 %3784 }
0x192c   :  { %5463 = vmatprep.mubr.msk.f32.mxu1 %vm1920_vm2, %v3785_v62 }
0x192d   :  { %5464 = vmatmul.mubr.msk.f32.vlgmr.msra.gmra.mrb[22].mxu1 %vm1920_vm2, %v3787_v4 }
0x192e   :  { %5772 = vmatpush3.bf16.msra.mxu1 %v7669_v10  ;;  %5470 = vmatprep.mubr.msk.f32.mxu1 %vm1070_vm9, %v7555_v35  ;;  %v3995_v10 = vld [vmem:[%s7986_s24 + $0x18] sm:$0xff]  ;;  %s6530_s24 = smov [#allocation23]  }
0x192f   :  { %5790 = vmatprep.subr.bf16.mxu1 %v7812_v42  ;;  %v7856_v29 = vpack.c.bf16 %v3995_v10, %v3994_v25 }
0x1935   :  { %5471 = vmatmul.mubr.msk.f32.vlgmr.msra.gmra.mrb[22].mxu1 %vm1070_vm9, %v7563_v46 }
0x1936   :  { %5792 = vmatpush3.bf16.msra.mxu1 %v7812_v42  ;;  %5503 = vmatprep.mubr.msk.f32.mxu1 %vm1920_vm2, %v3785_v62 }
0x1937   :  { %5794 = vmatprep.subr.bf16.mxu1 %v7822_v30 }
0x193a   :  { %5796 = vmatpush3.bf16.msra.mxu1 %v7822_v30 }
0x193b   :  { %5798 = vmatprep.subr.bf16.mxu1 %v7834_v31 }
0x193d   :  { %5504 = vmatmul.mubr.msk.f32.vlgmr.msra.gmra.mrb[24].mxu1 %vm1920_vm2, %v3787_v4 }
0x193e   :  { %5800 = vmatpush3.bf16.msra.mxu1 %v7834_v31  ;;  %5514 = vmatprep.mubr.msk.f32.mxu1 %vm1920_vm2, %v7636_v54 }
0x193f   :  { %5802 = vmatprep.subr.bf16.mxu1 %v7856_v29 }
0x1942   :  { %5804 = vmatpush3.bf16.msra.mxu1 %v7856_v29 }
0x1943   :  { %5822 = vmatprep.subr.bf16.mxu1 %v7812_v42 }
0x1945   :  { %5515 = vmatmul.mubr.msk.f32.vlgmr.msra.gmra.mrb[24].mxu1 %vm1920_vm2, %v7634_v28 }
0x1946   :  { %5824 = vmatpush3.bf16.msra.mxu1 %v7812_v42  ;;  %5547 = vmatprep.mubr.msk.f32.mxu1 %vm1920_vm2, %v7745_v23 }
0x1947   :  { %5826 = vmatprep.subr.bf16.mxu1 %v7822_v30 }
0x194a   :  { %5828 = vmatpush3.bf16.msra.mxu1 %v7822_v30 }
0x194b   :  { %5830 = vmatprep.subr.bf16.mxu1 %v7834_v31 }
0x194d   :  { %5548 = vmatmul.mubr.msk.f32.vlgmr.msra.gmra.mrb[26].mxu1 %vm1920_vm2, %v7747_v43 }
0x194e   :  { %5832 = vmatpush3.bf16.msra.mxu1 %v7834_v31 }
0x194f   :  { %5834 = vmatprep.subr.bf16.mxu1 %v7856_v29 }
0x1952   :  { %5836 = vmatpush3.bf16.msra.mxu1 %v7856_v29 }
0x1a08   :  { %v5472_v28 = vpop.f32.mrb[22].mxu1 }
0x1a09   :  { %v3943_v54 = vadd.f32 %v5472_v28, %v7694_v8  ;;  %v3933_v3 = vpop.f32.mrb[23].mxu1 }
0x1a0a   :  { %v3942_v23 = vadd.f32 %v7694_v8, %v3933_v3 }
0x1a0b   :  { %6150 = vtanh.f32 %v3943_v54  ;;  %v4881_v27 = vmul.f32 -1.442695, %v3943_v54 }
0x1a0c   :  { %6152 = vtanh.f32 %v3942_v23  ;;  %v4880_v45 = vmul.f32 -1.442695, %v3942_v23 }
0x1a0d   :  { %6154 = vtanh.f32 %v3107_v12 }
0x1a0e   :  { %6156 = vtanh.f32 %v3106_v58 }
0x1a0f   :  { %6158 = vpow2.f32 %v4881_v27 }
0x1a10   :  { %6160 = vpow2.f32 %v4880_v45 }
0x1a11   :  { %6162 = vpow2.f32 %v4858_v22 }
0x1a12   :  { %6164 = vpow2.f32 %v4857_v1 }
0x1a15   :  { %v6151_v43 = vpop.eup %6150 }
0x1a16   :  { %v6153_v36 = vpop.eup %6152  ;;  %3964 = vrot.lane.b32.xlu1 %v6151_v43, %s6527_s13 }
0x1a17   :  { %3962 = vrot.lane.b32.xlu0 %v6153_v36, %s6527_s13  ;;  %v6155_v40 = vpop.eup %6154 }
0x1a18   :  { %v7886_v5 = vpop.f32.mrb[24].mxu1  ;;  %v6157_v13 = vpop.eup %6156 }
0x1a19   :  { %v7888_v8 = vpop.f32.mrb[25].mxu1  ;;  %v6159_v59 = vpop.eup %6158 }
0x1a1a   :  { %3128 = vrot.lane.b32.xlu1 %v6155_v40, %s6527_s13  ;;  %v6161_v17 = vpop.eup %6160  ;;  %v3951_v47 = vadd.f32 1.0, %v6159_v59 }
0x1a1b   :  { %3126 = vrot.lane.b32.xlu0 %v6157_v13, %s6527_s13  ;;  %v6163_v19 = vpop.eup %6162  ;;  %v3950_v48 = vadd.f32 1.0, %v6161_v17 }
0x1a1c   :  { %v6165_v15 = vpop.eup %6164  ;;  %v3115_v33 = vadd.f32 1.0, %v6163_v19  ;;  %6166 = vrcp.f32 %v3951_v47 }
0x1a1d   :  { %v3114_v50 = vadd.f32 1.0, %v6165_v15  ;;  %6168 = vrcp.f32 %v3950_v48 }
0x1a1e   :  { %6170 = vrcp.f32 %v3115_v33 }
0x1a1f   :  { %6172 = vrcp.f32 %v3114_v50 }
0x1a26   :  { %v6167_v61 = vpop.eup %6166 }
0x1a27   :  { %v6169_v14 = vpop.eup %6168  ;;  %v3959_v63 = vmul.f32 %v6167_v61, %v7798_v57 }
0x1a28   :  { %v6171_v34 = vpop.eup %6170  ;;  %v3958_v62 = vmul.f32 %v6169_v14, %v7800_v0 }
0x1a29   :  { %v6173_v41 = vpop.eup %6172  ;;  %v3123_v28 = vmul.f32 %v6171_v34, %v7707_v6 }
0x1a2a   :  { %v3122_v3 = vmul.f32 %v6173_v41, %v7709_v16 }
0x1a88   :  { %v3965_v20 = vpop.permute.xlu1 %3964 }
0x1a89   :  { %v3969_v32 = vmul.f32 %v6167_v61, %v3965_v20  ;;  %v3963_v18 = vpop.permute.xlu0 %3962 }
0x1a8a   :  { %v3968_v49 = vmul.f32 %v6169_v14, %v3963_v18 }
0x1a8b   :  { %3974 = vrot.lane.b32.xlu1 %v3969_v32, %s6528_s20 }
0x1a8c   :  { %v3129_v26 = vpop.permute.xlu1 %3128  ;;  %3972 = vrot.lane.b32.xlu0 %v3968_v49, %s6528_s20 }
0x1a8d   :  { %v3133_v21 = vmul.f32 %v6171_v34, %v3129_v26  ;;  %v3127_v39 = vpop.permute.xlu0 %3126 }
0x1a8e   :  { %v3132_v2 = vmul.f32 %v6173_v41, %v3127_v39 }
0x1a8f   :  { %3138 = vrot.lane.b32.xlu1 %v3133_v21, %s6528_s20 }
0x1a90   :  { %3136 = vrot.lane.b32.xlu0 %v3132_v2, %s6528_s20 }
0x1afd   :  { %v3975_v11 = vpop.permute.xlu1 %3974 }
0x1afe   :  { %v3979_v4 = vadd.f32 %v3975_v11, %v3959_v63  ;;  %v3973_v25 = vpop.permute.xlu0 %3972 }
0x1aff   :  { %v3978_v10 = vadd.f32 %v3973_v25, %v3958_v62 }
0x1b00   :  { %6174 = vtanh.f32 %v3979_v4 }
0x1b01   :  { %6176 = vtanh.f32 %v3978_v10  ;;  %v3139_v54 = vpop.permute.xlu1 %3138 }
0x1b02   :  { %v3143_v23 = vadd.f32 %v3139_v54, %v3123_v28  ;;  %v3137_v12 = vpop.permute.xlu0 %3136 }
0x1b03   :  { %v3142_v58 = vadd.f32 %v3137_v12, %v3122_v3 }
0x1b04   :  { %6178 = vtanh.f32 %v3143_v23 }
0x1b05   :  { %6180 = vtanh.f32 %v3142_v58 }
0x1b0a   :  { %v6175_v43 = vpop.eup %6174 }
0x1b0b   :  { %v6177_v57 = vpop.eup %6176  ;;  %3986 = vrot.lane.b32.xlu1 %v6175_v43, %s6527_s13 }
0x1b0c   :  { %3984 = vrot.lane.b32.xlu0 %v6177_v57, %s6527_s13 }
0x1b0e   :  { %v6179_v0 = vpop.eup %6178 }
0x1b0f   :  { %v6181_v36 = vpop.eup %6180  ;;  %3150 = vrot.lane.b32.xlu1 %v6179_v0, %s6527_s13 }
0x1b10   :  { %3148 = vrot.lane.b32.xlu0 %v6181_v36, %s6527_s13  ;;  %s4744_s13 = sshll.u32 %s6530_s24, 4  ;;  %s4745_s13 = int_to_ptr.vmem [resolvable:$true] %s4744_s13 }
0x1b11   :  { %p6473_p13 = scmp.lt.s32.totalorder %s4745_s13, %s4745_s13 }
0x1b7d   :  { %v3987_v6 = vpop.permute.xlu1 %3986 }
0x1b7e   :  { %v3991_v40 = vmul.f32 %v6167_v61, %v3987_v6  ;;  %v3985_v16 = vpop.permute.xlu0 %3984 }
0x1b7f   :  { %v3990_v13 = vmul.f32 %v6169_v14, %v3985_v16 }
0x1b80   :  { %4004 = vrot.lane.b32.xlu1 %v3991_v40, %s6528_s20 }
0x1b81   :  { %v3151_v27 = vpop.permute.xlu1 %3150  ;;  %4002 = vrot.lane.b32.xlu0 %v3990_v13, %s6528_s20 }
0x1b82   :  { %v3155_v45 = vmul.f32 %v6171_v34, %v3151_v27  ;;  %v3149_v22 = vpop.permute.xlu0 %3148 }
0x1b83   :  { %v3154_v1 = vmul.f32 %v6173_v41, %v3149_v22 }
0x1b84   :  { %4552 = vrot.lane.b32.xlu1 %v3155_v45, %s6528_s20 }
0x1b85   :  { %4550 = vrot.lane.b32.xlu0 %v3154_v1, %s6528_s20  ;;  %s6468_s20 = scalar_lea.vmem %s4745_s13, 256 }
0x1b86   :  { %p6469_p12 = scmp.ne.s32.totalorder %s4745_s13, %s6468_s20  ;;  %p6474_p0 = scmp.lt.s32.totalorder %s6468_s20, %s6468_s20 }
0x1b88   :  { %p6475_p1 = por %p6474_p0, %p6473_p13 }
0x1b8a   :  { %p6476_p2 = pnand %p6475_p1, %p6469_p12 }
0x1bf2   :  { %v4005_v59 = vpop.permute.xlu1 %4004 }
0x1bf3   :  { %v4003_v17 = vpop.permute.xlu0 %4002 }
0x1bf4   :  { %5481 = vmatprep.mubr.msk.f32.mxu0 %vm1920_vm2, %v4003_v17 }
0x1bf5   :  { %5482 = vmatmul.mubr.msk.f32.vlgmr.msra.gmra.mrb[30].mxu0 %vm1920_vm2, %v4005_v59 }
0x1bf6   :  { %5784 = vmatpush3.bf16.msra.mxu0 %v7834_v31  ;;  %5492 = vmatprep.mubr.msk.f32.mxu0 %vm1920_vm2, %v7590_v7  ;;  %v4553_v19 = vpop.permute.xlu1 %4552  ;;  %v6529_v7 = vmov 0  }
0x1bf7   :  { %v4551_v47 = vpop.permute.xlu0 %4550  ;;  %5786 = vmatprep.subr.bf16.mxu0 %v7856_v29  ;;  %5956 = vset.pattern.permute.xlu1 %v6529_v7 }
0x1bf8   :  { %5558 = vmatprep.mubr.msk.f32.mxu1 %vm1920_vm2, %v4551_v47  ;;  %5957 = vset.pattern.permute.xlu0 %v6529_v7 }
0x1bf9   :  { %5559 = vmatmul.mubr.msk.f32.vlgmr.msra.gmra.mrb[26].mxu1 %vm1920_vm2, %v4553_v19 }
0x1bfa   :  { %5788 = vmatpush3.bf16.msra.mxu0 %v7856_v29 }
0x1bfb   :  { %5806 = vmatprep.subr.bf16.mxu0 %v7812_v42 }
0x1bfd   :  { %5493 = vmatmul.mubr.msk.f32.vlgmr.msra.gmra.mrb[30].mxu0 %vm1920_vm2, %v7594_v44 }
0x1bfe   :  { %5808 = vmatpush3.bf16.msra.mxu0 %v7812_v42  ;;  %5525 = vmatprep.mubr.msk.f32.mxu0 %vm1920_vm2, %v7779_v37  ;;  %v4886_v42 = vld [vmem:[#allocation2] ss:$0 sm:$0xff] }
0x1bff   :  { %5810 = vmatprep.subr.bf16.mxu0 %v7822_v30 }
0x1c02   :  { %5812 = vmatpush3.bf16.msra.mxu0 %v7822_v30 }
0x1c03   :  { %5814 = vmatprep.subr.bf16.mxu0 %v7834_v31 }
0x1c05   :  { %5526 = vmatmul.mubr.msk.f32.vlgmr.msra.gmra.mrb[32].mxu0 %vm1920_vm2, %v7781_v53  ;;  %v4320_v53 = vadd.f32 %v7886_v5, %v4886_v42 }
0x1c06   :  { %5816 = vmatpush3.bf16.msra.mxu0 %v7834_v31  ;;  %5536 = vmatprep.mubr.msk.f32.mxu0 %vm1920_vm2, %v7727_v56  ;;  %v4319_v56 = vadd.f32 %v4886_v42, %v7888_v8 }
0x1c07   :  { %5818 = vmatprep.subr.bf16.mxu0 %v7856_v29 }
0x1c0a   :  { %5820 = vmatpush3.bf16.msra.mxu0 %v7856_v29 }
0x1c0d   :  { %5537 = vmatmul.mubr.msk.f32.vlgmr.msra.gmra.mrb[32].mxu0 %vm1920_vm2, %v7729_v51 }
0x1ccc   :  { %v5560_v44 = vpop.f32.mrb[26].mxu1 }
0x1ccd   :  { %v4624_v37 = vpop.f32.mrb[27].mxu1  ;;  %v4634_v14 = vadd.f32 %v5560_v44, %v4886_v42 }
0x1cce   :  { %v4633_v18 = vadd.f32 %v4886_v42, %v4624_v37 }
0x1cd0   :  { %v5494_v30 = vpop.f32.mrb[30].mxu0 }
0x1cd1   :  { %v4168_v31 = vadd.f32 %v5494_v30, %v4886_v42  ;;  %v4151_v48 = vpop.f32.mrb[31].mxu0 }
0x1cd2   :  { %v4167_v15 = vadd.f32 %v4886_v42, %v4151_v48 }
0x1cd3   :  { %v4636_v33 = vmax.f32 %v4168_v31, %v4320_v53 }
0x1cd4   :  { %v4635_v50 = vmax.f32 %v4167_v15, %v4319_v56 }
0x1ce0   :  { %v5538_v29 = vpop.f32.mrb[32].mxu0 }
0x1ce1   :  { %v4472_v61 = vadd.f32 %v5538_v29, %v4886_v42  ;;  %v4462_v20 = vpop.f32.mrb[33].mxu0 }
0x1ce2   :  { %v4471_v51 = vadd.f32 %v4886_v42, %v4462_v20 }
0x1ce3   :  { %v4638_v32 = vmax.f32 %v4636_v33, %v4472_v61 }
0x1ce4   :  { %v4637_v49 = vmax.f32 %v4635_v50, %v4471_v51 }
0x1ce5   :  { %v4640_v34 = vmax.f32 %v4638_v32, %v4634_v14 }
0x1ce6   :  { %v4639_v26 = vmax.f32 %v4637_v49, %v4633_v18 }
0x1ce7   :  { %v4642_v41 = vsub.f32 %v4168_v31, %v4640_v34  ;;  %v4648_v21 = vsub.f32 %v4320_v53, %v4640_v34  ;;  %v4654_v5 = vsub.f32 %v4472_v61, %v4640_v34  ;;  %v4660_v39 = vsub.f32 %v4634_v14, %v4640_v34 }
0x1ce8   :  { %v4641_v2 = vsub.f32 %v4167_v15, %v4639_v26  ;;  %v4647_v63 = vsub.f32 %v4319_v56, %v4639_v26  ;;  %v4653_v8 = vsub.f32 %v4471_v51, %v4639_v26  ;;  %v4659_v11 = vsub.f32 %v4633_v18, %v4639_v26 }
0x1ce9   :  { %v4645_v62 = vmul.f32 1.442695, %v4642_v41  ;;  %v4651_v4 = vmul.f32 1.442695, %v4648_v21  ;;  %v4657_v25 = vmul.f32 1.442695, %v4654_v5 }
0x1cea   :  { %v4663_v10 = vmul.f32 1.442695, %v4660_v39  ;;  %v4643_v28 = vmul.f32 1.442695, %v4641_v2  ;;  %v4649_v54 = vmul.f32 1.442695, %v4647_v63 }
0x1ceb   :  { %6182 = vpow2.f32 %v4645_v62  ;;  %v4655_v3 = vmul.f32 1.442695, %v4653_v8  ;;  %v4661_v23 = vmul.f32 1.442695, %v4659_v11 }
0x1cec   :  { %6184 = vpow2.f32 %v4651_v4 }
0x1ced   :  { %6186 = vpow2.f32 %v4657_v25 }
0x1cee   :  { %6188 = vpow2.f32 %v4663_v10 }
0x1cef   :  { %6190 = vpow2.f32 %v4643_v28 }
0x1cf0   :  { %6192 = vpow2.f32 %v4649_v54 }
0x1cf1   :  { %6194 = vpow2.f32 %v4655_v3 }
0x1cf2   :  { %6196 = vpow2.f32 %v4661_v23 }
0x1cf5   :  { %v6183_v12 = vpop.eup %6182 }
0x1cf6   :  { %v6185_v58 = vpop.eup %6184 }
0x1cf7   :  { %v6187_v43 = vpop.eup %6186  ;;  %v4666_v57 = vadd.f32 %v6185_v58, %v6183_v12 }
0x1cf8   :  { %v6189_v0 = vpop.eup %6188 }
0x1cf9   :  { %v6191_v36 = vpop.eup %6190  ;;  %v4668_v6 = vadd.f32 %v6187_v43, %v4666_v57 }
0x1cfa   :  { %v6193_v40 = vpop.eup %6192 }
0x1cfb   :  { %v4670_v16 = vadd.f32 %v6189_v0, %v4668_v6  ;;  %v4665_v13 = vadd.f32 %v6193_v40, %v6191_v36  ;;  %v6195_v27 = vpop.eup %6194 }
0x1cfc   :  { %v6197_v22 = vpop.eup %6196 }
0x1cfd   :  { %6198 = vrcp.f32 %v4670_v16  ;;  %v4667_v45 = vadd.f32 %v6195_v27, %v4665_v13 }
0x1cff   :  { %v4669_v1 = vadd.f32 %v6197_v22, %v4667_v45 }
0x1d01   :  { %6200 = vrcp.f32 %v4669_v1 }
0x1d07   :  { %v6199_v59 = vpop.eup %6198 }
0x1d08   :  { %v4690_v17 = vmul.f32 %v6199_v59, %v6185_v58  ;;  %v4674_v47 = vmul.f32 %v6199_v59, %v6183_v12  ;;  %v4706_v19 = vmul.f32 %v6199_v59, %v6187_v43  ;;  %v4722_v7 = vmul.f32 %v6199_v59, %v6189_v0 }
0x1d0a   :  { %4698 = vperm.xlu0 %5957, %v4690_v17   ;;  %4682 = vperm.xlu1 %5956, %v4674_v47  }
0x1d0b   :  { %v6201_v44 = vpop.eup %6200 }
0x1d0c   :  { %v4689_v37 = vmul.f32 %v6201_v44, %v6193_v40  ;;  %v4705_v42 = vmul.f32 %v6201_v44, %v6195_v27  ;;  %v4673_v30 = vmul.f32 %v6201_v44, %v6191_v36  ;;  %v4721_v53 = vmul.f32 %v6201_v44, %v6197_v22 }
0x1d0e   :  { %4714 = vperm.xlu0 %5957, %v4706_v19   ;;  %4693 = vperm.xlu1 %5956, %v4689_v37  }
0x1d12   :  { %4709 = vperm.xlu1 %5956, %v4705_v42   ;;  %4677 = vperm.xlu0 %5957, %v4673_v30  }
0x1d16   :  { %4725 = vperm.xlu1 %5956, %v4721_v53   ;;  %4730 = vperm.xlu0 %5957, %v4722_v7  }
0x1d89   :  { %v4699_v31 = vpop.permute.xlu0 %4698  ;;  %v4683_v48 = vpop.permute.xlu1 %4682 }
0x1d8a   :  { %v4702_v33 = vmul.f32 %v4699_v31, %v7210_v55  ;;  %v4686_v50 = vmul.f32 %v4683_v48, %v7563_v46 }
0x1d8c   :  { %v4704_v32 = vadd.f32 %v4702_v33, %v4686_v50 }
0x1d8d   :  { %v4715_v56 = vpop.permute.xlu0 %4714  ;;  %v4694_v15 = vpop.permute.xlu1 %4693 }
0x1d8e   :  { %v4718_v20 = vmul.f32 %v4715_v56, %v7430_v24  ;;  %v4701_v51 = vmul.f32 %v4694_v15, %v7212_v60 }
0x1d90   :  { %v4720_v41 = vadd.f32 %v4718_v20, %v4704_v32 }
0x1d91   :  { %v4710_v29 = vpop.permute.xlu1 %4709  ;;  %v4678_v61 = vpop.permute.xlu0 %4677 }
0x1d92   :  { %v4685_v14 = vmul.f32 %v4678_v61, %v7555_v35  ;;  %v4717_v18 = vmul.f32 %v4710_v29, %v7432_v9 }
0x1d94   :  { %v4703_v49 = vadd.f32 %v4701_v51, %v4685_v14 }
0x1d95   :  { %v4726_v34 = vpop.permute.xlu1 %4725  ;;  %v4731_v26 = vpop.permute.xlu0 %4730 }
0x1d96   :  { %v4719_v55 = vadd.f32 %v4717_v18, %v4703_v49  ;;  %v4733_v46 = vmul.f32 %v4726_v34, %v7674_v38  ;;  %v4734_v21 = vmul.f32 %v4731_v26, %v7680_v52 }
0x1d98   :  { %v4735_v5 = vadd.f32 %v4733_v46, %v4719_v55  ;;  %v4736_v24 = vadd.f32 %v4734_v21, %v4720_v41 }
0x1d9a   :  { %4737 = vst.msk [vmem:[#allocation23] sm:$0xff] %vm1070_vm9, %v4735_v5  ;;  %4738 = vst.msk [vmem:[#allocation23 + $0x8] sm:$0xff] %vm1070_vm9, %v4736_v24 }
0x1d9b   :  { %6479 = shalt.err (!%p6476_p2)
}
0x1d9c   :  { %s6480_s0 = scalar_lea.hbm %s7989_s27, 256 }
0x1d9d   :  { %p6481_p3 = scmp.ne.s32.totalorder %s7989_s27, %s6480_s0  ;;  %p6484_p4 = scmp.lt.u32.totalorder %s6480_s0, %s7989_s27 }
0x1d9f   :  { %p6486_p5 = pnand %p6484_p4, %p6481_p3 }
0x1da1   :  { %6489 = shalt.err (!%p6486_p5)
}
0x1da2   :  { %4750 = dma.vmem_to_hbm [thread:$0]  %s4745_s13, 256, %s7989_s27, [#allocation5], %s6512_s15, %s6512_s15, %s6513_s5  }
0x1da3   :  { %6504 = dma.done.wait [#allocation5], 256  }
0x1da4   :  { %6505 = vsyncadd [#allocation5], 4294967040 }
0x1da5   :  { %4754 = vsyncpa [#allocation4], 1 }
0x1da6   :  { %4755 = vsyncpa [#allocation7], 1 }
0x1da7   :  { %4756 = vsyncpa [#allocation10], 1 }
0x1da8   :  { %4757 = vsyncpa [#allocation13], 1 }
0x1da9   :  { %4758 = vsyncpa [#allocation16], 1 }
0x1daa   :  { %4759 = vsyncpa [#allocation19], 1 }
0x1dab   :  { %4760 = vsyncpa [#allocation22], 1 }
0x1dac   :  { %4761 = vsyncpa [#allocation5], 1 }

</bundles_post_ra>
